<compile_context>
chip_gen: v7x
topology: tpu7x:2x2x1
jax: 0.10.0
libtpu: 0.0.40
codegen_flags: <defaults>
</compile_context>

<pallas_src>
import functools

import jax
import jax.numpy as jnp
import numpy as np
from jax.experimental import pallas as pl
from jax.experimental.pallas import tpu as pltpu


# -----------------------------------------------------------------------------
# Host-precomputed, shape-only constants (resident in VMEM inside the kernel).
# -----------------------------------------------------------------------------
@functools.lru_cache(maxsize=None)
def _make_constants(Hin, Win, b_blk):
    H, W = 2 * Hin, 2 * Win
    HWin, HW = Hin * Win, H * W

    q = np.arange(HW)
    h, w = q // W, q % W

    # Nearest-upsample selection (one image): U0[p, q] = 1 iff p == src(q).
    src = (h // 2) * Win + (w // 2)
    U0 = np.zeros((HWin, HW), np.float32)
    U0[src, q] = 1.0
    # Block-diagonal over the batch block (batch packed on lanes).
    U = np.kron(np.eye(b_blk, dtype=np.float32), U0)         # (b*HWin, b*HW)

    # Stride-2 parity (phase) masks: phase k = 2*(h%2) + (w%2).
    phase = (h % 2) * 2 + (w % 2)
    pm0 = (phase[None, :] == np.arange(4)[:, None]).astype(np.float32)
    pm = np.tile(pm0, (1, b_blk))                             # (4, b*HW)

    # 3x3 'same' padding boundary masks for the 9 im2col taps.
    bm0 = np.zeros((9, HW), np.float32)
    for ti in range(9):
        dh, dw = ti // 3 - 1, ti % 3 - 1
        ok = (h + dh >= 0) & (h + dh < H) & (w + dw >= 0) & (w + dw < W)
        bm0[ti] = ok.astype(np.float32)
    bm = np.tile(bm0, (1, b_blk))                             # (9, b*HW)

    return jnp.asarray(U), jnp.asarray(pm), jnp.asarray(bm)


# -----------------------------------------------------------------------------
# Fused kernel: upconv -> attention -> concat -> (3x3 conv + BN + ReLU) x 2.
# Layout: (C, B_BLK*H*W), channels on sublanes, batch+space on lanes.
# -----------------------------------------------------------------------------
def _make_decode_kernel(in_size, out_size, Hin, Win, b_blk):
    Cin, Cout = in_size, out_size
    F_int = out_size // 2
    H, W = 2 * Hin, 2 * Win
    L = b_blk * H * W                           # lane extent at full resolution

    def kernel(prev_ref, x_ref, usel_ref, pm_ref, bm_ref,
               wup_ref, wg_ref, wx_ref, wpsi_ref, wc1_ref, wc2_ref,
               bup_ref, bgx_ref, bpsi_ref, b1_ref, b2_ref, out_ref):
        prev = prev_ref[0]                      # (Cin,  b_blk*HWin)
        x = x_ref[0]                            # (Cout, L)
        pm = pm_ref[...]                        # (4, L) parity masks
        bm = bm_ref[...]                        # (9, L) boundary masks

        # ---- ConvTranspose2d(kernel=2, stride=2) ----------------------------
        # 4 per-phase 1x1 projections of the coarse image, nearest-upsample
        # scatter via the precomputed selection matmul, parity-mask combine.
        t = jnp.dot(wup_ref[...], prev,
                    preferred_element_type=jnp.float32)        # (4*Cout, b*HWin)
        z = jnp.dot(t, usel_ref[...],
                    preferred_element_type=jnp.float32)        # (4*Cout, L)
        up = pm[0:1] * z[0:Cout]
        for k in range(1, 4):
            up = up + pm[k:k + 1] * z[k * Cout:(k + 1) * Cout]
        up = up + bup_ref[...]                                  # (Cout, L)

        # ---- attention gate (1x1 convs, BN folded) ---------------------------
        a = (jnp.dot(wg_ref[...], up, preferred_element_type=jnp.float32)
             + jnp.dot(wx_ref[...], x, preferred_element_type=jnp.float32)
             + bgx_ref[...])
        a = jnp.maximum(a, 0.0)                                 # (F_int, L)
        wpsi = wpsi_ref[...]                                    # (1, F_int)
        psi = bpsi_ref[...] + wpsi[0:1, 0:1] * a[0:1]
        for k in range(1, F_int):
            psi = psi + wpsi[0:1, k:k + 1] * a[k:k + 1]
        psi = jax.nn.sigmoid(psi)                               # (1, L)
        atten = x * psi                                         # (Cout, L)

        # ---- (3x3 conv -> BN -> ReLU) x 2 : per-tap matmul accumulation ------
        def conv3x3(img, wtap_ref, bias):
            acc = jnp.dot(wtap_ref[4], img,
                          preferred_element_type=jnp.float32)   # centre tap
            for ti in range(9):
                if ti == 4:
                    continue
                dh, dw = ti // 3 - 1, ti % 3 - 1
                s = dh * W + dw
                shifted = pltpu.roll(img, (-s) % L, axis=1) * bm[ti:ti + 1]
                acc = acc + jnp.dot(wtap_ref[ti], shifted,
                                    preferred_element_type=jnp.float32)
            return jnp.maximum(acc + bias, 0.0)

        cat = jnp.concatenate([atten, up], axis=0)              # (2*Cout, L)
        h1 = conv3x3(cat, wc1_ref, b1_ref[...])                 # (Cout, L)
        out_ref[0] = conv3x3(h1, wc2_ref, b2_ref[...])          # (Cout, L)

    return kernel


# -----------------------------------------------------------------------------
# Wrapper: NCHW in / NCHW out.  Host only does the batch-block (re)packing.
# -----------------------------------------------------------------------------
def decode_block_pallas(prev_nchw, curr_nchw, kp, in_size, out_size,
                        block_batch=4):
    N, Cin, Hin, Win = prev_nchw.shape
    Nc, Cout, H, W = curr_nchw.shape
    assert (Cin, Cout) == (in_size, out_size)
    assert Nc == N and (H, W) == (2 * Hin, 2 * Win)
    HWin, HW = Hin * Win, H * W

    b_blk = max(1, min(block_batch, N))
    n_pad = (-N) % b_blk
    if n_pad:
        prev_nchw = jnp.concatenate(
            [prev_nchw, jnp.zeros((n_pad, Cin, Hin, Win), prev_nchw.dtype)], 0)
        curr_nchw = jnp.concatenate(
            [curr_nchw, jnp.zeros((n_pad, Cout, H, W), curr_nchw.dtype)], 0)
    Np = N + n_pad
    G = Np // b_blk

    # Pack B_BLK images onto the lane axis: (G, C, b_blk*HW).
    prev_p = (prev_nchw.astype(jnp.float32).reshape(G, b_blk, Cin, HWin)
              .transpose(0, 2, 1, 3).reshape(G, Cin, b_blk * HWin))
    curr_p = (curr_nchw.astype(jnp.float32).reshape(G, b_blk, Cout, HW)
              .transpose(0, 2, 1, 3).reshape(G, Cout, b_blk * HW))

    usel, pm, bm = _make_constants(Hin, Win, b_blk)

    def const(arr):
        nd = arr.ndim
        return pl.BlockSpec(arr.shape, lambda g, _nd=nd: (0,) * _nd)

    kernel = _make_decode_kernel(in_size, out_size, Hin, Win, b_blk)
    out = pl.pallas_call(
        kernel,
        out_shape=jax.ShapeDtypeStruct((G, Cout, b_blk * HW), jnp.float32),
        grid=(G,),
        in_specs=[
            pl.BlockSpec((1, Cin, b_blk * HWin), lambda g: (g, 0, 0)),
            pl.BlockSpec((1, Cout, b_blk * HW), lambda g: (g, 0, 0)),
            const(usel), const(pm), const(bm),
            const(kp['w_up']), const(kp['w_g']), const(kp['w_x']),
            const(kp['w_psi']), const(kp['w_c1']), const(kp['w_c2']),
            const(kp['b_up']), const(kp['b_gx']), const(kp['b_psi']),
            const(kp['b1']), const(kp['b2']),
        ],
        out_specs=pl.BlockSpec((1, Cout, b_blk * HW), lambda g: (g, 0, 0)),
        compiler_params=pltpu.CompilerParams(dimension_semantics=("parallel",)),
    )(prev_p, curr_p, usel, pm, bm,
      kp['w_up'], kp['w_g'], kp['w_x'], kp['w_psi'], kp['w_c1'], kp['w_c2'],
      kp['b_up'], kp['b_gx'], kp['b_psi'], kp['b1'], kp['b2'])

    out = (out.reshape(G, Cout, b_blk, HW).transpose(0, 2, 1, 3)
           .reshape(Np, Cout, H, W))
    return out[:N]


# -----------------------------------------------------------------------------
# Parameter construction (PyTorch layouts) and BN folding (eval mode).
# -----------------------------------------------------------------------------
def make_params(key, in_size, out_size):
    F_int = out_size // 2
    ks = iter(jax.random.split(key, 40))

    def nrm(shape, scale=0.2):
        return scale * jax.random.normal(next(ks), shape, jnp.float32)

    def conv_bn(o, i, k):
        return dict(w=nrm((o, i, k, k)), b=nrm((o,)),
                    gamma=1.0 + nrm((o,), 0.1), beta=nrm((o,), 0.1),
                    mean=nrm((o,), 0.1), var=0.5 + jnp.abs(nrm((o,), 0.3)))

    return {
        'up_w': nrm((in_size, out_size, 2, 2)),   # ConvTranspose2d (I, O, kH, kW)
        'up_b': nrm((out_size,)),
        'wg': conv_bn(F_int, out_size, 1),
        'wx': conv_bn(F_int, out_size, 1),
        'psi': conv_bn(1, F_int, 1),
        'c1': conv_bn(out_size, 2 * out_size, 3),
        'c2': conv_bn(out_size, out_size, 3),
    }


def _bn_scale_shift(c, eps=1e-5):
    s = c['gamma'] / jnp.sqrt(c['var'] + eps)
    return s, c['beta'] - c['mean'] * s


def prepare_kernel_params(p, in_size, out_size):
    Cin, Cout = in_size, out_size
    F_int = out_size // 2

    # ConvTranspose2d weight (Cin, Cout, 2, 2) -> rows (ki*2+kj)*Cout + o.
    w_up = jnp.transpose(p['up_w'], (2, 3, 1, 0)).reshape(4 * Cout, Cin)

    def fold_1x1(c):
        s, t = _bn_scale_shift(c)
        return c['w'][:, :, 0, 0] * s[:, None], c['b'] * s + t

    wg, bg = fold_1x1(p['wg'])
    wx, bx = fold_1x1(p['wx'])
    wpsi, bpsi = fold_1x1(p['psi'])                           # (1, F_int), (1,)

    def fold_3x3_taps(c):
        s, t = _bn_scale_shift(c)
        w = c['w'] * s[:, None, None, None]                   # (O, I, 3, 3)
        w = jnp.transpose(w, (2, 3, 0, 1)).reshape(9, w.shape[0], w.shape[1])
        return w, c['b'] * s + t                              # (9, O, I), (O,)

    w1, b1 = fold_3x3_taps(p['c1'])                           # (9, Cout, 2*Cout)
    w2, b2 = fold_3x3_taps(p['c2'])                           # (9, Cout, Cout)

    col = lambda v: v.astype(jnp.float32).reshape(-1, 1)
    f32 = lambda v: v.astype(jnp.float32)
    return {
        'w_up': f32(w_up), 'w_g': f32(wg), 'w_x': f32(wx), 'w_psi': f32(wpsi),
        'w_c1': f32(w1), 'w_c2': f32(w2),
        'b_up': col(p['up_b']), 'b_gx': col(bg + bx), 'b_psi': col(bpsi),
        'b1': col(b1), 'b2': col(b2),
    }


# -----------------------------------------------------------------------------
# Pure-JAX reference (explicit eval-mode BatchNorm, un-folded weights).
# -----------------------------------------------------------------------------
def decode_block_reference(prev_nchw, curr_nchw, p):
    prev = jnp.transpose(prev_nchw, (0, 2, 3, 1)).astype(jnp.float32)
    curr = jnp.transpose(curr_nchw, (0, 2, 3, 1)).astype(jnp.float32)
    N, Hin, Win, _ = prev.shape
    Cout = curr.shape[-1]

    def bn(x, c, eps=1e-5):
        return (x - c['mean']) / jnp.sqrt(c['var'] + eps) * c['gamma'] + c['beta']

    def conv(x, w, pad):
        w_hwio = jnp.transpose(w, (2, 3, 1, 0))
        return jax.lax.conv_general_dilated(
            x, w_hwio, (1, 1), pad, dimension_numbers=('NHWC', 'HWIO', 'NHWC'))

    # ConvTranspose2d(kernel=2, stride=2)
    r = jnp.einsum('nhwc,cokl->nhwklo', prev, p['up_w'])
    r = jnp.transpose(r, (0, 1, 3, 2, 4, 5)).reshape(N, 2 * Hin, 2 * Win, Cout)
    up = r + p['up_b']

    g1 = bn(conv(up, p['wg']['w'], 'VALID') + p['wg']['b'], p['wg'])
    x1 = bn(conv(curr, p['wx']['w'], 'VALID') + p['wx']['b'], p['wx'])
    a = jax.nn.relu(g1 + x1)
    psi = jax.nn.sigmoid(bn(conv(a, p['psi']['w'], 'VALID') + p['psi']['b'], p['psi']))
    atten = curr * psi

    cat = jnp.concatenate([atten, up], axis=-1)
    h1 = jax.nn.relu(bn(conv(cat, p['c1']['w'], 'SAME') + p['c1']['b'], p['c1']))
    out = jax.nn.relu(bn(conv(h1, p['c2']['w'], 'SAME') + p['c2']['b'], p['c2']))
    return jnp.transpose(out, (0, 3, 1, 2))


if __name__ == "__main__":
    in_size, out_size = 8, 4
    N, Hin, Win = 8, 8, 8
    B_BLK = 4                           # images per grid step (batch-blocking)

    key = jax.random.PRNGKey(0)
    k1, k2, k3 = jax.random.split(key, 3)
    prev_encode = jax.random.normal(k1, (N, in_size, Hin, Win), jnp.float32)
    curr_decode = jax.random.normal(k2, (N, out_size, 2 * Hin, 2 * Win), jnp.float32)

    params = make_params(k3, in_size, out_size)
    kparams = prepare_kernel_params(params, in_size, out_size)

    out = decode_block_pallas(prev_encode, curr_decode, kparams,
                              in_size, out_size, block_batch=B_BLK)
    out = jax.block_until_ready(out)
    assert out.shape == (N, out_size, 2 * Hin, 2 * Win), out.shape

    ref = decode_block_reference(prev_encode, curr_decode, params)
    np.testing.assert_allclose(np.asarray(out), np.asarray(ref), atol=1e-3, rtol=1e-3)

    print("KERNEL_OK")
</pallas_src>

<mosaic_0001>
module attributes {stable_mosaic.version = 11 : i64} {
  func.func @kernel(%arg0: i32, %arg1: memref<1x8x256xf32, #tpu.memory_space<vmem>>, %arg2: memref<1x4x1024xf32, #tpu.memory_space<vmem>>, %arg3: memref<256x1024xf32, #tpu.memory_space<vmem>>, %arg4: memref<4x1024xf32, #tpu.memory_space<vmem>>, %arg5: memref<9x1024xf32, #tpu.memory_space<vmem>>, %arg6: memref<16x8xf32, #tpu.memory_space<vmem>>, %arg7: memref<2x4xf32, #tpu.memory_space<vmem>>, %arg8: memref<2x4xf32, #tpu.memory_space<vmem>>, %arg9: memref<1x2xf32, #tpu.memory_space<vmem>>, %arg10: memref<9x4x8xf32, #tpu.memory_space<vmem>>, %arg11: memref<9x4x4xf32, #tpu.memory_space<vmem>>, %arg12: memref<4x1xf32, #tpu.memory_space<vmem>>, %arg13: memref<2x1xf32, #tpu.memory_space<vmem>>, %arg14: memref<1x1xf32, #tpu.memory_space<vmem>>, %arg15: memref<4x1xf32, #tpu.memory_space<vmem>>, %arg16: memref<4x1xf32, #tpu.memory_space<vmem>>, %arg17: memref<1x4x1024xf32, #tpu.memory_space<vmem>>) attributes {dimension_semantics = [#tpu.dimension_semantics<parallel>], iteration_bounds = array<i64: 2>, scalar_prefetch = 0 : i64, scratch_operands = 0 : i64, tpu.core_type = #tpu.core_type<tc>, window_params = [{transform_indices = @transform_0, window_bounds = array<i64: 1, 8, 256>}, {transform_indices = @transform_1, window_bounds = array<i64: 1, 4, 1024>}, {pipeline_mode = #tpu.pipeline_mode<synchronous>, transform_indices = @transform_2, window_bounds = array<i64: 256, 1024>}, {pipeline_mode = #tpu.pipeline_mode<synchronous>, transform_indices = @transform_3, window_bounds = array<i64: 4, 1024>}, {pipeline_mode = #tpu.pipeline_mode<synchronous>, transform_indices = @transform_4, window_bounds = array<i64: 9, 1024>}, {pipeline_mode = #tpu.pipeline_mode<synchronous>, transform_indices = @transform_5, window_bounds = array<i64: 16, 8>}, {pipeline_mode = #tpu.pipeline_mode<synchronous>, transform_indices = @transform_6, window_bounds = array<i64: 2, 4>}, {pipeline_mode = #tpu.pipeline_mode<synchronous>, transform_indices = @transform_7, window_bounds = array<i64: 2, 4>}, {pipeline_mode = #tpu.pipeline_mode<synchronous>, transform_indices = @transform_8, window_bounds = array<i64: 1, 2>}, {pipeline_mode = #tpu.pipeline_mode<synchronous>, transform_indices = @transform_9, window_bounds = array<i64: 9, 4, 8>}, {pipeline_mode = #tpu.pipeline_mode<synchronous>, transform_indices = @transform_10, window_bounds = array<i64: 9, 4, 4>}, {pipeline_mode = #tpu.pipeline_mode<synchronous>, transform_indices = @transform_11, window_bounds = array<i64: 4, 1>}, {pipeline_mode = #tpu.pipeline_mode<synchronous>, transform_indices = @transform_12, window_bounds = array<i64: 2, 1>}, {pipeline_mode = #tpu.pipeline_mode<synchronous>, transform_indices = @transform_13, window_bounds = array<i64: 1, 1>}, {pipeline_mode = #tpu.pipeline_mode<synchronous>, transform_indices = @transform_14, window_bounds = array<i64: 4, 1>}, {pipeline_mode = #tpu.pipeline_mode<synchronous>, transform_indices = @transform_15, window_bounds = array<i64: 4, 1>}, {transform_indices = @transform_16, window_bounds = array<i64: 1, 4, 1024>}]} {
    %c0 = arith.constant 0 : index
    %c0_0 = arith.constant 0 : index
    %c0_1 = arith.constant 0 : index
    %0 = vector.load %arg1[%c0, %c0_0, %c0_1] : memref<1x8x256xf32, #tpu.memory_space<vmem>>, vector<1x8x256xf32>
    %1 = vector.shape_cast %0 : vector<1x8x256xf32> to vector<8x256xf32>
    %c0_2 = arith.constant 0 : index
    %c0_3 = arith.constant 0 : index
    %c0_4 = arith.constant 0 : index
    %2 = vector.load %arg2[%c0_2, %c0_3, %c0_4] : memref<1x4x1024xf32, #tpu.memory_space<vmem>>, vector<1x4x1024xf32>
    %3 = vector.shape_cast %2 : vector<1x4x1024xf32> to vector<4x1024xf32>
    %c0_5 = arith.constant 0 : index
    %c0_6 = arith.constant 0 : index
    %4 = vector.load %arg4[%c0_5, %c0_6] : memref<4x1024xf32, #tpu.memory_space<vmem>>, vector<4x1024xf32>
    %c0_7 = arith.constant 0 : index
    %c0_8 = arith.constant 0 : index
    %5 = vector.load %arg5[%c0_7, %c0_8] : memref<9x1024xf32, #tpu.memory_space<vmem>>, vector<9x1024xf32>
    %c0_9 = arith.constant 0 : index
    %c0_10 = arith.constant 0 : index
    %6 = vector.load %arg6[%c0_9, %c0_10] : memref<16x8xf32, #tpu.memory_space<vmem>>, vector<16x8xf32>
    %cst = arith.constant dense<0.000000e+00> : vector<16x256xf32>
    %7 = tpu.matmul %6, %1, %cst {dimension_numbers = #tpu.dot_dimension_numbers<[1], [0], [0], [1], [0, 0, 1, 1], [], []>} : vector<16x8xf32>, vector<8x256xf32>, vector<16x256xf32> -> vector<16x256xf32>
    %c0_11 = arith.constant 0 : index
    %c0_12 = arith.constant 0 : index
    %8 = vector.load %arg3[%c0_11, %c0_12] : memref<256x1024xf32, #tpu.memory_space<vmem>>, vector<256x1024xf32>
    %cst_13 = arith.constant dense<0.000000e+00> : vector<16x1024xf32>
    %9 = tpu.matmul %7, %8, %cst_13 {dimension_numbers = #tpu.dot_dimension_numbers<[1], [0], [0], [1], [0, 0, 1, 1], [], []>} : vector<16x256xf32>, vector<256x1024xf32>, vector<16x1024xf32> -> vector<16x1024xf32>
    %10 = vector.extract_strided_slice %4 {offsets = [0, 0], sizes = [1, 1024], strides = [1, 1]} : vector<4x1024xf32> to vector<1x1024xf32>
    %11 = vector.extract_strided_slice %9 {offsets = [0, 0], sizes = [4, 1024], strides = [1, 1]} : vector<16x1024xf32> to vector<4x1024xf32>
    %12 = vector.broadcast %10 : vector<1x1024xf32> to vector<4x1024xf32>
    %13 = arith.mulf %12, %11 : vector<4x1024xf32>
    %14 = vector.extract_strided_slice %4 {offsets = [1, 0], sizes = [1, 1024], strides = [1, 1]} : vector<4x1024xf32> to vector<1x1024xf32>
    %15 = vector.extract_strided_slice %9 {offsets = [4, 0], sizes = [4, 1024], strides = [1, 1]} : vector<16x1024xf32> to vector<4x1024xf32>
    %16 = vector.broadcast %14 : vector<1x1024xf32> to vector<4x1024xf32>
    %17 = arith.mulf %16, %15 : vector<4x1024xf32>
    %18 = arith.addf %13, %17 : vector<4x1024xf32>
    %19 = vector.extract_strided_slice %4 {offsets = [2, 0], sizes = [1, 1024], strides = [1, 1]} : vector<4x1024xf32> to vector<1x1024xf32>
    %20 = vector.extract_strided_slice %9 {offsets = [8, 0], sizes = [4, 1024], strides = [1, 1]} : vector<16x1024xf32> to vector<4x1024xf32>
    %21 = vector.broadcast %19 : vector<1x1024xf32> to vector<4x1024xf32>
    %22 = arith.mulf %21, %20 : vector<4x1024xf32>
    %23 = arith.addf %18, %22 : vector<4x1024xf32>
    %24 = vector.extract_strided_slice %4 {offsets = [3, 0], sizes = [1, 1024], strides = [1, 1]} : vector<4x1024xf32> to vector<1x1024xf32>
    %25 = vector.extract_strided_slice %9 {offsets = [12, 0], sizes = [4, 1024], strides = [1, 1]} : vector<16x1024xf32> to vector<4x1024xf32>
    %26 = vector.broadcast %24 : vector<1x1024xf32> to vector<4x1024xf32>
    %27 = arith.mulf %26, %25 : vector<4x1024xf32>
    %28 = arith.addf %23, %27 : vector<4x1024xf32>
    %c0_14 = arith.constant 0 : index
    %c0_15 = arith.constant 0 : index
    %29 = vector.load %arg12[%c0_14, %c0_15] : memref<4x1xf32, #tpu.memory_space<vmem>>, vector<4x1xf32>
    %30 = vector.broadcast %29 : vector<4x1xf32> to vector<4x1024xf32>
    %31 = arith.addf %28, %30 : vector<4x1024xf32>
    %c0_16 = arith.constant 0 : index
    %c0_17 = arith.constant 0 : index
    %32 = vector.load %arg7[%c0_16, %c0_17] : memref<2x4xf32, #tpu.memory_space<vmem>>, vector<2x4xf32>
    %cst_18 = arith.constant dense<0.000000e+00> : vector<2x1024xf32>
    %33 = tpu.matmul %32, %31, %cst_18 {dimension_numbers = #tpu.dot_dimension_numbers<[1], [0], [0], [1], [0, 0, 1, 1], [], []>} : vector<2x4xf32>, vector<4x1024xf32>, vector<2x1024xf32> -> vector<2x1024xf32>
    %c0_19 = arith.constant 0 : index
    %c0_20 = arith.constant 0 : index
    %34 = vector.load %arg8[%c0_19, %c0_20] : memref<2x4xf32, #tpu.memory_space<vmem>>, vector<2x4xf32>
    %cst_21 = arith.constant dense<0.000000e+00> : vector<2x1024xf32>
    %35 = tpu.matmul %34, %3, %cst_21 {dimension_numbers = #tpu.dot_dimension_numbers<[1], [0], [0], [1], [0, 0, 1, 1], [], []>} : vector<2x4xf32>, vector<4x1024xf32>, vector<2x1024xf32> -> vector<2x1024xf32>
    %36 = arith.addf %33, %35 : vector<2x1024xf32>
    %c0_22 = arith.constant 0 : index
    %c0_23 = arith.constant 0 : index
    %37 = vector.load %arg13[%c0_22, %c0_23] : memref<2x1xf32, #tpu.memory_space<vmem>>, vector<2x1xf32>
    %38 = vector.broadcast %37 : vector<2x1xf32> to vector<2x1024xf32>
    %39 = arith.addf %36, %38 : vector<2x1024xf32>
    %cst_24 = arith.constant 0.000000e+00 : f32
    %40 = vector.broadcast %cst_24 : f32 to vector<2x1024xf32>
    %41 = arith.maximumf %39, %40 : vector<2x1024xf32>
    %c0_25 = arith.constant 0 : index
    %c0_26 = arith.constant 0 : index
    %42 = vector.load %arg9[%c0_25, %c0_26] : memref<1x2xf32, #tpu.memory_space<vmem>>, vector<1x2xf32>
    %c0_27 = arith.constant 0 : index
    %c0_28 = arith.constant 0 : index
    %43 = vector.load %arg14[%c0_27, %c0_28] : memref<1x1xf32, #tpu.memory_space<vmem>>, vector<1x1xf32>
    %44 = vector.extract_strided_slice %42 {offsets = [0, 0], sizes = [1, 1], strides = [1, 1]} : vector<1x2xf32> to vector<1x1xf32>
    %45 = vector.extract_strided_slice %41 {offsets = [0, 0], sizes = [1, 1024], strides = [1, 1]} : vector<2x1024xf32> to vector<1x1024xf32>
    %46 = vector.broadcast %44 : vector<1x1xf32> to vector<1x1024xf32>
    %47 = arith.mulf %46, %45 : vector<1x1024xf32>
    %48 = vector.broadcast %43 : vector<1x1xf32> to vector<1x1024xf32>
    %49 = arith.addf %48, %47 : vector<1x1024xf32>
    %50 = vector.extract_strided_slice %42 {offsets = [0, 1], sizes = [1, 1], strides = [1, 1]} : vector<1x2xf32> to vector<1x1xf32>
    %51 = vector.extract_strided_slice %41 {offsets = [1, 0], sizes = [1, 1024], strides = [1, 1]} : vector<2x1024xf32> to vector<1x1024xf32>
    %52 = vector.broadcast %50 : vector<1x1xf32> to vector<1x1024xf32>
    %53 = arith.mulf %52, %51 : vector<1x1024xf32>
    %54 = arith.addf %49, %53 : vector<1x1024xf32>
    %55 = arith.negf %54 : vector<1x1024xf32>
    %56 = math.exp %55 : vector<1x1024xf32>
    %cst_29 = arith.constant 1.000000e+00 : f32
    %57 = vector.broadcast %cst_29 : f32 to vector<1x1024xf32>
    %58 = arith.addf %57, %56 : vector<1x1024xf32>
    %59 = arith.divf %57, %58 : vector<1x1024xf32>
    %60 = vector.broadcast %59 : vector<1x1024xf32> to vector<4x1024xf32>
    %61 = arith.mulf %3, %60 : vector<4x1024xf32>
    %62 = tpu.concatenate %61, %31 in 0 : vector<4x1024xf32>, vector<4x1024xf32> -> vector<8x1024xf32>
    %c0_30 = arith.constant 0 : index
    %c0_31 = arith.constant 0 : index
    %63 = vector.load %arg15[%c0_30, %c0_31] : memref<4x1xf32, #tpu.memory_space<vmem>>, vector<4x1xf32>
    %c4 = arith.constant 4 : index
    %c0_32 = arith.constant 0 : index
    %c0_33 = arith.constant 0 : index
    %64 = vector.load %arg10[%c4, %c0_32, %c0_33] : memref<9x4x8xf32, #tpu.memory_space<vmem>>, vector<1x4x8xf32>
    %65 = vector.shape_cast %64 : vector<1x4x8xf32> to vector<4x8xf32>
    %cst_34 = arith.constant dense<0.000000e+00> : vector<4x1024xf32>
    %66 = tpu.matmul %65, %62, %cst_34 {dimension_numbers = #tpu.dot_dimension_numbers<[1], [0], [0], [1], [0, 0, 1, 1], [], []>} : vector<4x8xf32>, vector<8x1024xf32>, vector<4x1024xf32> -> vector<4x1024xf32>
    %c17_i32 = arith.constant 17 : i32
    %67 = tpu.dynamic_rotate %62 by %c17_i32 dim 1 : vector<8x1024xf32>, i32 -> vector<8x1024xf32>
    %68 = vector.extract_strided_slice %5 {offsets = [0, 0], sizes = [1, 1024], strides = [1, 1]} : vector<9x1024xf32> to vector<1x1024xf32>
    %69 = vector.broadcast %68 : vector<1x1024xf32> to vector<8x1024xf32>
    %70 = arith.mulf %67, %69 : vector<8x1024xf32>
    %c0_35 = arith.constant 0 : index
    %c0_36 = arith.constant 0 : index
    %c0_37 = arith.constant 0 : index
    %71 = vector.load %arg10[%c0_35, %c0_36, %c0_37] : memref<9x4x8xf32, #tpu.memory_space<vmem>>, vector<1x4x8xf32>
    %72 = vector.shape_cast %71 : vector<1x4x8xf32> to vector<4x8xf32>
    %cst_38 = arith.constant dense<0.000000e+00> : vector<4x1024xf32>
    %73 = tpu.matmul %72, %70, %cst_38 {dimension_numbers = #tpu.dot_dimension_numbers<[1], [0], [0], [1], [0, 0, 1, 1], [], []>} : vector<4x8xf32>, vector<8x1024xf32>, vector<4x1024xf32> -> vector<4x1024xf32>
    %74 = arith.addf %66, %73 : vector<4x1024xf32>
    %c16_i32 = arith.constant 16 : i32
    %75 = tpu.dynamic_rotate %62 by %c16_i32 dim 1 : vector<8x1024xf32>, i32 -> vector<8x1024xf32>
    %76 = vector.extract_strided_slice %5 {offsets = [1, 0], sizes = [1, 1024], strides = [1, 1]} : vector<9x1024xf32> to vector<1x1024xf32>
    %77 = vector.broadcast %76 : vector<1x1024xf32> to vector<8x1024xf32>
    %78 = arith.mulf %75, %77 : vector<8x1024xf32>
    %c1 = arith.constant 1 : index
    %c0_39 = arith.constant 0 : index
    %c0_40 = arith.constant 0 : index
    %79 = vector.load %arg10[%c1, %c0_39, %c0_40] : memref<9x4x8xf32, #tpu.memory_space<vmem>>, vector<1x4x8xf32>
    %80 = vector.shape_cast %79 : vector<1x4x8xf32> to vector<4x8xf32>
    %cst_41 = arith.constant dense<0.000000e+00> : vector<4x1024xf32>
    %81 = tpu.matmul %80, %78, %cst_41 {dimension_numbers = #tpu.dot_dimension_numbers<[1], [0], [0], [1], [0, 0, 1, 1], [], []>} : vector<4x8xf32>, vector<8x1024xf32>, vector<4x1024xf32> -> vector<4x1024xf32>
    %82 = arith.addf %74, %81 : vector<4x1024xf32>
    %c15_i32 = arith.constant 15 : i32
    %83 = tpu.dynamic_rotate %62 by %c15_i32 dim 1 : vector<8x1024xf32>, i32 -> vector<8x1024xf32>
    %84 = vector.extract_strided_slice %5 {offsets = [2, 0], sizes = [1, 1024], strides = [1, 1]} : vector<9x1024xf32> to vector<1x1024xf32>
    %85 = vector.broadcast %84 : vector<1x1024xf32> to vector<8x1024xf32>
    %86 = arith.mulf %83, %85 : vector<8x1024xf32>
    %c2 = arith.constant 2 : index
    %c0_42 = arith.constant 0 : index
    %c0_43 = arith.constant 0 : index
    %87 = vector.load %arg10[%c2, %c0_42, %c0_43] : memref<9x4x8xf32, #tpu.memory_space<vmem>>, vector<1x4x8xf32>
    %88 = vector.shape_cast %87 : vector<1x4x8xf32> to vector<4x8xf32>
    %cst_44 = arith.constant dense<0.000000e+00> : vector<4x1024xf32>
    %89 = tpu.matmul %88, %86, %cst_44 {dimension_numbers = #tpu.dot_dimension_numbers<[1], [0], [0], [1], [0, 0, 1, 1], [], []>} : vector<4x8xf32>, vector<8x1024xf32>, vector<4x1024xf32> -> vector<4x1024xf32>
    %90 = arith.addf %82, %89 : vector<4x1024xf32>
    %c1_i32 = arith.constant 1 : i32
    %91 = tpu.dynamic_rotate %62 by %c1_i32 dim 1 : vector<8x1024xf32>, i32 -> vector<8x1024xf32>
    %92 = vector.extract_strided_slice %5 {offsets = [3, 0], sizes = [1, 1024], strides = [1, 1]} : vector<9x1024xf32> to vector<1x1024xf32>
    %93 = vector.broadcast %92 : vector<1x1024xf32> to vector<8x1024xf32>
    %94 = arith.mulf %91, %93 : vector<8x1024xf32>
    %c3 = arith.constant 3 : index
    %c0_45 = arith.constant 0 : index
    %c0_46 = arith.constant 0 : index
    %95 = vector.load %arg10[%c3, %c0_45, %c0_46] : memref<9x4x8xf32, #tpu.memory_space<vmem>>, vector<1x4x8xf32>
    %96 = vector.shape_cast %95 : vector<1x4x8xf32> to vector<4x8xf32>
    %cst_47 = arith.constant dense<0.000000e+00> : vector<4x1024xf32>
    %97 = tpu.matmul %96, %94, %cst_47 {dimension_numbers = #tpu.dot_dimension_numbers<[1], [0], [0], [1], [0, 0, 1, 1], [], []>} : vector<4x8xf32>, vector<8x1024xf32>, vector<4x1024xf32> -> vector<4x1024xf32>
    %98 = arith.addf %90, %97 : vector<4x1024xf32>
    %c1023_i32 = arith.constant 1023 : i32
    %99 = tpu.dynamic_rotate %62 by %c1023_i32 dim 1 : vector<8x1024xf32>, i32 -> vector<8x1024xf32>
    %100 = vector.extract_strided_slice %5 {offsets = [5, 0], sizes = [1, 1024], strides = [1, 1]} : vector<9x1024xf32> to vector<1x1024xf32>
    %101 = vector.broadcast %100 : vector<1x1024xf32> to vector<8x1024xf32>
    %102 = arith.mulf %99, %101 : vector<8x1024xf32>
    %c5 = arith.constant 5 : index
    %c0_48 = arith.constant 0 : index
    %c0_49 = arith.constant 0 : index
    %103 = vector.load %arg10[%c5, %c0_48, %c0_49] : memref<9x4x8xf32, #tpu.memory_space<vmem>>, vector<1x4x8xf32>
    %104 = vector.shape_cast %103 : vector<1x4x8xf32> to vector<4x8xf32>
    %cst_50 = arith.constant dense<0.000000e+00> : vector<4x1024xf32>
    %105 = tpu.matmul %104, %102, %cst_50 {dimension_numbers = #tpu.dot_dimension_numbers<[1], [0], [0], [1], [0, 0, 1, 1], [], []>} : vector<4x8xf32>, vector<8x1024xf32>, vector<4x1024xf32> -> vector<4x1024xf32>
    %106 = arith.addf %98, %105 : vector<4x1024xf32>
    %c1009_i32 = arith.constant 1009 : i32
    %107 = tpu.dynamic_rotate %62 by %c1009_i32 dim 1 : vector<8x1024xf32>, i32 -> vector<8x1024xf32>
    %108 = vector.extract_strided_slice %5 {offsets = [6, 0], sizes = [1, 1024], strides = [1, 1]} : vector<9x1024xf32> to vector<1x1024xf32>
    %109 = vector.broadcast %108 : vector<1x1024xf32> to vector<8x1024xf32>
    %110 = arith.mulf %107, %109 : vector<8x1024xf32>
    %c6 = arith.constant 6 : index
    %c0_51 = arith.constant 0 : index
    %c0_52 = arith.constant 0 : index
    %111 = vector.load %arg10[%c6, %c0_51, %c0_52] : memref<9x4x8xf32, #tpu.memory_space<vmem>>, vector<1x4x8xf32>
    %112 = vector.shape_cast %111 : vector<1x4x8xf32> to vector<4x8xf32>
    %cst_53 = arith.constant dense<0.000000e+00> : vector<4x1024xf32>
    %113 = tpu.matmul %112, %110, %cst_53 {dimension_numbers = #tpu.dot_dimension_numbers<[1], [0], [0], [1], [0, 0, 1, 1], [], []>} : vector<4x8xf32>, vector<8x1024xf32>, vector<4x1024xf32> -> vector<4x1024xf32>
    %114 = arith.addf %106, %113 : vector<4x1024xf32>
    %c1008_i32 = arith.constant 1008 : i32
    %115 = tpu.dynamic_rotate %62 by %c1008_i32 dim 1 : vector<8x1024xf32>, i32 -> vector<8x1024xf32>
    %116 = vector.extract_strided_slice %5 {offsets = [7, 0], sizes = [1, 1024], strides = [1, 1]} : vector<9x1024xf32> to vector<1x1024xf32>
    %117 = vector.broadcast %116 : vector<1x1024xf32> to vector<8x1024xf32>
    %118 = arith.mulf %115, %117 : vector<8x1024xf32>
    %c7 = arith.constant 7 : index
    %c0_54 = arith.constant 0 : index
    %c0_55 = arith.constant 0 : index
    %119 = vector.load %arg10[%c7, %c0_54, %c0_55] : memref<9x4x8xf32, #tpu.memory_space<vmem>>, vector<1x4x8xf32>
    %120 = vector.shape_cast %119 : vector<1x4x8xf32> to vector<4x8xf32>
    %cst_56 = arith.constant dense<0.000000e+00> : vector<4x1024xf32>
    %121 = tpu.matmul %120, %118, %cst_56 {dimension_numbers = #tpu.dot_dimension_numbers<[1], [0], [0], [1], [0, 0, 1, 1], [], []>} : vector<4x8xf32>, vector<8x1024xf32>, vector<4x1024xf32> -> vector<4x1024xf32>
    %122 = arith.addf %114, %121 : vector<4x1024xf32>
    %c1007_i32 = arith.constant 1007 : i32
    %123 = tpu.dynamic_rotate %62 by %c1007_i32 dim 1 : vector<8x1024xf32>, i32 -> vector<8x1024xf32>
    %124 = vector.extract_strided_slice %5 {offsets = [8, 0], sizes = [1, 1024], strides = [1, 1]} : vector<9x1024xf32> to vector<1x1024xf32>
    %125 = vector.broadcast %124 : vector<1x1024xf32> to vector<8x1024xf32>
    %126 = arith.mulf %123, %125 : vector<8x1024xf32>
    %c8 = arith.constant 8 : index
    %c0_57 = arith.constant 0 : index
    %c0_58 = arith.constant 0 : index
    %127 = vector.load %arg10[%c8, %c0_57, %c0_58] : memref<9x4x8xf32, #tpu.memory_space<vmem>>, vector<1x4x8xf32>
    %128 = vector.shape_cast %127 : vector<1x4x8xf32> to vector<4x8xf32>
    %cst_59 = arith.constant dense<0.000000e+00> : vector<4x1024xf32>
    %129 = tpu.matmul %128, %126, %cst_59 {dimension_numbers = #tpu.dot_dimension_numbers<[1], [0], [0], [1], [0, 0, 1, 1], [], []>} : vector<4x8xf32>, vector<8x1024xf32>, vector<4x1024xf32> -> vector<4x1024xf32>
    %130 = arith.addf %122, %129 : vector<4x1024xf32>
    %131 = vector.broadcast %63 : vector<4x1xf32> to vector<4x1024xf32>
    %132 = arith.addf %130, %131 : vector<4x1024xf32>
    %cst_60 = arith.constant 0.000000e+00 : f32
    %133 = vector.broadcast %cst_60 : f32 to vector<4x1024xf32>
    %134 = arith.maximumf %132, %133 : vector<4x1024xf32>
    %c0_61 = arith.constant 0 : index
    %c0_62 = arith.constant 0 : index
    %135 = vector.load %arg16[%c0_61, %c0_62] : memref<4x1xf32, #tpu.memory_space<vmem>>, vector<4x1xf32>
    %c4_63 = arith.constant 4 : index
    %c0_64 = arith.constant 0 : index
    %c0_65 = arith.constant 0 : index
    %136 = vector.load %arg11[%c4_63, %c0_64, %c0_65] : memref<9x4x4xf32, #tpu.memory_space<vmem>>, vector<1x4x4xf32>
    %137 = vector.shape_cast %136 : vector<1x4x4xf32> to vector<4x4xf32>
    %cst_66 = arith.constant dense<0.000000e+00> : vector<4x1024xf32>
    %138 = tpu.matmul %137, %134, %cst_66 {dimension_numbers = #tpu.dot_dimension_numbers<[1], [0], [0], [1], [0, 0, 1, 1], [], []>} : vector<4x4xf32>, vector<4x1024xf32>, vector<4x1024xf32> -> vector<4x1024xf32>
    %c17_i32_67 = arith.constant 17 : i32
    %139 = tpu.dynamic_rotate %134 by %c17_i32_67 dim 1 : vector<4x1024xf32>, i32 -> vector<4x1024xf32>
    %140 = vector.extract_strided_slice %5 {offsets = [0, 0], sizes = [1, 1024], strides = [1, 1]} : vector<9x1024xf32> to vector<1x1024xf32>
    %141 = vector.broadcast %140 : vector<1x1024xf32> to vector<4x1024xf32>
    %142 = arith.mulf %139, %141 : vector<4x1024xf32>
    %c0_68 = arith.constant 0 : index
    %c0_69 = arith.constant 0 : index
    %c0_70 = arith.constant 0 : index
    %143 = vector.load %arg11[%c0_68, %c0_69, %c0_70] : memref<9x4x4xf32, #tpu.memory_space<vmem>>, vector<1x4x4xf32>
    %144 = vector.shape_cast %143 : vector<1x4x4xf32> to vector<4x4xf32>
    %cst_71 = arith.constant dense<0.000000e+00> : vector<4x1024xf32>
    %145 = tpu.matmul %144, %142, %cst_71 {dimension_numbers = #tpu.dot_dimension_numbers<[1], [0], [0], [1], [0, 0, 1, 1], [], []>} : vector<4x4xf32>, vector<4x1024xf32>, vector<4x1024xf32> -> vector<4x1024xf32>
    %146 = arith.addf %138, %145 : vector<4x1024xf32>
    %c16_i32_72 = arith.constant 16 : i32
    %147 = tpu.dynamic_rotate %134 by %c16_i32_72 dim 1 : vector<4x1024xf32>, i32 -> vector<4x1024xf32>
    %148 = vector.extract_strided_slice %5 {offsets = [1, 0], sizes = [1, 1024], strides = [1, 1]} : vector<9x1024xf32> to vector<1x1024xf32>
    %149 = vector.broadcast %148 : vector<1x1024xf32> to vector<4x1024xf32>
    %150 = arith.mulf %147, %149 : vector<4x1024xf32>
    %c1_73 = arith.constant 1 : index
    %c0_74 = arith.constant 0 : index
    %c0_75 = arith.constant 0 : index
    %151 = vector.load %arg11[%c1_73, %c0_74, %c0_75] : memref<9x4x4xf32, #tpu.memory_space<vmem>>, vector<1x4x4xf32>
    %152 = vector.shape_cast %151 : vector<1x4x4xf32> to vector<4x4xf32>
    %cst_76 = arith.constant dense<0.000000e+00> : vector<4x1024xf32>
    %153 = tpu.matmul %152, %150, %cst_76 {dimension_numbers = #tpu.dot_dimension_numbers<[1], [0], [0], [1], [0, 0, 1, 1], [], []>} : vector<4x4xf32>, vector<4x1024xf32>, vector<4x1024xf32> -> vector<4x1024xf32>
    %154 = arith.addf %146, %153 : vector<4x1024xf32>
    %c15_i32_77 = arith.constant 15 : i32
    %155 = tpu.dynamic_rotate %134 by %c15_i32_77 dim 1 : vector<4x1024xf32>, i32 -> vector<4x1024xf32>
    %156 = vector.extract_strided_slice %5 {offsets = [2, 0], sizes = [1, 1024], strides = [1, 1]} : vector<9x1024xf32> to vector<1x1024xf32>
    %157 = vector.broadcast %156 : vector<1x1024xf32> to vector<4x1024xf32>
    %158 = arith.mulf %155, %157 : vector<4x1024xf32>
    %c2_78 = arith.constant 2 : index
    %c0_79 = arith.constant 0 : index
    %c0_80 = arith.constant 0 : index
    %159 = vector.load %arg11[%c2_78, %c0_79, %c0_80] : memref<9x4x4xf32, #tpu.memory_space<vmem>>, vector<1x4x4xf32>
    %160 = vector.shape_cast %159 : vector<1x4x4xf32> to vector<4x4xf32>
    %cst_81 = arith.constant dense<0.000000e+00> : vector<4x1024xf32>
    %161 = tpu.matmul %160, %158, %cst_81 {dimension_numbers = #tpu.dot_dimension_numbers<[1], [0], [0], [1], [0, 0, 1, 1], [], []>} : vector<4x4xf32>, vector<4x1024xf32>, vector<4x1024xf32> -> vector<4x1024xf32>
    %162 = arith.addf %154, %161 : vector<4x1024xf32>
    %c1_i32_82 = arith.constant 1 : i32
    %163 = tpu.dynamic_rotate %134 by %c1_i32_82 dim 1 : vector<4x1024xf32>, i32 -> vector<4x1024xf32>
    %164 = vector.extract_strided_slice %5 {offsets = [3, 0], sizes = [1, 1024], strides = [1, 1]} : vector<9x1024xf32> to vector<1x1024xf32>
    %165 = vector.broadcast %164 : vector<1x1024xf32> to vector<4x1024xf32>
    %166 = arith.mulf %163, %165 : vector<4x1024xf32>
    %c3_83 = arith.constant 3 : index
    %c0_84 = arith.constant 0 : index
    %c0_85 = arith.constant 0 : index
    %167 = vector.load %arg11[%c3_83, %c0_84, %c0_85] : memref<9x4x4xf32, #tpu.memory_space<vmem>>, vector<1x4x4xf32>
    %168 = vector.shape_cast %167 : vector<1x4x4xf32> to vector<4x4xf32>
    %cst_86 = arith.constant dense<0.000000e+00> : vector<4x1024xf32>
    %169 = tpu.matmul %168, %166, %cst_86 {dimension_numbers = #tpu.dot_dimension_numbers<[1], [0], [0], [1], [0, 0, 1, 1], [], []>} : vector<4x4xf32>, vector<4x1024xf32>, vector<4x1024xf32> -> vector<4x1024xf32>
    %170 = arith.addf %162, %169 : vector<4x1024xf32>
    %c1023_i32_87 = arith.constant 1023 : i32
    %171 = tpu.dynamic_rotate %134 by %c1023_i32_87 dim 1 : vector<4x1024xf32>, i32 -> vector<4x1024xf32>
    %172 = vector.extract_strided_slice %5 {offsets = [5, 0], sizes = [1, 1024], strides = [1, 1]} : vector<9x1024xf32> to vector<1x1024xf32>
    %173 = vector.broadcast %172 : vector<1x1024xf32> to vector<4x1024xf32>
    %174 = arith.mulf %171, %173 : vector<4x1024xf32>
    %c5_88 = arith.constant 5 : index
    %c0_89 = arith.constant 0 : index
    %c0_90 = arith.constant 0 : index
    %175 = vector.load %arg11[%c5_88, %c0_89, %c0_90] : memref<9x4x4xf32, #tpu.memory_space<vmem>>, vector<1x4x4xf32>
    %176 = vector.shape_cast %175 : vector<1x4x4xf32> to vector<4x4xf32>
    %cst_91 = arith.constant dense<0.000000e+00> : vector<4x1024xf32>
    %177 = tpu.matmul %176, %174, %cst_91 {dimension_numbers = #tpu.dot_dimension_numbers<[1], [0], [0], [1], [0, 0, 1, 1], [], []>} : vector<4x4xf32>, vector<4x1024xf32>, vector<4x1024xf32> -> vector<4x1024xf32>
    %178 = arith.addf %170, %177 : vector<4x1024xf32>
    %c1009_i32_92 = arith.constant 1009 : i32
    %179 = tpu.dynamic_rotate %134 by %c1009_i32_92 dim 1 : vector<4x1024xf32>, i32 -> vector<4x1024xf32>
    %180 = vector.extract_strided_slice %5 {offsets = [6, 0], sizes = [1, 1024], strides = [1, 1]} : vector<9x1024xf32> to vector<1x1024xf32>
    %181 = vector.broadcast %180 : vector<1x1024xf32> to vector<4x1024xf32>
    %182 = arith.mulf %179, %181 : vector<4x1024xf32>
    %c6_93 = arith.constant 6 : index
    %c0_94 = arith.constant 0 : index
    %c0_95 = arith.constant 0 : index
    %183 = vector.load %arg11[%c6_93, %c0_94, %c0_95] : memref<9x4x4xf32, #tpu.memory_space<vmem>>, vector<1x4x4xf32>
    %184 = vector.shape_cast %183 : vector<1x4x4xf32> to vector<4x4xf32>
    %cst_96 = arith.constant dense<0.000000e+00> : vector<4x1024xf32>
    %185 = tpu.matmul %184, %182, %cst_96 {dimension_numbers = #tpu.dot_dimension_numbers<[1], [0], [0], [1], [0, 0, 1, 1], [], []>} : vector<4x4xf32>, vector<4x1024xf32>, vector<4x1024xf32> -> vector<4x1024xf32>
    %186 = arith.addf %178, %185 : vector<4x1024xf32>
    %c1008_i32_97 = arith.constant 1008 : i32
    %187 = tpu.dynamic_rotate %134 by %c1008_i32_97 dim 1 : vector<4x1024xf32>, i32 -> vector<4x1024xf32>
    %188 = vector.extract_strided_slice %5 {offsets = [7, 0], sizes = [1, 1024], strides = [1, 1]} : vector<9x1024xf32> to vector<1x1024xf32>
    %189 = vector.broadcast %188 : vector<1x1024xf32> to vector<4x1024xf32>
    %190 = arith.mulf %187, %189 : vector<4x1024xf32>
    %c7_98 = arith.constant 7 : index
    %c0_99 = arith.constant 0 : index
    %c0_100 = arith.constant 0 : index
    %191 = vector.load %arg11[%c7_98, %c0_99, %c0_100] : memref<9x4x4xf32, #tpu.memory_space<vmem>>, vector<1x4x4xf32>
    %192 = vector.shape_cast %191 : vector<1x4x4xf32> to vector<4x4xf32>
    %cst_101 = arith.constant dense<0.000000e+00> : vector<4x1024xf32>
    %193 = tpu.matmul %192, %190, %cst_101 {dimension_numbers = #tpu.dot_dimension_numbers<[1], [0], [0], [1], [0, 0, 1, 1], [], []>} : vector<4x4xf32>, vector<4x1024xf32>, vector<4x1024xf32> -> vector<4x1024xf32>
    %194 = arith.addf %186, %193 : vector<4x1024xf32>
    %c1007_i32_102 = arith.constant 1007 : i32
    %195 = tpu.dynamic_rotate %134 by %c1007_i32_102 dim 1 : vector<4x1024xf32>, i32 -> vector<4x1024xf32>
    %196 = vector.extract_strided_slice %5 {offsets = [8, 0], sizes = [1, 1024], strides = [1, 1]} : vector<9x1024xf32> to vector<1x1024xf32>
    %197 = vector.broadcast %196 : vector<1x1024xf32> to vector<4x1024xf32>
    %198 = arith.mulf %195, %197 : vector<4x1024xf32>
    %c8_103 = arith.constant 8 : index
    %c0_104 = arith.constant 0 : index
    %c0_105 = arith.constant 0 : index
    %199 = vector.load %arg11[%c8_103, %c0_104, %c0_105] : memref<9x4x4xf32, #tpu.memory_space<vmem>>, vector<1x4x4xf32>
    %200 = vector.shape_cast %199 : vector<1x4x4xf32> to vector<4x4xf32>
    %cst_106 = arith.constant dense<0.000000e+00> : vector<4x1024xf32>
    %201 = tpu.matmul %200, %198, %cst_106 {dimension_numbers = #tpu.dot_dimension_numbers<[1], [0], [0], [1], [0, 0, 1, 1], [], []>} : vector<4x4xf32>, vector<4x1024xf32>, vector<4x1024xf32> -> vector<4x1024xf32>
    %202 = arith.addf %194, %201 : vector<4x1024xf32>
    %203 = vector.broadcast %135 : vector<4x1xf32> to vector<4x1024xf32>
    %204 = arith.addf %202, %203 : vector<4x1024xf32>
    %cst_107 = arith.constant 0.000000e+00 : f32
    %205 = vector.broadcast %cst_107 : f32 to vector<4x1024xf32>
    %206 = arith.maximumf %204, %205 : vector<4x1024xf32>
    %c0_108 = arith.constant 0 : index
    %c0_109 = arith.constant 0 : index
    %c0_110 = arith.constant 0 : index
    %207 = vector.load %arg17[%c0_108, %c0_109, %c0_110] : memref<1x4x1024xf32, #tpu.memory_space<vmem>>, vector<1x4x1024xf32>
    %208 = vector.shape_cast %207 : vector<1x4x1024xf32> to vector<4x1024xf32>
    %209 = vector.shape_cast %206 : vector<4x1024xf32> to vector<1x4x1024xf32>
    tpu.vector_store %arg17[%c0_108, %c0_109, %c0_110], %209 {strides = array<i32>} : memref<1x4x1024xf32, #tpu.memory_space<vmem>>, vector<1x4x1024xf32>,
    return
  }
  func.func @transform_0(%arg0: i32) -> (i32, i32, i32) {
    %c0_i32 = arith.constant 0 : i32
    %c0_i32_0 = arith.constant 0 : i32
    %c0_i32_1 = arith.constant 0 : i32
    return %arg0, %c0_i32, %c0_i32_0 : i32, i32, i32
  }
  func.func @transform_1(%arg0: i32) -> (i32, i32, i32) {
    %c0_i32 = arith.constant 0 : i32
    %c0_i32_0 = arith.constant 0 : i32
    %c0_i32_1 = arith.constant 0 : i32
    return %arg0, %c0_i32, %c0_i32_0 : i32, i32, i32
  }
  func.func @transform_2(%arg0: i32) -> (i32, i32) {
    %c0_i32 = arith.constant 0 : i32
    %c0_i32_0 = arith.constant 0 : i32
    %c0_i32_1 = arith.constant 0 : i32
    return %c0_i32, %c0_i32_0 : i32, i32
  }
  func.func @transform_3(%arg0: i32) -> (i32, i32) {
    %c0_i32 = arith.constant 0 : i32
    %c0_i32_0 = arith.constant 0 : i32
    %c0_i32_1 = arith.constant 0 : i32
    return %c0_i32, %c0_i32_0 : i32, i32
  }
  func.func @transform_4(%arg0: i32) -> (i32, i32) {
    %c0_i32 = arith.constant 0 : i32
    %c0_i32_0 = arith.constant 0 : i32
    %c0_i32_1 = arith.constant 0 : i32
    return %c0_i32, %c0_i32_0 : i32, i32
  }
  func.func @transform_5(%arg0: i32) -> (i32, i32) {
    %c0_i32 = arith.constant 0 : i32
    %c0_i32_0 = arith.constant 0 : i32
    %c0_i32_1 = arith.constant 0 : i32
    return %c0_i32, %c0_i32_0 : i32, i32
  }
  func.func @transform_6(%arg0: i32) -> (i32, i32) {
    %c0_i32 = arith.constant 0 : i32
    %c0_i32_0 = arith.constant 0 : i32
    %c0_i32_1 = arith.constant 0 : i32
    return %c0_i32, %c0_i32_0 : i32, i32
  }
  func.func @transform_7(%arg0: i32) -> (i32, i32) {
    %c0_i32 = arith.constant 0 : i32
    %c0_i32_0 = arith.constant 0 : i32
    %c0_i32_1 = arith.constant 0 : i32
    return %c0_i32, %c0_i32_0 : i32, i32
  }
  func.func @transform_8(%arg0: i32) -> (i32, i32) {
    %c0_i32 = arith.constant 0 : i32
    %c0_i32_0 = arith.constant 0 : i32
    %c0_i32_1 = arith.constant 0 : i32
    return %c0_i32, %c0_i32_0 : i32, i32
  }
  func.func @transform_9(%arg0: i32) -> (i32, i32, i32) {
    %c0_i32 = arith.constant 0 : i32
    %c0_i32_0 = arith.constant 0 : i32
    %c0_i32_1 = arith.constant 0 : i32
    %c0_i32_2 = arith.constant 0 : i32
    return %c0_i32, %c0_i32_0, %c0_i32_1 : i32, i32, i32
  }
  func.func @transform_10(%arg0: i32) -> (i32, i32, i32) {
    %c0_i32 = arith.constant 0 : i32
    %c0_i32_0 = arith.constant 0 : i32
    %c0_i32_1 = arith.constant 0 : i32
    %c0_i32_2 = arith.constant 0 : i32
    return %c0_i32, %c0_i32_0, %c0_i32_1 : i32, i32, i32
  }
  func.func @transform_11(%arg0: i32) -> (i32, i32) {
    %c0_i32 = arith.constant 0 : i32
    %c0_i32_0 = arith.constant 0 : i32
    %c0_i32_1 = arith.constant 0 : i32
    return %c0_i32, %c0_i32_0 : i32, i32
  }
  func.func @transform_12(%arg0: i32) -> (i32, i32) {
    %c0_i32 = arith.constant 0 : i32
    %c0_i32_0 = arith.constant 0 : i32
    %c0_i32_1 = arith.constant 0 : i32
    return %c0_i32, %c0_i32_0 : i32, i32
  }
  func.func @transform_13(%arg0: i32) -> (i32, i32) {
    %c0_i32 = arith.constant 0 : i32
    %c0_i32_0 = arith.constant 0 : i32
    %c0_i32_1 = arith.constant 0 : i32
    return %c0_i32, %c0_i32_0 : i32, i32
  }
  func.func @transform_14(%arg0: i32) -> (i32, i32) {
    %c0_i32 = arith.constant 0 : i32
    %c0_i32_0 = arith.constant 0 : i32
    %c0_i32_1 = arith.constant 0 : i32
    return %c0_i32, %c0_i32_0 : i32, i32
  }
  func.func @transform_15(%arg0: i32) -> (i32, i32) {
    %c0_i32 = arith.constant 0 : i32
    %c0_i32_0 = arith.constant 0 : i32
    %c0_i32_1 = arith.constant 0 : i32
    return %c0_i32, %c0_i32_0 : i32, i32
  }
  func.func @transform_16(%arg0: i32) -> (i32, i32, i32) {
    %c0_i32 = arith.constant 0 : i32
    %c0_i32_0 = arith.constant 0 : i32
    %c0_i32_1 = arith.constant 0 : i32
    return %arg0, %c0_i32, %c0_i32_0 : i32, i32, i32
  }
}

</mosaic_0001>

<bundles_post_ra>
// kernel: tpu_custom_call.1
= control target key start
LH: loop header
LB: loop body
LE: loop exit
PB: predicated region body
PF: predicated region fallthrough
CT: control target
= control target key end

     0   :  { %s12334_s0 = inlined_call_operand.vmem [shape: f32[2,8,256], index: 0, kind: input, shape index: {}]   ;;  %s12335_s1 = inlined_call_operand.hbm [shape: f32[2,4,1024], index: 1, kind: input, shape index: {}]   ;;  %s12336_s2 = inlined_call_operand.hbm [shape: f32[256,1024], index: 2, kind: input, shape index: {}]   ;;  %s12337_s3 = inlined_call_operand.hbm [shape: f32[4,1024], index: 3, kind: input, shape index: {}]   ;;  %s12338_s4 = inlined_call_operand.vmem [shape: f32[9,1024], index: 4, kind: input, shape index: {}]   ;;  %s12339_s5 = inlined_call_operand.vmem [shape: f32[16,8], index: 5, kind: input, shape index: {}]   ;;  %s12340_s6 = inlined_call_operand.hbm [shape: f32[2,4], index: 6, kind: input, shape index: {}]   ;;  %s12341_s7 = inlined_call_operand.hbm [shape: f32[2,4], index: 7, kind: input, shape index: {}]   ;;  %s12342_s8 = inlined_call_operand.vmem [shape: f32[1,2], index: 8, kind: input, shape index: {}]   ;;  %s12343_s9 = inlined_call_operand.vmem [shape: f32[9,4,8], index: 9, kind: input, shape index: {}]   ;;  %s12344_s10 = inlined_call_operand.vmem [shape: f32[9,4,4], index: 10, kind: input, shape index: {}]   ;;  %s12345_s11 = inlined_call_operand.vmem [shape: f32[4,1], index: 11, kind: input, shape index: {}]   ;;  %s12346_s12 = inlined_call_operand.vmem [shape: f32[2,1], index: 12, kind: input, shape index: {}]   ;;  %s12347_s13 = inlined_call_operand.<no memory space> [shape: f32[1,1], index: 13, kind: input, shape index: {}]   ;;  %s12348_s14 = inlined_call_operand.vmem [shape: f32[4,1], index: 14, kind: input, shape index: {}]   ;;  %s12349_s15 = inlined_call_operand.vmem [shape: f32[4,1], index: 15, kind: input, shape index: {}]   ;;  %s12350_s16 = inlined_call_operand.hbm [shape: f32[2,4,1024], index: 16, kind: output, shape index: {}]  }
   0x1   :  { %12422 = sst [smem:[#allocation61_spill]] %s12334_s0  ;;  %v21_v0 = vstv %s12347_s13 }
   0x2   :  { %12423 = sst [smem:[#allocation62_spill]] %s12335_s1  ;;  %22 = vst [vmem:[#allocation2] sm:$0x1] %v21_v0 }
   0x3   :  { %12424 = sst [smem:[#allocation63_spill]] %s12336_s2 }
   0x4   :  { %12425 = sst [smem:[#allocation64_spill]] %s12338_s4 }
   0x5   :  { %12426 = sst [smem:[#allocation65_spill]] %s12343_s9 }
   0x6   :  { %12427 = sst [smem:[#allocation66_spill]] %s12344_s10 }
   0x7   :  { %12428 = sst [smem:[#allocation67_spill]] %s12348_s14 }
   0x8   :  { %12429 = sst [smem:[#allocation68_spill]] %s12349_s15 }
   0x9   :  { %12430 = sst [smem:[#allocation69_spill]] %s12350_s16 }
   0xa   :  { %23 = vsyncpa [#allocation4], 0 }
   0xb   :  { %25 = vsyncpa [#allocation4 + $0x1], 0 }
   0xc   :  { %26 = vsyncpa [#allocation7], 0 }
   0xd   :  { %27 = vsyncpa [#allocation10], 0 }
   0xe   :  { %28 = vsyncpa [#allocation5], 0 }
   0xf   :  { %30 = vsyncpa [#allocation5 + $0x1], 0  ;;  %s10157_s23 = smov 0   ;;  %s10159_s24 = smov 0  }
  0x10   :  { %s10161_s25 = smov 0   ;;  %s10163_s26 = smov 0  }
  0x11 LB: > { %s10050_s13 = smov [#allocation6]   ;;  %s10178_s28 = sadd.s32 4294967295, %s10048_s26   ;;  %s10048_s26 = sphi %s10163_s26, %s12567_s26   ;;  %s10044_s25 = sphi %s10161_s25, %s12566_s25   ;;  %s10040_s24 = sphi %s10159_s24, %s12565_s24   ;;  %s10036_s23 = sphi %s10157_s23, %s12564_s23  }
  0x12   : > { %s425_s27 = sshll.u32 %s10050_s13, 4  ;;  %p9072_p0 = scmp.ge.s32.totalorder %s10048_s26, 1  ;;  %s10183_s27 = int_to_ptr.vmem [resolvable:$true] %s425_s27 }
  0x13   : > { %p12355_p1 = scmp.eq.s32.totalorder %s10178_s28, 0  ;;  %p413_p2 = scmp.lt.s32.totalorder %s10048_s26, 3 }
  0x14   : > { %s10051_s30 = smov [#allocation9]   ;;  %s10052_s18 = smov [#allocation8]  }
  0x15   : > { %p10185_p3 = pnand %p9072_p0, %p413_p2  ;;  %s456_s0 = sshll.u32 %s10051_s30, 4  ;;  %s10198_s0 = int_to_ptr.vmem [resolvable:$true] %s456_s0 }
  0x16   : > { %s439_s19 = sshll.u32 %s10052_s18, 4  ;;  %s12433_s2 = sld [smem:[#allocation63_spill]]  ;;  %s10200_s19 = int_to_ptr.vmem [resolvable:$true] %s439_s19 }
  0x17   : > { %s12431_s29 = scalar_select %p10185_p3, 1, 0 }
  0x18   : > { %p9712_p5 = pneg %p10185_p3 }
  0x1a   : > { %p10194_p6 = pnand %p9712_p5, %p12355_p1 }
  0x1c   : > { %s9832_s22 = scalar_lea.hbm %s12433_s2, 32768  ;;  %p10210_p8 = pneg %p10194_p6 }
  0x1d   : > { %p9833_p7 = scmp.ne.s32.totalorder %s12433_s2, %s9832_s22  ;;  %p9839_p11 = scmp.lt.u32.totalorder %s9832_s22, %s12433_s2 }
  0x1f   : > { %p9835_p9 = pnand %p10210_p8, %p9833_p7 }
  0x21   : > { %p9836_p10 = pneg %p9835_p9 }
  0x23   : > { %p9841_p12 = pnand %p9839_p11, %p9836_p10 }
  0x25   : > { %9844 = shalt.err (!%p9841_p12)
}
  0x26   : > { %s9845_s16 = scalar_lea.vmem %s10183_s27, 32768  ;;  %p9853_p5 = scmp.lt.s32.totalorder %s10183_s27, %s10183_s27 }
  0x27   : > { %p9846_p13 = scmp.ne.s32.totalorder %s10183_s27, %s9845_s16  ;;  %p9854_p4 = scmp.lt.s32.totalorder %s9845_s16, %s9845_s16 }
  0x29   : > { %p9848_p0 = pnand %p9846_p13, %p10210_p8  ;;  %p9855_p7 = por %p9854_p4, %p9853_p5 }
  0x2b   : > { %p9849_p2 = pneg %p9848_p0 }
  0x2d   : > { %p9856_p9 = pnand %p9855_p7, %p9849_p2 }
  0x2f   : > { %9859 = shalt.err (!%p9856_p9)
}
  0x30   : > { %s10053_s20 = smov 1024   ;;  %s10054_s10 = smov 64  }
  0x31   : > { %9715 = dma.hbm_to_vmem [thread:$0]  (!%p10194_p6), %s12433_s2, 32768, %s10183_s27, [#allocation7], %s10053_s20, %s10053_s20, %s10054_s10  }
  0x32   : > { %s9860_s15 = scalar_lea.hbm %s12340_s6, 32 }
  0x33   : > { %p9861_p4 = scmp.ne.s32.totalorder %s12340_s6, %s9860_s15  ;;  %p9867_p12 = scmp.lt.u32.totalorder %s9860_s15, %s12340_s6 }
  0x35   : > { %p9863_p10 = pnand %p9861_p4, %p10210_p8 }
  0x37   : > { %p9864_p11 = pneg %p9863_p10 }
  0x39   : > { %p9869_p13 = pnand %p9867_p12, %p9864_p11 }
  0x3b   : > { %9872 = shalt.err (!%p9869_p13)
}
  0x3c   : > { %s9873_s27 = scalar_lea.vmem %s10198_s0, 32  ;;  %p9881_p7 = scmp.lt.s32.totalorder %s10198_s0, %s10198_s0 }
  0x3d   : > { %p9874_p0 = scmp.ne.s32.totalorder %s10198_s0, %s9873_s27  ;;  %p9882_p9 = scmp.lt.s32.totalorder %s9873_s27, %s9873_s27 }
  0x3f   : > { %p9876_p2 = pnand %p9874_p0, %p10210_p8  ;;  %p9883_p4 = por %p9882_p9, %p9881_p7 }
  0x41   : > { %p9877_p5 = pneg %p9876_p2 }
  0x43   : > { %p9884_p10 = pnand %p9883_p4, %p9877_p5 }
  0x45   : > { %9887 = shalt.err (!%p9884_p10)
}
  0x46   : > { %9721 = dma.hbm_to_vmem [thread:$0]  (!%p10194_p6), %s12340_s6, 32, %s10198_s0, [#allocation10]  }
  0x47   : > { %s9888_s20 = scalar_lea.hbm %s12337_s3, 512 }
  0x48   : > { %p9889_p11 = scmp.ne.s32.totalorder %s12337_s3, %s9888_s20  ;;  %p9895_p0 = scmp.lt.u32.totalorder %s9888_s20, %s12337_s3 }
  0x4a   : > { %p9891_p12 = pnand %p9889_p11, %p10210_p8 }
  0x4c   : > { %p9892_p13 = pneg %p9891_p12 }
  0x4e   : > { %p9897_p2 = pnand %p9895_p0, %p9892_p13 }
  0x50   : > { %9900 = shalt.err (!%p9897_p2)
}
  0x51   : > { %s9901_s0 = scalar_lea.vmem %s10200_s19, 512  ;;  %p9909_p4 = scmp.lt.s32.totalorder %s10200_s19, %s10200_s19 }
  0x52   : > { %p9902_p5 = scmp.ne.s32.totalorder %s10200_s19, %s9901_s0  ;;  %p9910_p10 = scmp.lt.s32.totalorder %s9901_s0, %s9901_s0 }
  0x54   : > { %p9904_p7 = pnand %p9902_p5, %p10210_p8  ;;  %p9911_p11 = por %p9910_p10, %p9909_p4 }
  0x56   : > { %p9905_p9 = pneg %p9904_p7 }
  0x58   : > { %p9912_p12 = pnand %p9911_p11, %p9905_p9 }
  0x5a   : > { %9915 = shalt.err (!%p9912_p12)
}
  0x5b   : > { %9718 = dma.hbm_to_vmem [thread:$0]  (!%p10194_p6), %s12337_s3, 512, %s10200_s19, [#allocation7]  }
  0x5c   : > { %s10055_s27 = smov [#allocation11]   ;;  %s9916_s15 = scalar_lea.hbm %s12341_s7, 32 }
  0x5d   : > { %s467_s4 = sshll.u32 %s10055_s27, 4  ;;  %p9917_p13 = scmp.ne.s32.totalorder %s12341_s7, %s9916_s15  ;;  %s468_s4 = int_to_ptr.vmem [resolvable:$true] %s467_s4 }
  0x5e   : > { %p9923_p5 = scmp.lt.u32.totalorder %s9916_s15, %s12341_s7 }
  0x5f   : > { %p9919_p0 = pnand %p9917_p13, %p10210_p8 }
  0x61   : > { %p9920_p2 = pneg %p9919_p0 }
  0x63   : > { %p9925_p7 = pnand %p9923_p5, %p9920_p2 }
  0x65   : > { %9928 = shalt.err (!%p9925_p7)
}
  0x66   : > { %s9929_s19 = scalar_lea.vmem %s468_s4, 32  ;;  %p9937_p11 = scmp.lt.s32.totalorder %s468_s4, %s468_s4 }
  0x67   : > { %p9930_p9 = scmp.ne.s32.totalorder %s468_s4, %s9929_s19  ;;  %p9938_p12 = scmp.lt.s32.totalorder %s9929_s19, %s9929_s19 }
  0x69   : > { %p9932_p4 = pnand %p9930_p9, %p10210_p8  ;;  %p9939_p1 = por %p9938_p12, %p9937_p11 }
  0x6b   : > { %p9933_p10 = pneg %p9932_p4 }
  0x6d   : > { %p9940_p3 = pnand %p9939_p1, %p9933_p10 }
  0x6f   : > { %9943 = shalt.err (!%p9940_p3)
}
  0x70   : > { %9724 = dma.hbm_to_vmem [thread:$0]  (!%p10194_p6), %s12341_s7, 32, %s468_s4, [#allocation10]  }
  0x71   : > { %s9071_s30 = sadd.s32 4294967294, %s10048_s26   ;;  %s10297_s17 = sadd.s32 1, %s10048_s26  }
  0x72   : > { %s66_s18 = ssub.s32 %s10048_s26, %s10297_s17  ;;  %s69_s16 = sadd.s32 1, %s10044_s25 }
  0x73   : > { %p67_p1 = scmp.eq.s32.totalorder %s66_s18, 0  ;;  %p76_p3 = scmp.ne.s32.totalorder %s10044_s25, %s10040_s24 }
  0x74   : > { %p77_p8 = scmp.eq.s32.totalorder %s10048_s26, 0  ;;  %p82_p13 = scmp.ne.s32.totalorder %s10040_s24, %s10036_s23 }
  0x75   : > { %s10308_s27 = scalar_select %p67_p1, %s10044_s25, %s69_s16  }
  0x76   : > { %p10310_p0 = por %p77_p8, %p76_p3  ;;  %p12436_p2 = scmp.eq.s32.totalorder %s10178_s28, 0 }
  0x77   : > { %p400_p5 = scmp.eq.s32.totalorder %s10178_s28, 1  ;;  %p406_p7 = scmp.eq.s32.totalorder %s9071_s30, 1 }
  0x78   : > { %p10316_p6 = por %p12436_p2, %p82_p13  ;;  %p9737_p9 = scmp.lt.s32.totalorder %s10048_s26, 2 }
  0x79   : > { %s510_s14 = sand.u32 1, %s10044_s25   ;;  %p10323_p4 = por %p400_p5, %p76_p3 }
  0x7a   : > { %p10327_p10 = por %p406_p7, %p82_p13  ;;  %s9078_s10 = sshll.u32 %s510_s14, 5 }
  0x7b   : > { %s12438_s15 = scalar_select %p10323_p4, 1, 0 }
  0x7c   : > { %s12439_s20 = scalar_select %p10327_p10, 1, 0 }
  0x7d   : > { %s9297_s21 = sshll.u32 %s10048_s26, 9  ;;  %s12440_s1 = sld [smem:[#allocation62_spill]] }
  0x7e   : > { %s514_s0 = scalar_lea.vmem [#allocation3], %s9078_s10  ;;  %p10341_p11 = pnand %p9737_p9, %p10310_p0 }
  0x7f   : > { %s522_s30 = sshll.u32 %s514_s0, 4  ;;  %s511_s16 = scalar_lea.sflag [#allocation4], %s510_s14  ;;  %s10337_s30 = int_to_ptr.vmem [resolvable:$true] %s522_s30 }
  0x80   : > { %p9946_p1 = pneg %p10341_p11 }
  0x83   : > { %s10335_s13 = scalar_lea.hbm %s12440_s1, %s9297_s21  ;;  %s9949_s22 = scalar_lea.hbm %s12440_s1, 1024 }
  0x84   : > { %s9944_s2 = scalar_lea.hbm %s10335_s13, 512  ;;  %p9950_p13 = scmp.lt.u32.totalorder %s10335_s13, %s12440_s1 }
  0x85   : > { %p9945_p12 = scmp.ne.s32.totalorder %s10335_s13, %s9944_s2  ;;  %p9951_p0 = scmp.lt.u32.totalorder %s9949_s22, %s9944_s2 }
  0x86   : > { %p9953_p5 = scmp.lt.u32.totalorder %s9944_s2, %s10335_s13 }
  0x87   : > { %p9947_p3 = pnand %p9946_p1, %p9945_p12  ;;  %p9952_p2 = por %p9951_p0, %p9950_p13 }
  0x89   : > { %p9948_p8 = pneg %p9947_p3  ;;  %p9954_p7 = por %p9953_p5, %p9952_p2 }
  0x8b   : > { %p9955_p9 = pnand %p9954_p7, %p9948_p8 }
  0x8d   : > { %9958 = shalt.err (!%p9955_p9)
}
  0x8e   : > { %s9959_s14 = scalar_lea.vmem %s10337_s30, 512  ;;  %s10056_s0 = smov [#allocation3]  }
  0x8f   : > { %p9960_p12 = scmp.ne.s32.totalorder %s10337_s30, %s9959_s14  ;;  %s9964_s10 = sshll.u32 %s10056_s0, 4  ;;  %s9965_s10 = int_to_ptr.vmem [resolvable:$false] %s9964_s10 }
  0x90   : > { %s9966_s21 = scalar_lea.vmem %s9965_s10, 1024  ;;  %p9967_p4 = scmp.lt.s32.totalorder %s10337_s30, %s9965_s10 }
  0x91   : > { %p9962_p3 = pnand %p9960_p12, %p9946_p1  ;;  %p9968_p13 = scmp.lt.s32.totalorder %s9966_s21, %s9959_s14 }
  0x93   : > { %p9963_p10 = pneg %p9962_p3  ;;  %p9969_p0 = por %p9968_p13, %p9967_p4 }
  0x95   : > { %p9970_p2 = pnand %p9969_p0, %p9963_p10 }
  0x97   : > { %9973 = shalt.err (!%p9970_p2)
}
  0x98   : > { %9728 = dma.hbm_to_vmem [thread:$0]  (!%p10341_p11), %s10335_s13, 512, %s10337_s30, %s511_s16  }
  0x99   : > { %p12442_p8 = scmp.ne.s32.totalorder %s12431_s29, 0 }
  0x9b   : > { %531 = sbr.rel (%p12442_p8) target bundleno = 1843 (0x733), region = 84 }
  0xa2   : > { %s10373_s2 = sand.u32 1, %s10040_s24  }
  0xa3   : > { %s12358_s22 = sshll.u32 %s10373_s2, 5  ;;  %s534_s9 = scalar_lea.sflag [#allocation4], %s10373_s2 }
  0xa4   : > { %s10379_s19 = scalar_lea.vmem [#allocation3], %s12358_s22 }
  0xa5   : > { %10019 = dma.done.wait (%p10316_p6), %s534_s9, 512  }
  0xa6   : > { %10021 = vsyncadd (%p10316_p6), %s534_s9, 4294966784  ;;  %p12443_p4 = scmp.eq.s32.totalorder %s10178_s28, 0 }
  0xa8   : > { %10023 = dma.done.wait (%p12443_p4), [#allocation7], 33280   ;;  %p12444_p10 = pmov %p12443_p4 }
  0xa9   : > { %p12445_p11 = pmov %p12443_p4 }
  0xaa   : > { %10025 = vsyncadd (%p12444_p10), [#allocation7], 4294934016 }
  0xab   : > { %10027 = dma.done.wait (%p12445_p11), [#allocation10], 64   ;;  %p12446_p1 = pmov %p12443_p4 }
  0xac   : > { %p607_p5 = scmp.lt.s32.totalorder %s10178_s28, 1  ;;  %v12369_v1 = vmov 0.0   ;;  %s12447_s18 = sld [smem:[#allocation61_spill]]  ;;  %v638_v4 = vld [vmem:[%s12339_s5] sm:$0xff]  ;;  %vm640_vm0 = vcmask 64512   ;;  %v725_v5 = vld [vmem:[#allocation6 + $0x8] sm:$0xff] }
  0xad   : > { %10029 = vsyncadd (%p12446_p1), [#allocation10], 4294967232  ;;  %711 = vmatprep.mubr.f32.mxu0 %v12369_v1  ;;  %v733_v6 = vld [vmem:[#allocation6 + $0x48] sm:$0xff]  ;;  %v727_v9 = vld [vmem:[#allocation6 + $0x18] sm:$0xff]  ;;  %vm1712_vm1 = vcmask 1043456   ;;  %vm1708_vm2 = vcmask 31744  }
  0xae   : > { %s608_s29 = scalar_select %p607_p5, %s10178_s28, 1  ;;  %v639_v7 = vld [vmem:[%s12339_s5 + $0x8] sm:$0xff]  ;;  %v9300_v8 = vpack.c.bf16 %v733_v6, %v725_v5  ;;  %v735_v10 = vld [vmem:[#allocation6 + $0x58] sm:$0xff]  ;;  %v726_v14 = vld [vmem:[#allocation6 + $0x10] sm:$0xff] }
  0xaf   : > { %v724_v11 = vld [vmem:[#allocation6] sm:$0xff]  ;;  %v9364_v12 = vpack.c.bf16 %v735_v10, %v727_v9  ;;  %v734_v15 = vld [vmem:[#allocation6 + $0x50] sm:$0xff]  ;;  %v741_v18 = vld [vmem:[#allocation6 + $0x88] sm:$0xff]  ;;  %s12367_s14 = smov 15   ;;  %s12361_s0 = smov 1  }
  0xb0   : > { %s9298_s4 = sshll.u32 %s608_s29, 4  ;;  %v732_v13 = vld [vmem:[#allocation6 + $0x40] sm:$0xff]  ;;  %9301 = vmatprep.subr.bf16.mxu1 %v9300_v8  ;;  %v9366_v17 = vpack.c.bf16 %v734_v15, %v726_v14  ;;  %v749_v19 = vld [vmem:[#allocation6 + $0xc8] sm:$0xff]  ;;  %v743_v20 = vld [vmem:[#allocation6 + $0x98] sm:$0xff]  ;;  %s10064_s10 = smov 127  }
  0xb1   : > { %v9302_v16 = vpack.c.bf16 %v732_v13, %v724_v11  ;;  %v9304_v21 = vpack.c.bf16 %v749_v19, %v741_v18  ;;  %v751_v22 = vld [vmem:[#allocation6 + $0xd8] sm:$0xff]  ;;  %v740_v23 = vld [vmem:[#allocation6 + $0x80] sm:$0xff]  ;;  %v742_v27 = vld [vmem:[#allocation6 + $0x90] sm:$0xff]  ;;  %s12359_s21 = smov 113   ;;  %s12365_s9 = smov 112  }
  0xb2   : > { %s611_s16 = scalar_lea.vmem %s12447_s18, %s9298_s4  ;;  %v748_v24 = vld [vmem:[#allocation6 + $0xc0] sm:$0xff]  ;;  %v9368_v25 = vpack.c.bf16 %v751_v22, %v743_v20  ;;  %v750_v28 = vld [vmem:[#allocation6 + $0xd0] sm:$0xff]  ;;  %v757_v29 = vld [vmem:[#allocation6 + $0x108] sm:$0xff]  ;;  %s10060_s18 = smov 17  }
  0xb3   : > { %v613_v2 = vld [vmem:[%s611_s16 + $0x8] sm:$0xff]  ;;  %v612_v3 = vld [vmem:[%s611_s16] sm:$0xff]  ;;  %9303 = vmatpush1.bf16.msra.mxu1 %v9302_v16  ;;  %v9306_v26 = vpack.c.bf16 %v748_v24, %v740_v23  ;;  %v9370_v30 = vpack.c.bf16 %v750_v28, %v742_v27  ;;  %v758_v38 = vld [vmem:[#allocation6 + $0x110] sm:$0xff]  ;;  %s10061_s16 = smov 16   ;;  %s12363_s29 = smov 111  }
  0xb4   : > { %647 = vmatprep.subr.mxu0 %v613_v2  ;;  %9305 = vmatprep.subr.bf16.mxu1 %v9304_v21  ;;  %v765_v31 = vld [vmem:[#allocation6 + $0x148] sm:$0xff]  ;;  %v759_v32 = vld [vmem:[#allocation6 + $0x118] sm:$0xff]  ;;  %v756_v36 = vld [vmem:[#allocation6 + $0x100] sm:$0xff]  ;;  %s12455_s4 = sld [smem:[#allocation65_spill]]  ;;  %s12508_s30 = sld [smem:[#allocation68_spill]] }
  0xb5   : > { %648 = vmatpush1.msra.mxu0 %v612_v3  ;;  %v767_v33 = vld [vmem:[#allocation6 + $0x158] sm:$0xff]  ;;  %v9308_v34 = vpack.c.bf16 %v765_v31, %v757_v29  ;;  %v764_v37 = vld [vmem:[#allocation6 + $0x140] sm:$0xff]  ;;  %v766_v39 = vld [vmem:[#allocation6 + $0x150] sm:$0xff]  ;;  %s12559_s22 = sshll.u32 %s10373_s2, 5  ;;  %s9299_s13 = sshll.u32 %s10178_s28, 9 }
  0xb6   : > { %9090 = vmatmul.mubr.msk.f32.vlgmr.msra.gmra.mrb[0].mxu0 %vm640_vm0, %v638_v4  ;;  %9365 = vmatprep.subr.bf16.mxu0 %v9364_v12  ;;  %v9372_v35 = vpack.c.bf16 %v767_v33, %v759_v32  ;;  %v773_v40 = vld [vmem:[#allocation6 + $0x188] sm:$0xff]  ;;  %v9310_v42 = vpack.c.bf16 %v764_v37, %v756_v36  ;;  %v9374_v43 = vpack.c.bf16 %v766_v39, %v758_v38  ;;  %v775_v44 = vld [vmem:[#allocation6 + $0x198] sm:$0xff]  ;;  %v772_v46 = vld [vmem:[#allocation6 + $0x180] sm:$0xff]  ;;  %p12561_p7 = scmp.ne.s32.totalorder %s12438_s15, 0 }
  0xb7   : > { %717 = vmatprep.mubr.f32.mxu0 %v12369_v1  ;;  %9367 = vmatpush1.bf16.msra.mxu0 %v9366_v17  ;;  %v781_v41 = vld [vmem:[#allocation6 + $0x1c8] sm:$0xff]  ;;  %v783_v45 = vld [vmem:[#allocation6 + $0x1d8] sm:$0xff]  ;;  %v780_v49 = vld [vmem:[#allocation6 + $0x1c0] sm:$0xff] }
  0xb8   : > { %9369 = vmatprep.subr.bf16.mxu0 %v9368_v25  ;;  %9307 = vmatpush1.bf16.msra.mxu1 %v9306_v26  ;;  %v9312_v47 = vpack.c.bf16 %v781_v41, %v773_v40  ;;  %v9376_v48 = vpack.c.bf16 %v783_v45, %v775_v44  ;;  %v774_v50 = vld [vmem:[#allocation6 + $0x190] sm:$0xff]  ;;  %v789_v52 = vld [vmem:[#allocation6 + $0x208] sm:$0xff]  ;;  %v791_v54 = vld [vmem:[#allocation6 + $0x218] sm:$0xff]  ;;  %v9314_v56 = vpack.c.bf16 %v780_v49, %v772_v46 }
  0xb9   : > { %9309 = vmatprep.subr.bf16.mxu1 %v9308_v34  ;;  %v782_v51 = vld [vmem:[#allocation6 + $0x1d0] sm:$0xff]  ;;  %v797_v53 = vld [vmem:[#allocation6 + $0x248] sm:$0xff]  ;;  %v799_v55 = vld [vmem:[#allocation6 + $0x258] sm:$0xff] }
  0xba   : > { %9091 = vmatmul.mubr.msk.f32.gmra.mrb[2].mxu0 %vm640_vm0, %v639_v7  ;;  %v9378_v57 = vpack.c.bf16 %v782_v51, %v774_v50  ;;  %v788_v58 = vld [vmem:[#allocation6 + $0x200] sm:$0xff]  ;;  %v9316_v60 = vpack.c.bf16 %v797_v53, %v789_v52  ;;  %v9380_v61 = vpack.c.bf16 %v799_v55, %v791_v54  ;;  %v790_v62 = vld [vmem:[#allocation6 + $0x210] sm:$0xff]  ;;  %v805_v0 = vld [vmem:[#allocation6 + $0x288] sm:$0xff] }
  0xbb   : > { %9371 = vmatpush1.bf16.msra.mxu0 %v9370_v30  ;;  %v796_v59 = vld [vmem:[#allocation6 + $0x240] sm:$0xff]  ;;  %v798_v63 = vld [vmem:[#allocation6 + $0x250] sm:$0xff]  ;;  %v813_v2 = vld [vmem:[#allocation6 + $0x2c8] sm:$0xff] }
  0xbc   : > { %9373 = vmatprep.subr.bf16.mxu0 %v9372_v35  ;;  %9311 = vmatpush1.bf16.msra.mxu1 %v9310_v42  ;;  %v807_v3 = vld [vmem:[#allocation6 + $0x298] sm:$0xff]  ;;  %v9318_v5 = vpack.c.bf16 %v796_v59, %v788_v58  ;;  %v9382_v6 = vpack.c.bf16 %v798_v63, %v790_v62  ;;  %v804_v7 = vld [vmem:[#allocation6 + $0x280] sm:$0xff]  ;;  %v9320_v9 = vpack.c.bf16 %v813_v2, %v805_v0  ;;  %v806_v11 = vld [vmem:[#allocation6 + $0x290] sm:$0xff] }
  0xbd   : > { %9313 = vmatprep.subr.bf16.mxu1 %v9312_v47  ;;  %v815_v4 = vld [vmem:[#allocation6 + $0x2d8] sm:$0xff]  ;;  %v812_v8 = vld [vmem:[#allocation6 + $0x2c0] sm:$0xff]  ;;  %v814_v12 = vld [vmem:[#allocation6 + $0x2d0] sm:$0xff] }
  0xbe   : > { %v9384_v10 = vpack.c.bf16 %v815_v4, %v807_v3  ;;  %v821_v13 = vld [vmem:[#allocation6 + $0x308] sm:$0xff]  ;;  %v823_v15 = vld [vmem:[#allocation6 + $0x318] sm:$0xff]  ;;  %v9322_v17 = vpack.c.bf16 %v812_v8, %v804_v7  ;;  %v9386_v18 = vpack.c.bf16 %v814_v12, %v806_v11  ;;  %v820_v19 = vld [vmem:[#allocation6 + $0x300] sm:$0xff] }
  0xbf   : > { %9375 = vmatpush1.bf16.msra.mxu0 %v9374_v43  ;;  %v829_v14 = vld [vmem:[#allocation6 + $0x348] sm:$0xff]  ;;  %v831_v16 = vld [vmem:[#allocation6 + $0x358] sm:$0xff]  ;;  %v828_v20 = vld [vmem:[#allocation6 + $0x340] sm:$0xff] }
  0xc0   : > { %9377 = vmatprep.subr.bf16.mxu0 %v9376_v48  ;;  %9315 = vmatpush1.bf16.msra.mxu1 %v9314_v56  ;;  %v9324_v21 = vpack.c.bf16 %v829_v14, %v821_v13  ;;  %v9388_v22 = vpack.c.bf16 %v831_v16, %v823_v15  ;;  %v822_v23 = vld [vmem:[#allocation6 + $0x310] sm:$0xff]  ;;  %v837_v25 = vld [vmem:[#allocation6 + $0x388] sm:$0xff]  ;;  %v839_v27 = vld [vmem:[#allocation6 + $0x398] sm:$0xff]  ;;  %v9326_v29 = vpack.c.bf16 %v828_v20, %v820_v19 }
  0xc1   : > { %9317 = vmatprep.subr.bf16.mxu1 %v9316_v60  ;;  %v830_v24 = vld [vmem:[#allocation6 + $0x350] sm:$0xff]  ;;  %v845_v26 = vld [vmem:[#allocation6 + $0x3c8] sm:$0xff]  ;;  %v847_v28 = vld [vmem:[#allocation6 + $0x3d8] sm:$0xff] }
  0xc2   : > { %v9390_v30 = vpack.c.bf16 %v830_v24, %v822_v23  ;;  %v836_v31 = vld [vmem:[#allocation6 + $0x380] sm:$0xff]  ;;  %v9328_v33 = vpack.c.bf16 %v845_v26, %v837_v25  ;;  %v9392_v34 = vpack.c.bf16 %v847_v28, %v839_v27  ;;  %v838_v35 = vld [vmem:[#allocation6 + $0x390] sm:$0xff]  ;;  %v853_v37 = vld [vmem:[#allocation6 + $0x408] sm:$0xff] }
  0xc3   : > { %9379 = vmatpush1.bf16.msra.mxu0 %v9378_v57  ;;  %v844_v32 = vld [vmem:[#allocation6 + $0x3c0] sm:$0xff]  ;;  %v846_v36 = vld [vmem:[#allocation6 + $0x3d0] sm:$0xff]  ;;  %v861_v38 = vld [vmem:[#allocation6 + $0x448] sm:$0xff] }
  0xc4   : > { %9381 = vmatprep.subr.bf16.mxu0 %v9380_v61  ;;  %9319 = vmatpush1.bf16.msra.mxu1 %v9318_v5  ;;  %v855_v39 = vld [vmem:[#allocation6 + $0x418] sm:$0xff]  ;;  %v9330_v41 = vpack.c.bf16 %v844_v32, %v836_v31  ;;  %v9394_v42 = vpack.c.bf16 %v846_v36, %v838_v35  ;;  %v852_v43 = vld [vmem:[#allocation6 + $0x400] sm:$0xff]  ;;  %v9332_v45 = vpack.c.bf16 %v861_v38, %v853_v37  ;;  %v854_v47 = vld [vmem:[#allocation6 + $0x410] sm:$0xff] }
  0xc5   : > { %9321 = vmatprep.subr.bf16.mxu1 %v9320_v9  ;;  %v863_v40 = vld [vmem:[#allocation6 + $0x458] sm:$0xff]  ;;  %v860_v44 = vld [vmem:[#allocation6 + $0x440] sm:$0xff]  ;;  %v862_v48 = vld [vmem:[#allocation6 + $0x450] sm:$0xff] }
  0xc6   : > { %v9396_v46 = vpack.c.bf16 %v863_v40, %v855_v39  ;;  %v869_v49 = vld [vmem:[#allocation6 + $0x488] sm:$0xff]  ;;  %v871_v51 = vld [vmem:[#allocation6 + $0x498] sm:$0xff]  ;;  %v9334_v53 = vpack.c.bf16 %v860_v44, %v852_v43  ;;  %v9398_v54 = vpack.c.bf16 %v862_v48, %v854_v47  ;;  %v868_v55 = vld [vmem:[#allocation6 + $0x480] sm:$0xff] }
  0xc7   : > { %9383 = vmatpush1.bf16.msra.mxu0 %v9382_v6  ;;  %v877_v50 = vld [vmem:[#allocation6 + $0x4c8] sm:$0xff]  ;;  %v879_v52 = vld [vmem:[#allocation6 + $0x4d8] sm:$0xff]  ;;  %v876_v56 = vld [vmem:[#allocation6 + $0x4c0] sm:$0xff] }
  0xc8   : > { %9385 = vmatprep.subr.bf16.mxu0 %v9384_v10  ;;  %9323 = vmatpush1.bf16.msra.mxu1 %v9322_v17  ;;  %v9336_v57 = vpack.c.bf16 %v877_v50, %v869_v49  ;;  %v9400_v58 = vpack.c.bf16 %v879_v52, %v871_v51  ;;  %v870_v59 = vld [vmem:[#allocation6 + $0x490] sm:$0xff]  ;;  %v885_v61 = vld [vmem:[#allocation6 + $0x508] sm:$0xff]  ;;  %v887_v63 = vld [vmem:[#allocation6 + $0x518] sm:$0xff]  ;;  %v9338_v2 = vpack.c.bf16 %v876_v56, %v868_v55 }
  0xc9   : > { %9325 = vmatprep.subr.bf16.mxu1 %v9324_v21  ;;  %v878_v60 = vld [vmem:[#allocation6 + $0x4d0] sm:$0xff]  ;;  %v893_v62 = vld [vmem:[#allocation6 + $0x548] sm:$0xff]  ;;  %v895_v0 = vld [vmem:[#allocation6 + $0x558] sm:$0xff] }
  0xca   : > { %v9402_v3 = vpack.c.bf16 %v878_v60, %v870_v59  ;;  %v884_v4 = vld [vmem:[#allocation6 + $0x500] sm:$0xff]  ;;  %v9340_v6 = vpack.c.bf16 %v893_v62, %v885_v61  ;;  %v9404_v7 = vpack.c.bf16 %v895_v0, %v887_v63  ;;  %v886_v8 = vld [vmem:[#allocation6 + $0x510] sm:$0xff]  ;;  %v901_v10 = vld [vmem:[#allocation6 + $0x588] sm:$0xff] }
  0xcb   : > { %9387 = vmatpush1.bf16.msra.mxu0 %v9386_v18  ;;  %v892_v5 = vld [vmem:[#allocation6 + $0x540] sm:$0xff]  ;;  %v894_v9 = vld [vmem:[#allocation6 + $0x550] sm:$0xff]  ;;  %v909_v11 = vld [vmem:[#allocation6 + $0x5c8] sm:$0xff] }
  0xcc   : > { %9389 = vmatprep.subr.bf16.mxu0 %v9388_v22  ;;  %9327 = vmatpush1.bf16.msra.mxu1 %v9326_v29  ;;  %v903_v12 = vld [vmem:[#allocation6 + $0x598] sm:$0xff]  ;;  %v9342_v14 = vpack.c.bf16 %v892_v5, %v884_v4  ;;  %v9406_v15 = vpack.c.bf16 %v894_v9, %v886_v8  ;;  %v900_v16 = vld [vmem:[#allocation6 + $0x580] sm:$0xff]  ;;  %v9344_v18 = vpack.c.bf16 %v909_v11, %v901_v10  ;;  %v902_v20 = vld [vmem:[#allocation6 + $0x590] sm:$0xff] }
  0xcd   : > { %9329 = vmatprep.subr.bf16.mxu1 %v9328_v33  ;;  %v911_v13 = vld [vmem:[#allocation6 + $0x5d8] sm:$0xff]  ;;  %v908_v17 = vld [vmem:[#allocation6 + $0x5c0] sm:$0xff]  ;;  %v910_v21 = vld [vmem:[#allocation6 + $0x5d0] sm:$0xff] }
  0xce   : > { %v9408_v19 = vpack.c.bf16 %v911_v13, %v903_v12  ;;  %v917_v22 = vld [vmem:[#allocation6 + $0x608] sm:$0xff]  ;;  %v919_v24 = vld [vmem:[#allocation6 + $0x618] sm:$0xff]  ;;  %v9346_v26 = vpack.c.bf16 %v908_v17, %v900_v16  ;;  %v9410_v27 = vpack.c.bf16 %v910_v21, %v902_v20  ;;  %v916_v28 = vld [vmem:[#allocation6 + $0x600] sm:$0xff]  ;;  %v10058_v16 = vmov 0  }
  0xcf   : > { %9391 = vmatpush1.bf16.msra.mxu0 %v9390_v30  ;;  %v925_v23 = vld [vmem:[#allocation6 + $0x648] sm:$0xff]  ;;  %v927_v25 = vld [vmem:[#allocation6 + $0x658] sm:$0xff]  ;;  %v924_v29 = vld [vmem:[#allocation6 + $0x640] sm:$0xff]  ;;  %9792 = vset.pattern.permute.xlu0 %v10058_v16 }
  0xd0   : > { %9393 = vmatprep.subr.bf16.mxu0 %v9392_v34  ;;  %9331 = vmatpush1.bf16.msra.mxu1 %v9330_v41  ;;  %v9348_v30 = vpack.c.bf16 %v925_v23, %v917_v22  ;;  %v9412_v31 = vpack.c.bf16 %v927_v25, %v919_v24  ;;  %v918_v32 = vld [vmem:[#allocation6 + $0x610] sm:$0xff]  ;;  %v933_v34 = vld [vmem:[#allocation6 + $0x688] sm:$0xff]  ;;  %v935_v36 = vld [vmem:[#allocation6 + $0x698] sm:$0xff]  ;;  %v9350_v38 = vpack.c.bf16 %v924_v29, %v916_v28 }
  0xd1   : > { %9333 = vmatprep.subr.bf16.mxu1 %v9332_v45  ;;  %v926_v33 = vld [vmem:[#allocation6 + $0x650] sm:$0xff]  ;;  %v941_v35 = vld [vmem:[#allocation6 + $0x6c8] sm:$0xff]  ;;  %v943_v37 = vld [vmem:[#allocation6 + $0x6d8] sm:$0xff]  ;;  %9793 = vset.pattern.permute.xlu1 %v10058_v16 }
  0xd2   : > { %v9414_v39 = vpack.c.bf16 %v926_v33, %v918_v32  ;;  %v932_v40 = vld [vmem:[#allocation6 + $0x680] sm:$0xff]  ;;  %v9416_v43 = vpack.c.bf16 %v943_v37, %v935_v36  ;;  %v934_v44 = vld [vmem:[#allocation6 + $0x690] sm:$0xff]  ;;  %v957_v47 = vld [vmem:[#allocation6 + $0x748] sm:$0xff] }
  0xd3   : > { %9395 = vmatpush1.bf16.msra.mxu0 %v9394_v42  ;;  %v940_v41 = vld [vmem:[#allocation6 + $0x6c0] sm:$0xff]  ;;  %v9352_v42 = vpack.c.bf16 %v941_v35, %v933_v34  ;;  %v942_v45 = vld [vmem:[#allocation6 + $0x6d0] sm:$0xff]  ;;  %v951_v48 = vld [vmem:[#allocation6 + $0x718] sm:$0xff] }
  0xd4   : > { %9397 = vmatprep.subr.bf16.mxu0 %v9396_v46  ;;  %9335 = vmatpush1.bf16.msra.mxu1 %v9334_v53  ;;  %v949_v46 = vld [vmem:[#allocation6 + $0x708] sm:$0xff]  ;;  %v959_v49 = vld [vmem:[#allocation6 + $0x758] sm:$0xff]  ;;  %v9354_v50 = vpack.c.bf16 %v940_v41, %v932_v40  ;;  %v9418_v51 = vpack.c.bf16 %v942_v45, %v934_v44  ;;  %v948_v52 = vld [vmem:[#allocation6 + $0x700] sm:$0xff] }
  0xd5   : > { %9337 = vmatprep.subr.bf16.mxu1 %v9336_v57  ;;  %v956_v53 = vld [vmem:[#allocation6 + $0x740] sm:$0xff]  ;;  %v9420_v55 = vpack.c.bf16 %v959_v49, %v951_v48  ;;  %v950_v56 = vld [vmem:[#allocation6 + $0x710] sm:$0xff]  ;;  %v973_v59 = vld [vmem:[#allocation6 + $0x7c8] sm:$0xff] }
  0xd6   : > { %v958_v57 = vld [vmem:[#allocation6 + $0x750] sm:$0xff]  ;;  %v967_v60 = vld [vmem:[#allocation6 + $0x798] sm:$0xff]  ;;  %v9358_v62 = vpack.c.bf16 %v956_v53, %v948_v52  ;;  %v964_v0 = vld [vmem:[#allocation6 + $0x780] sm:$0xff] }
  0xd7   : > { %9399 = vmatpush1.bf16.msra.mxu0 %v9398_v54  ;;  %v9356_v54 = vpack.c.bf16 %v957_v47, %v949_v46  ;;  %v975_v61 = vld [vmem:[#allocation6 + $0x7d8] sm:$0xff]  ;;  %v9422_v63 = vpack.c.bf16 %v958_v57, %v950_v56  ;;  %v972_v4 = vld [vmem:[#allocation6 + $0x7c0] sm:$0xff]  ;;  %v966_v5 = vld [vmem:[#allocation6 + $0x790] sm:$0xff] }
  0xd8   : > { %9401 = vmatprep.subr.bf16.mxu0 %v9400_v58  ;;  %9339 = vmatpush1.bf16.msra.mxu1 %v9338_v2  ;;  %v965_v58 = vld [vmem:[#allocation6 + $0x788] sm:$0xff]  ;;  %v731_v11 = vld [vmem:[#allocation6 + $0x38] sm:$0xff]  ;;  %v736_v20 = vld [vmem:[#allocation6 + $0x60] sm:$0xff] }
  0xd9   : > { %9341 = vmatprep.subr.bf16.mxu1 %v9340_v6  ;;  %v9360_v2 = vpack.c.bf16 %v973_v59, %v965_v58  ;;  %v974_v6 = vld [vmem:[#allocation6 + $0x7d0] sm:$0xff]  ;;  %v729_v9 = vld [vmem:[#allocation6 + $0x28] sm:$0xff]  ;;  %v739_v13 = vld [vmem:[#allocation6 + $0x78] sm:$0xff] }
  0xda   : > { %v9426_v8 = vpack.c.bf16 %v974_v6, %v966_v5  ;;  %v737_v10 = vld [vmem:[#allocation6 + $0x68] sm:$0xff]  ;;  %v2324_v17 = vld [vmem:[%s12346_s12] sm:$0x3]  ;;  %v730_v21 = vld [vmem:[#allocation6 + $0x30] sm:$0xff] }
  0xdb   : > { %9403 = vmatpush1.bf16.msra.mxu0 %v9402_v3  ;;  %v9424_v3 = vpack.c.bf16 %v975_v61, %v967_v60  ;;  %v9428_v12 = vpack.c.bf16 %v737_v10, %v729_v9  ;;  %v738_v22 = vld [vmem:[#allocation6 + $0x70] sm:$0xff]  ;;  %v745_v23 = vld [vmem:[#allocation6 + $0xa8] sm:$0xff]  ;;  %v747_v25 = vld [vmem:[#allocation6 + $0xb8] sm:$0xff] }
  0xdc   : > { %9405 = vmatprep.subr.bf16.mxu0 %v9404_v7  ;;  %9343 = vmatpush1.bf16.msra.mxu1 %v9342_v14  ;;  %v9362_v7 = vpack.c.bf16 %v972_v4, %v964_v0  ;;  %v9492_v14 = vpack.c.bf16 %v739_v13, %v731_v11  ;;  %v753_v24 = vld [vmem:[#allocation6 + $0xe8] sm:$0xff]  ;;  %v9494_v29 = vpack.c.bf16 %v738_v22, %v730_v21  ;;  %v752_v34 = vld [vmem:[#allocation6 + $0xe0] sm:$0xff]  ;;  %v746_v35 = vld [vmem:[#allocation6 + $0xb0] sm:$0xff] }
  0xdd   : > { %9345 = vmatprep.subr.bf16.mxu1 %v9344_v18  ;;  %v2347_v18 = vld [vmem:[#allocation2] sm:$0x1]  ;;  %v9432_v32 = vpack.c.bf16 %v753_v24, %v745_v23  ;;  %v754_v36 = vld [vmem:[#allocation6 + $0xf0] sm:$0xff]  ;;  %v761_v37 = vld [vmem:[#allocation6 + $0x128] sm:$0xff] }
  0xde   : > { %v771_v40 = vld [vmem:[#allocation6 + $0x178] sm:$0xff]  ;;  %v760_v44 = vld [vmem:[#allocation6 + $0x120] sm:$0xff]  ;;  %v762_v47 = vld [vmem:[#allocation6 + $0x130] sm:$0xff] }
  0xdf   : > { %9407 = vmatpush1.bf16.msra.mxu0 %v9406_v15  ;;  %v1684_v15 = vld [vmem:[%s12345_s11] sm:$0xf]  ;;  %v770_v48 = vld [vmem:[#allocation6 + $0x170] sm:$0xff]  ;;  %v777_v49 = vld [vmem:[#allocation6 + $0x1a8] sm:$0xff] }
  0xe0   : > { %9409 = vmatprep.subr.bf16.mxu0 %v9408_v19  ;;  %9347 = vmatpush1.bf16.msra.mxu1 %v9346_v26  ;;  %v728_v19 = vld [vmem:[#allocation6 + $0x20] sm:$0xff]  ;;  %v755_v26 = vld [vmem:[#allocation6 + $0xf8] sm:$0xff]  ;;  %v785_v52 = vld [vmem:[#allocation6 + $0x1e8] sm:$0xff]  ;;  %v9502_v56 = vpack.c.bf16 %v770_v48, %v762_v47 }
  0xe1   : > { %9349 = vmatprep.subr.bf16.mxu1 %v9348_v30  ;;  %1687 = vperm.xlu0 %9792, %v1684_v15   ;;  %v9430_v28 = vpack.c.bf16 %v736_v20, %v728_v19  ;;  %v744_v30 = vld [vmem:[#allocation6 + $0xa0] sm:$0xff]  ;;  %v9496_v33 = vpack.c.bf16 %v755_v26, %v747_v25  ;;  %v779_v53 = vld [vmem:[#allocation6 + $0x1b8] sm:$0xff]  ;;  %v9440_v59 = vpack.c.bf16 %v785_v52, %v777_v49  ;;  %v778_v61 = vld [vmem:[#allocation6 + $0x1b0] sm:$0xff] }
  0xe2   : > { %v768_v45 = vld [vmem:[#allocation6 + $0x160] sm:$0xff]  ;;  %v801_v0 = vld [vmem:[#allocation6 + $0x268] sm:$0xff]  ;;  %v794_v10 = vld [vmem:[#allocation6 + $0x230] sm:$0xff] }
  0xe3   : > { %9411 = vmatpush1.bf16.msra.mxu0 %v9410_v27  ;;  %v776_v57 = vld [vmem:[#allocation6 + $0x1a0] sm:$0xff]  ;;  %v802_v11 = vld [vmem:[#allocation6 + $0x270] sm:$0xff]  ;;  %v817_v13 = vld [vmem:[#allocation6 + $0x2e8] sm:$0xff] }
  0xe4   : > { %9413 = vmatprep.subr.bf16.mxu0 %v9412_v31  ;;  %9351 = vmatpush1.bf16.msra.mxu1 %v9350_v38  ;;  %v769_v38 = vld [vmem:[#allocation6 + $0x168] sm:$0xff]  ;;  %v784_v58 = vld [vmem:[#allocation6 + $0x1e0] sm:$0xff]  ;;  %v819_v15 = vld [vmem:[#allocation6 + $0x2f8] sm:$0xff] }
  0xe5   : > { %9353 = vmatprep.subr.bf16.mxu1 %v9352_v42  ;;  %2327 = vperm.xlu0 %9792, %v2324_v17   ;;  %v9434_v42 = vpack.c.bf16 %v752_v34, %v744_v30  ;;  %v9442_v4 = vpack.c.bf16 %v784_v58, %v776_v57  ;;  %v792_v6 = vld [vmem:[#allocation6 + $0x220] sm:$0xff]  ;;  %v810_v23 = vld [vmem:[#allocation6 + $0x2b0] sm:$0xff]  ;;  %v825_v25 = vld [vmem:[#allocation6 + $0x328] sm:$0xff] }
  0xe6   : > { %v808_v19 = vld [vmem:[#allocation6 + $0x2a0] sm:$0xff]  ;;  %v818_v24 = vld [vmem:[#allocation6 + $0x2f0] sm:$0xff]  ;;  %v833_v26 = vld [vmem:[#allocation6 + $0x368] sm:$0xff] }
  0xe7   : > { %9415 = vmatpush1.bf16.msra.mxu0 %v9414_v39  ;;  %v763_v39 = vld [vmem:[#allocation6 + $0x138] sm:$0xff]  ;;  %v816_v20 = vld [vmem:[#allocation6 + $0x2e0] sm:$0xff]  ;;  %v9452_v34 = vpack.c.bf16 %v833_v26, %v825_v25  ;;  %v857_v52 = vld [vmem:[#allocation6 + $0x428] sm:$0xff] }
  0xe8   : > { %9417 = vmatprep.subr.bf16.mxu0 %v9416_v43  ;;  %9355 = vmatpush1.bf16.msra.mxu1 %v9354_v50  ;;  %v9498_v43 = vpack.c.bf16 %v754_v36, %v746_v35  ;;  %v9436_v50 = vpack.c.bf16 %v769_v38, %v761_v37  ;;  %v9450_v30 = vpack.c.bf16 %v816_v20, %v808_v19  ;;  %v826_v36 = vld [vmem:[#allocation6 + $0x330] sm:$0xff]  ;;  %v841_v38 = vld [vmem:[#allocation6 + $0x3a8] sm:$0xff]  ;;  %v848_v47 = vld [vmem:[#allocation6 + $0x3e0] sm:$0xff] }
  0xe9   : > { %9357 = vmatprep.subr.bf16.mxu1 %v9356_v54  ;;  %2367 = vperm.xlu0 %9792, %v2347_v18   ;;  %v787_v54 = vld [vmem:[#allocation6 + $0x1f8] sm:$0xff]  ;;  %v9510_v18 = vpack.c.bf16 %v802_v11, %v794_v10  ;;  %v834_v37 = vld [vmem:[#allocation6 + $0x370] sm:$0xff]  ;;  %v856_v58 = vld [vmem:[#allocation6 + $0x420] sm:$0xff] }
  0xea   : > { %v9504_v60 = vpack.c.bf16 %v787_v54, %v779_v53  ;;  %v865_v53 = vld [vmem:[#allocation6 + $0x468] sm:$0xff]  ;;  %v859_v54 = vld [vmem:[#allocation6 + $0x438] sm:$0xff]  ;;  %v874_v11 = vld [vmem:[#allocation6 + $0x4b0] sm:$0xff] }
  0xeb   : > { %9419 = vmatpush1.bf16.msra.mxu0 %v9418_v51  ;;  %v9500_v51 = vpack.c.bf16 %v771_v40, %v763_v39  ;;  %v849_v39 = vld [vmem:[#allocation6 + $0x3e8] sm:$0xff]  ;;  %v843_v40 = vld [vmem:[#allocation6 + $0x3b8] sm:$0xff]  ;;  %v888_v20 = vld [vmem:[#allocation6 + $0x520] sm:$0xff] }
  0xec   : > { %9421 = vmatprep.subr.bf16.mxu0 %v9420_v55  ;;  %9359 = vmatpush1.bf16.msra.mxu1 %v9358_v62  ;;  %v9438_v55 = vpack.c.bf16 %v768_v45, %v760_v44  ;;  %v786_v62 = vld [vmem:[#allocation6 + $0x1f0] sm:$0xff]  ;;  %v9518_v44 = vpack.c.bf16 %v834_v37, %v826_v36  ;;  %v840_v45 = vld [vmem:[#allocation6 + $0x3a0] sm:$0xff]  ;;  %v9456_v48 = vpack.c.bf16 %v849_v39, %v841_v38  ;;  %v905_v26 = vld [vmem:[#allocation6 + $0x5a8] sm:$0xff] }
  0xed   : > { %9361 = vmatprep.subr.bf16.mxu1 %v9360_v2  ;;  %v795_v2 = vld [vmem:[#allocation6 + $0x238] sm:$0xff]  ;;  %v9506_v5 = vpack.c.bf16 %v786_v62, %v778_v61  ;;  %v858_v62 = vld [vmem:[#allocation6 + $0x430] sm:$0xff]  ;;  %v921_v39 = vld [vmem:[#allocation6 + $0x628] sm:$0xff] }
  0xee   : > { %v898_v25 = vld [vmem:[#allocation6 + $0x570] sm:$0xff] }
  0xef   : > { %9423 = vmatpush1.bf16.msra.mxu0 %v9422_v63  ;;  %v793_v63 = vld [vmem:[#allocation6 + $0x228] sm:$0xff]  ;;  %v906_v37 = vld [vmem:[#allocation6 + $0x5b0] sm:$0xff] }
  0xf0   : > { %9425 = vmatprep.subr.bf16.mxu0 %v9424_v3  ;;  %9363 = vmatpush1.bf16.msra.mxu1 %v9362_v7  ;;  %v803_v3 = vld [vmem:[#allocation6 + $0x278] sm:$0xff]  ;;  %v800_v7 = vld [vmem:[#allocation6 + $0x260] sm:$0xff]  ;;  %v914_v38 = vld [vmem:[#allocation6 + $0x5f0] sm:$0xff] }
  0xf1   : > { %9429 = vmatprep.subr.bf16.mxu1 %v9428_v12  ;;  %v9508_v9 = vpack.c.bf16 %v803_v3, %v795_v2  ;;  %v809_v12 = vld [vmem:[#allocation6 + $0x2a8] sm:$0xff]  ;;  %v9446_v17 = vpack.c.bf16 %v800_v7, %v792_v6  ;;  %v875_v3 = vld [vmem:[#allocation6 + $0x4b8] sm:$0xff]  ;;  %v872_v7 = vld [vmem:[#allocation6 + $0x4a0] sm:$0xff] }
  0xf2   : > { %v9448_v21 = vpack.c.bf16 %v817_v13, %v809_v12  ;;  %v881_v2 = vld [vmem:[#allocation6 + $0x4e8] sm:$0xff]  ;;  %v882_v12 = vld [vmem:[#allocation6 + $0x4f0] sm:$0xff] }
  0xf3   : > { %9427 = vmatpush1.bf16.msra.mxu0 %v9426_v8  ;;  %v9444_v8 = vpack.c.bf16 %v801_v0, %v793_v63  ;;  %v866_v63 = vld [vmem:[#allocation6 + $0x470] sm:$0xff]  ;;  %v873_v0 = vld [vmem:[#allocation6 + $0x4a8] sm:$0xff]  ;;  %v9530_v19 = vpack.c.bf16 %v882_v12, %v874_v11 }
  0xf4   : > { %9493 = vmatprep.subr.bf16.mxu0 %v9492_v14  ;;  %v811_v14 = vld [vmem:[#allocation6 + $0x2b8] sm:$0xff]  ;;  %v9526_v6 = vpack.c.bf16 %v866_v63, %v858_v62  ;;  %v889_v13 = vld [vmem:[#allocation6 + $0x528] sm:$0xff]  ;;  %v938_v63 = vld [vmem:[#allocation6 + $0x6b0] sm:$0xff] }
  0xf5   : > { %v9512_v22 = vpack.c.bf16 %v819_v15, %v811_v14  ;;  %v897_v14 = vld [vmem:[#allocation6 + $0x568] sm:$0xff]  ;;  %v891_v15 = vld [vmem:[#allocation6 + $0x538] sm:$0xff]  ;;  %v954_v12 = vld [vmem:[#allocation6 + $0x730] sm:$0xff] }
 0x189   : > { %v10416_v27 = vpop.f32.mrb[0].mxu0 }
 0x18a   : > { %v715_v31 = vpop.f32.mrb[1].mxu0 }
 0x18b   : > { %1044 = vmatprep.mubr.f32.mxu1 %v715_v31  ;;  %1121 = vmatprep.mubr.f32.mxu0 %v715_v31 }
 0x18c   : > { %1045 = vmatmul.mubr.f32.vlgmr.msra.gmra.mrb[0].mxu1 %v10416_v27  ;;  %1122 = vmatmul.mubr.f32.vlgmr.msra.gmra.mrb[4].mxu0 %v10416_v27 }
 0x18d   : > { %9431 = vmatpush1.bf16.msra.mxu1 %v9430_v28  ;;  %9495 = vmatpush1.bf16.msra.mxu0 %v9494_v29  ;;  %v10420_v41 = vpop.f32.mrb[2].mxu0  ;;  %v827_v28 = vld [vmem:[#allocation6 + $0x338] sm:$0xff] }
 0x18e   : > { %v10422_v46 = vpop.f32.mrb[3].mxu0  ;;  %9433 = vmatprep.subr.bf16.mxu1 %v9432_v32  ;;  %9497 = vmatprep.subr.bf16.mxu0 %v9496_v33  ;;  %v835_v29 = vld [vmem:[#allocation6 + $0x378] sm:$0xff]  ;;  %v824_v32 = vld [vmem:[#allocation6 + $0x320] sm:$0xff] }
 0x18f   : > { %1050 = vmatprep.mubr.f32.mxu1 %v10422_v46  ;;  %1127 = vmatprep.mubr.f32.mxu0 %v10422_v46  ;;  %v832_v33 = vld [vmem:[#allocation6 + $0x360] sm:$0xff]  ;;  %v9516_v35 = vpack.c.bf16 %v835_v29, %v827_v28  ;;  %v913_v28 = vld [vmem:[#allocation6 + $0x5e8] sm:$0xff]  ;;  %v907_v29 = vld [vmem:[#allocation6 + $0x5b8] sm:$0xff] }
 0x190   : > { %1051 = vmatmul.mubr.f32.gmra.mrb[2].mxu1 %v10420_v41  ;;  %1128 = vmatmul.mubr.f32.gmra.mrb[6].mxu0 %v10420_v41 }
 0x191   : > { %9435 = vmatpush1.bf16.msra.mxu1 %v9434_v42  ;;  %9499 = vmatpush1.bf16.msra.mxu0 %v9498_v43  ;;  %v851_v42 = vld [vmem:[#allocation6 + $0x3f8] sm:$0xff]  ;;  %v9454_v43 = vpack.c.bf16 %v832_v33, %v824_v32  ;;  %v904_v33 = vld [vmem:[#allocation6 + $0x5a0] sm:$0xff] }
 0x192   : > { %1198 = vmatprep.mubr.f32.mxu1 %v715_v31  ;;  %1275 = vmatprep.mubr.f32.mxu0 %v715_v31  ;;  %v9514_v31 = vpack.c.bf16 %v818_v24, %v810_v23  ;;  %v9520_v49 = vpack.c.bf16 %v851_v42, %v843_v40  ;;  %v890_v24 = vld [vmem:[#allocation6 + $0x530] sm:$0xff]  ;;  %v929_v40 = vld [vmem:[#allocation6 + $0x668] sm:$0xff]  ;;  %v923_v42 = vld [vmem:[#allocation6 + $0x638] sm:$0xff] }
 0x193   : > { %9437 = vmatprep.subr.bf16.mxu1 %v9436_v50  ;;  %9501 = vmatprep.subr.bf16.mxu0 %v9500_v51  ;;  %v842_v50 = vld [vmem:[#allocation6 + $0x3b0] sm:$0xff]  ;;  %v9534_v32 = vpack.c.bf16 %v898_v25, %v890_v24  ;;  %v976_v24 = vld [vmem:[#allocation6 + $0x7e0] sm:$0xff] }
 0x194   : > { %v850_v51 = vld [vmem:[#allocation6 + $0x3f0] sm:$0xff] }
 0x195   : > { %9439 = vmatpush1.bf16.msra.mxu1 %v9438_v55  ;;  %9503 = vmatpush1.bf16.msra.mxu0 %v9502_v56  ;;  %v867_v55 = vld [vmem:[#allocation6 + $0x478] sm:$0xff]  ;;  %v9458_v56 = vpack.c.bf16 %v848_v47, %v840_v45  ;;  %v9522_v57 = vpack.c.bf16 %v850_v51, %v842_v50  ;;  %v9538_v45 = vpack.c.bf16 %v914_v38, %v906_v37  ;;  %v920_v47 = vld [vmem:[#allocation6 + $0x620] sm:$0xff]  ;;  %v922_v51 = vld [vmem:[#allocation6 + $0x630] sm:$0xff]  ;;  %v10059_v37 = vmov 1  }
 0x196   : > { %9441 = vmatprep.subr.bf16.mxu1 %v9440_v59  ;;  %9505 = vmatprep.subr.bf16.mxu0 %v9504_v60  ;;  %v864_v59 = vld [vmem:[#allocation6 + $0x460] sm:$0xff]  ;;  %v9460_v60 = vpack.c.bf16 %v865_v53, %v857_v52  ;;  %v9524_v61 = vpack.c.bf16 %v867_v55, %v859_v54  ;;  %v930_v52 = vld [vmem:[#allocation6 + $0x670] sm:$0xff]  ;;  %v937_v53 = vld [vmem:[#allocation6 + $0x6a8] sm:$0xff]  ;;  %v1292_v38 = vlaneseq }
 0x197   : > { %v945_v54 = vld [vmem:[#allocation6 + $0x6e8] sm:$0xff]  ;;  %v939_v55 = vld [vmem:[#allocation6 + $0x6b8] sm:$0xff]  ;;  %v970_v25 = vld [vmem:[#allocation6 + $0x7b0] sm:$0xff] }
 0x199   : > { %9443 = vmatpush1.bf16.msra.mxu1 %v9442_v4  ;;  %9507 = vmatpush1.bf16.msra.mxu0 %v9506_v5  ;;  %v883_v4 = vld [vmem:[#allocation6 + $0x4f8] sm:$0xff]  ;;  %v9462_v5 = vpack.c.bf16 %v864_v59, %v856_v58  ;;  %v9542_v58 = vpack.c.bf16 %v930_v52, %v922_v51  ;;  %v936_v59 = vld [vmem:[#allocation6 + $0x6a0] sm:$0xff] }
 0x19a   : > { %9445 = vmatprep.subr.bf16.mxu1 %v9444_v8  ;;  %9509 = vmatprep.subr.bf16.mxu0 %v9508_v9  ;;  %v880_v8 = vld [vmem:[#allocation6 + $0x4e0] sm:$0xff]  ;;  %v9464_v9 = vpack.c.bf16 %v881_v2, %v873_v0  ;;  %v9528_v10 = vpack.c.bf16 %v883_v4, %v875_v3  ;;  %v946_v0 = vld [vmem:[#allocation6 + $0x6f0] sm:$0xff]  ;;  %v953_v2 = vld [vmem:[#allocation6 + $0x728] sm:$0xff] }
 0x19b   : > { %v961_v3 = vld [vmem:[#allocation6 + $0x768] sm:$0xff]  ;;  %v955_v4 = vld [vmem:[#allocation6 + $0x738] sm:$0xff] }
 0x19d   : > { %9447 = vmatpush1.bf16.msra.mxu1 %v9446_v17  ;;  %9511 = vmatpush1.bf16.msra.mxu0 %v9510_v18  ;;  %v899_v17 = vld [vmem:[#allocation6 + $0x578] sm:$0xff]  ;;  %v9466_v18 = vpack.c.bf16 %v880_v8, %v872_v7  ;;  %v9546_v7 = vpack.c.bf16 %v946_v0, %v938_v63  ;;  %v952_v8 = vld [vmem:[#allocation6 + $0x720] sm:$0xff] }
 0x19e   : > { %9449 = vmatprep.subr.bf16.mxu1 %v9448_v21  ;;  %9513 = vmatprep.subr.bf16.mxu0 %v9512_v22  ;;  %v896_v21 = vld [vmem:[#allocation6 + $0x560] sm:$0xff]  ;;  %v9468_v22 = vpack.c.bf16 %v897_v14, %v889_v13  ;;  %v9532_v23 = vpack.c.bf16 %v899_v17, %v891_v15  ;;  %v962_v13 = vld [vmem:[#allocation6 + $0x770] sm:$0xff]  ;;  %v969_v14 = vld [vmem:[#allocation6 + $0x7a8] sm:$0xff] }
 0x19f   : > { %v977_v15 = vld [vmem:[#allocation6 + $0x7e8] sm:$0xff]  ;;  %v971_v17 = vld [vmem:[#allocation6 + $0x7b8] sm:$0xff] }
 0x1a1   : > { %9451 = vmatpush1.bf16.msra.mxu1 %v9450_v30  ;;  %9515 = vmatpush1.bf16.msra.mxu0 %v9514_v31  ;;  %v915_v30 = vld [vmem:[#allocation6 + $0x5f8] sm:$0xff]  ;;  %v9470_v31 = vpack.c.bf16 %v896_v21, %v888_v20  ;;  %v9550_v20 = vpack.c.bf16 %v962_v13, %v954_v12  ;;  %v968_v21 = vld [vmem:[#allocation6 + $0x7a0] sm:$0xff] }
 0x1a2   : > { %9453 = vmatprep.subr.bf16.mxu1 %v9452_v34  ;;  %9517 = vmatprep.subr.bf16.mxu0 %v9516_v35  ;;  %v912_v34 = vld [vmem:[#allocation6 + $0x5e0] sm:$0xff]  ;;  %v9472_v35 = vpack.c.bf16 %v913_v28, %v905_v26  ;;  %v9536_v36 = vpack.c.bf16 %v915_v30, %v907_v29  ;;  %v978_v26 = vld [vmem:[#allocation6 + $0x7f0] sm:$0xff]  ;;  %v9490_v28 = vpack.c.bf16 %v976_v24, %v968_v21 }
 0x1a3   : > { %v9554_v29 = vpack.c.bf16 %v978_v26, %v970_v25  ;;  %v10437_v30 = vld [vmem:[%s10379_s19] sm:$0xff] }
 0x1a5   : > { %9455 = vmatpush1.bf16.msra.mxu1 %v9454_v43  ;;  %9519 = vmatpush1.bf16.msra.mxu0 %v9518_v44  ;;  %v931_v43 = vld [vmem:[#allocation6 + $0x678] sm:$0xff]  ;;  %v9474_v44 = vpack.c.bf16 %v912_v34, %v904_v33  ;;  %v10447_v33 = vld [vmem:[%s10379_s19 + $0x10] sm:$0xff] }
 0x1a6   : > { %9457 = vmatprep.subr.bf16.mxu1 %v9456_v48  ;;  %9521 = vmatprep.subr.bf16.mxu0 %v9520_v49  ;;  %v928_v48 = vld [vmem:[#allocation6 + $0x660] sm:$0xff]  ;;  %v9476_v49 = vpack.c.bf16 %v929_v40, %v921_v39  ;;  %v9540_v50 = vpack.c.bf16 %v931_v43, %v923_v42  ;;  %v1706_v34 = vcombine.high %v10447_v33, %v10447_v33  ;;  %v1293_v39 = vshrl.u32 %v1292_v38, 7  ;;  %v619_v43 = vld [vmem:[#allocation8 + $0x8] sm:$0xff] }
 0x1a7   : > { %v618_v42 = vld [vmem:[#allocation8] sm:$0xff] }
 0x1a8   : > { %v10481_v40 = vsub.s32 1, %v1293_v39  ;;  %v10495_v51 = vsub.s32 6, %v1293_v39  ;;  %v10497_v52 = vsub.s32 7, %v1293_v39 }
 0x1a9   : > { %9459 = vmatpush1.bf16.msra.mxu1 %v9458_v56  ;;  %9523 = vmatpush1.bf16.msra.mxu0 %v9522_v57  ;;  %v947_v56 = vld [vmem:[#allocation6 + $0x6f8] sm:$0xff]  ;;  %v9478_v57 = vpack.c.bf16 %v928_v48, %v920_v47  ;;  %v10487_v47 = vsub.s32 4, %v1293_v39  ;;  %v10489_v48 = vsub.s32 2, %v1293_v39 }
 0x1aa   : > { %9461 = vmatprep.subr.bf16.mxu1 %v9460_v60  ;;  %9525 = vmatprep.subr.bf16.mxu0 %v9524_v61  ;;  %v944_v60 = vld [vmem:[#allocation6 + $0x6e0] sm:$0xff]  ;;  %v9480_v61 = vpack.c.bf16 %v945_v54, %v937_v53  ;;  %v9544_v62 = vpack.c.bf16 %v947_v56, %v939_v55  ;;  %12448 = vst [vmem:[#allocation17_spill] sm:$0xff] %v10495_v51  ;;  %12449 = vst [vmem:[#allocation18_spill] sm:$0xff] %v10497_v52 }
 0x1ad   : > { %9463 = vmatpush1.bf16.msra.mxu1 %v9462_v5  ;;  %9527 = vmatpush1.bf16.msra.mxu0 %v9526_v6  ;;  %v963_v5 = vld [vmem:[#allocation6 + $0x778] sm:$0xff]  ;;  %v9482_v6 = vpack.c.bf16 %v944_v60, %v936_v59  ;;  %v1487_v59 = vrot.slane %v618_v42, %v10489_v48 }
 0x1ae   : > { %9465 = vmatprep.subr.bf16.mxu1 %v9464_v9  ;;  %9529 = vmatprep.subr.bf16.mxu0 %v9528_v10  ;;  %v960_v9 = vld [vmem:[#allocation6 + $0x760] sm:$0xff]  ;;  %v9484_v10 = vpack.c.bf16 %v961_v3, %v953_v2  ;;  %v9548_v11 = vpack.c.bf16 %v963_v5, %v955_v4  ;;  %v1491_v2 = vrot.slane %v618_v42, %v10495_v51 }
 0x1af   : > { %v1579_v3 = vrot.slane %v618_v42, %v10497_v52 }
 0x1b1   : > { %9467 = vmatpush1.bf16.msra.mxu1 %v9466_v18  ;;  %9531 = vmatpush1.bf16.msra.mxu0 %v9530_v19  ;;  %v979_v18 = vld [vmem:[#allocation6 + $0x7f8] sm:$0xff]  ;;  %v9486_v19 = vpack.c.bf16 %v960_v9, %v952_v8 }
 0x1b2   : > { %9469 = vmatprep.subr.bf16.mxu1 %v9468_v22  ;;  %9533 = vmatprep.subr.bf16.mxu0 %v9532_v23  ;;  %v9488_v22 = vpack.c.bf16 %v977_v15, %v969_v14  ;;  %v9552_v23 = vpack.c.bf16 %v979_v18, %v971_v17  ;;  %v1527_v14 = vrot.slane %v1487_v59, %v10489_v48 }
 0x1b5   : > { %9471 = vmatpush1.bf16.msra.mxu1 %v9470_v31  ;;  %9535 = vmatpush1.bf16.msra.mxu0 %v9534_v32  ;;  %v10440_v31 = vld [vmem:[%s10379_s19 + $0x8] sm:$0xff]  ;;  %v1704_v32 = vcombine.high %v10437_v30, %v10437_v30 }
 0x1b6   : > { %9473 = vmatprep.subr.bf16.mxu1 %v9472_v35  ;;  %9537 = vmatprep.subr.bf16.mxu0 %v9536_v36  ;;  %v2346_v36 = vld [vmem:[%s12342_s8] sm:$0x1] }
 0x1b7   : > { %2350 = vperm.xlu1 %9793, %v2346_v36  }
 0x1b9   : > { %9475 = vmatpush1.bf16.msra.mxu1 %v9474_v44  ;;  %9539 = vmatpush1.bf16.msra.mxu0 %v9538_v45  ;;  %v10483_v44 = vsub.s32 5, %v1293_v39  ;;  %v10485_v45 = vsub.s32 0, %v1293_v39 }
 0x1ba   : > { %9477 = vmatprep.subr.bf16.mxu1 %v9476_v49  ;;  %9541 = vmatprep.subr.bf16.mxu0 %v9540_v50  ;;  %v10491_v49 = vsub.s32 3, %v1293_v39  ;;  %v1375_v50 = vrot.slane %v618_v42, %v10481_v40 }
 0x1bb   : > { %9794 = vset.pattern.permute.xlu1 %v10059_v37  ;;  %v1379_v53 = vrot.slane %v618_v42, %v10483_v44  ;;  %v1387_v54 = vrot.slane %v619_v43, %v10483_v44  ;;  %v1295_v55 = vrot.slane %v618_v42, %v10485_v45  ;;  %v1303_v56 = vrot.slane %v619_v43, %v10485_v45 }
 0x1bc   : > { %2383 = vperm.xlu1 %9794, %v2346_v36   ;;  %v1575_v60 = vrot.slane %v618_v42, %v10491_v49  ;;  %v1415_v63 = vrot.slane %v1375_v50, %v10481_v40  ;;  %v1619_v24 = vrot.slane %v1579_v3, %v10491_v49 }
 0x1bd   : > { %9479 = vmatpush1.bf16.msra.mxu1 %v9478_v57  ;;  %9543 = vmatpush1.bf16.msra.mxu0 %v9542_v58  ;;  %v1299_v57 = vrot.slane %v618_v42, %v10487_v47  ;;  %v1307_v58 = vrot.slane %v619_v43, %v10487_v47  ;;  %v1419_v4 = vrot.slane %v1379_v53, %v10481_v40 }
 0x1be   : > { %9481 = vmatprep.subr.bf16.mxu1 %v9480_v61  ;;  %9545 = vmatprep.subr.bf16.mxu0 %v9544_v62  ;;  %v1495_v61 = vrot.slane %v619_v43, %v10489_v48  ;;  %v1583_v62 = vrot.slane %v619_v43, %v10491_v49  ;;  %v1427_v5 = vrot.slane %v1387_v54, %v10481_v40 }
 0x1bf   : > { %v1335_v8 = vrot.slane %v1295_v55, %v10485_v45  ;;  %v1343_v9 = vrot.slane %v1303_v56, %v10485_v45  ;;  %v1615_v15 = vrot.slane %v1575_v60, %v10491_v49 }
 0x1c0   : > { %9795 = vset.pattern.permute.xlu1 %v10058_v16  ;;  %v1383_v16 = vrot.slane %v619_v43, %v10481_v40  ;;  %v1535_v17 = vrot.slane %v1495_v61, %v10489_v48  ;;  %v1623_v18 = vrot.slane %v1583_v62, %v10491_v49 }
 0x1c1   : > { %9483 = vmatpush1.bf16.msra.mxu1 %v9482_v6  ;;  %9547 = vmatpush1.bf16.msra.mxu0 %v9546_v7  ;;  %v1499_v6 = vrot.slane %v619_v43, %v10495_v51  ;;  %v1587_v7 = vrot.slane %v619_v43, %v10497_v52 }
 0x1c2   : > { %9485 = vmatprep.subr.bf16.mxu1 %v9484_v10  ;;  %9549 = vmatprep.subr.bf16.mxu0 %v9548_v11  ;;  %v1423_v0 = vrot.slane %v1383_v16, %v10481_v40  ;;  %v1339_v10 = vrot.slane %v1299_v57, %v10485_v45  ;;  %v1347_v11 = vrot.slane %v1307_v58, %v10485_v45 }
 0x1c5   : > { %9487 = vmatpush1.bf16.msra.mxu1 %v9486_v19  ;;  %9551 = vmatpush1.bf16.msra.mxu0 %v9550_v20 }
 0x1c6   : > { %9489 = vmatprep.subr.bf16.mxu1 %v9488_v22  ;;  %9553 = vmatprep.subr.bf16.mxu0 %v9552_v23  ;;  %v1531_v23 = vrot.slane %v1491_v2, %v10489_v48 }
 0x1c9   : > { %9491 = vmatpush1.bf16.msra.mxu1 %v9490_v28  ;;  %9555 = vmatpush1.bf16.msra.mxu0 %v9554_v29  ;;  %v1539_v28 = vrot.slane %v1499_v6, %v10489_v48  ;;  %v1627_v29 = vrot.slane %v1587_v7, %v10491_v49 }
 0x1ca   : > { %9092 = vmatprep.subr.msk.mxu1 %vm1712_vm1, %v1704_v32 }
 0x1cc   : > { %1199 = vmatmul.mubr.f32.vlgmr.msra.gmra.mrb[4].mxu1 %v10416_v27  ;;  %1276 = vmatmul.mubr.f32.vlgmr.msra.gmra.mrb[8].mxu0 %v10416_v27  ;;  %v1705_v27 = vcombine.high %v10440_v31, %v10440_v31 }
 0x1cd   : > { %1204 = vmatprep.mubr.f32.mxu1 %v10422_v46  ;;  %1281 = vmatprep.mubr.f32.mxu0 %v10422_v46  ;;  %v1699_v46 = vld [vmem:[#allocation11] sm:$0x3] }
 0x1ce   : > { %9095 = vmatprep.subr.msk.mxu0 %vm1712_vm1, %v1705_v27  ;;  %9093 = vmatpush1.msk.msra.mxu1 %vm1712_vm1, %v10437_v30 }
 0x1cf   : > { %9096 = vmatpush1.msk.msra.mxu0 %vm1712_vm1, %v10440_v31  ;;  %9098 = vmatprep.subr.msk.mxu1 %vm1712_vm1, %v1706_v34 }
 0x1d0   : > { %1205 = vmatmul.mubr.f32.gmra.mrb[6].mxu1 %v10420_v41  ;;  %1282 = vmatmul.mubr.f32.gmra.mrb[10].mxu0 %v10420_v41  ;;  %v10450_v41 = vld [vmem:[%s10379_s19 + $0x18] sm:$0xff]  ;;  %s12450_s19 = sld [smem:[#allocation64_spill]] }
 0x1d1   : > { %1793 = vmatprep.mubr.f32.mxu1 %v12369_v1  ;;  %1864 = vmatprep.mubr.f32.mxu0 %v12369_v1  ;;  %v1707_v35 = vcombine.high %v10450_v41, %v10450_v41 }
 0x1d3   : > { %9101 = vmatprep.subr.msk.mxu0 %vm1712_vm1, %v1707_v35 }
 0x1d4   : > { %9094 = vmatmul.mubr.msk.f32.vlgmr.msra.gmra.mrb[8].mxu1 %vm1708_vm2, %v1699_v46  ;;  %9097 = vmatmul.mubr.msk.f32.vlgmr.msra.gmra.mrb[12].mxu0 %vm1708_vm2, %v1699_v46 }
 0x1d5   : > { %9099 = vmatpush1.msk.msra.mxu1 %vm1712_vm1, %v10447_v33  ;;  %1935 = vmatprep.mubr.f32.mxu1 %v12369_v1 }
 0x1d6   : > { %9102 = vmatpush1.msk.msra.mxu0 %vm1712_vm1, %v10450_v41  ;;  %2006 = vmatprep.mubr.f32.mxu0 %v12369_v1 }
 0x1d8   : > { %9100 = vmatmul.mubr.msk.f32.vlgmr.msra.gmra.mrb[10].mxu1 %vm1708_vm2, %v1699_v46  ;;  %9103 = vmatmul.mubr.msk.f32.vlgmr.msra.gmra.mrb[14].mxu0 %vm1708_vm2, %v1699_v46 }
 0x1d9   : > { %2104 = vmatprep.mubr.f32.mxu1 %v12369_v1  ;;  %2175 = vmatprep.mubr.f32.mxu0 %v12369_v1 }
 0x25f   : > { %v1046_v12 = vpop.f32.mrb[0].mxu1  ;;  %v1123_v13 = vpop.f32.mrb[4].mxu0 }
 0x260   : > { %v1444_v19 = vmul.f32 %v1415_v63, %v1046_v12  ;;  %v1446_v20 = vmul.f32 %v1423_v0, %v1123_v13  ;;  %v1048_v21 = vpop.f32.mrb[1].mxu1  ;;  %v1125_v22 = vpop.f32.mrb[5].mxu0  ;;  %v1364_v32 = vmul.f32 %v1335_v8, %v1046_v12  ;;  %v1366_v46 = vmul.f32 %v1343_v9, %v1123_v13 }
 0x261   : > { %v1445_v25 = vmul.f32 %v1419_v4, %v1048_v21  ;;  %v1447_v26 = vmul.f32 %v1427_v5, %v1125_v22  ;;  %v1365_v35 = vmul.f32 %v1339_v10, %v1048_v21  ;;  %v1367_v37 = vmul.f32 %v1347_v11, %v1125_v22  ;;  %v10529_v12 = vpop.permute.xlu0 %1687  ;;  %v620_v21 = vld [vmem:[#allocation8 + $0x10] sm:$0xff]  ;;  %v621_v22 = vld [vmem:[#allocation8 + $0x18] sm:$0xff] }
 0x262   : > { %v1460_v27 = vrot.slane %v1444_v19, 4  ;;  %v1462_v34 = vrot.slane %v1446_v20, 4  ;;  %v10540_v19 = vld [vmem:[#allocation9] sm:$0x3] }
 0x263   : > { %v1461_v36 = vrot.slane %v1445_v25, 4  ;;  %v1463_v39 = vrot.slane %v1447_v26, 4  ;;  %v1052_v42 = vpop.f32.mrb[2].mxu1  ;;  %v1129_v43 = vpop.f32.mrb[6].mxu0  ;;  %v1315_v25 = vrot.slane %v620_v21, %v10487_v47  ;;  %v1395_v26 = vrot.slane %v620_v21, %v10483_v44 }
 0x264   : > { %v1476_v50 = vadd.f32 %v1460_v27, %v1364_v32  ;;  %v1478_v16 = vadd.f32 %v1462_v34, %v1366_v46  ;;  %v1556_v53 = vmul.f32 %v1527_v14, %v1052_v42  ;;  %v1644_v54 = vmul.f32 %v1615_v15, %v1052_v42  ;;  %v1054_v55 = vpop.f32.mrb[3].mxu1  ;;  %v1131_v56 = vpop.f32.mrb[7].mxu0 }
 0x265   : > { %v1477_v57 = vadd.f32 %v1461_v36, %v1365_v35  ;;  %v1479_v58 = vadd.f32 %v1463_v39, %v1367_v37  ;;  %v1558_v59 = vmul.f32 %v1535_v17, %v1129_v43  ;;  %v1646_v60 = vmul.f32 %v1623_v18, %v1129_v43 }
 0x266   : > { %v1564_v61 = vadd.f32 %v1556_v53, %v1476_v50  ;;  %v1660_v62 = vrot.slane %v1644_v54, 4  ;;  %v1557_v63 = vmul.f32 %v1531_v23, %v1054_v55  ;;  %v1645_v0 = vmul.f32 %v1619_v24, %v1054_v55 }
 0x267   : > { %v1566_v2 = vadd.f32 %v1558_v59, %v1478_v16  ;;  %v1662_v3 = vrot.slane %v1646_v60, 4  ;;  %v1559_v4 = vmul.f32 %v1539_v28, %v1131_v56  ;;  %v1647_v5 = vmul.f32 %v1627_v29, %v1131_v56 }
 0x268   : > { %v1676_v6 = vadd.f32 %v1660_v62, %v1564_v61  ;;  %v1565_v7 = vadd.f32 %v1557_v63, %v1477_v57  ;;  %v1661_v8 = vrot.slane %v1645_v0, 4  ;;  %v1391_v23 = vrot.slane %v620_v21, %v10481_v40 }
 0x269   : > { %v1678_v9 = vadd.f32 %v1662_v3, %v1566_v2  ;;  %v1567_v10 = vadd.f32 %v1559_v4, %v1479_v58  ;;  %v1663_v11 = vrot.slane %v1647_v5, 4  ;;  %v1399_v24 = vrot.slane %v621_v22, %v10481_v40 }
 0x26a   : > { %v1677_v13 = vadd.f32 %v1661_v8, %v1565_v7  ;;  %v10538_v18 = vadd.f32 %v10529_v12, %v1676_v6  ;;  %v1323_v28 = vrot.slane %v621_v22, %v10487_v47  ;;  %v1403_v29 = vrot.slane %v621_v22, %v10483_v44 }
 0x26b   : > { %v1679_v14 = vadd.f32 %v1663_v11, %v1567_v10  ;;  %v10545_v20 = vadd.f32 %v10529_v12, %v1678_v9  ;;  %v1311_v32 = vrot.slane %v620_v21, %v10485_v45  ;;  %v1319_v27 = vrot.slane %v621_v22, %v10485_v45 }
 0x26c   : > { %v10532_v15 = vadd.f32 %v10529_v12, %v1677_v13  ;;  %v1503_v46 = vrot.slane %v620_v21, %v10489_v48  ;;  %v1591_v34 = vrot.slane %v620_v21, %v10491_v49  ;;  %v1511_v35 = vrot.slane %v621_v22, %v10489_v48 }
 0x26d   : > { %v10535_v17 = vadd.f32 %v10529_v12, %v1679_v14  ;;  %v1599_v36 = vrot.slane %v621_v22, %v10491_v49  ;;  %v1431_v37 = vrot.slane %v1391_v23, %v10481_v40  ;;  %v1439_v39 = vrot.slane %v1399_v24, %v10481_v40 }
 0x26e   : > { %9104 = vmatprep.subr.msk.mxu1 %vm1712_vm1, %v10532_v15  ;;  %v1507_v47 = vrot.slane %v620_v21, %v10495_v51  ;;  %v1595_v42 = vrot.slane %v620_v21, %v10497_v52  ;;  %v1355_v43 = vrot.slane %v1315_v25, %v10485_v45  ;;  %v1435_v50 = vrot.slane %v1395_v26, %v10481_v40 }
 0x26f   : > { %9107 = vmatprep.subr.msk.mxu0 %vm1712_vm1, %v10535_v17  ;;  %9105 = vmatpush1.msk.msra.mxu1 %vm1712_vm1, %v10538_v18  ;;  %v1363_v16 = vrot.slane %v1323_v28, %v10485_v45  ;;  %v1443_v53 = vrot.slane %v1403_v29, %v10481_v40  ;;  %v1351_v54 = vrot.slane %v1311_v32, %v10485_v45 }
 0x270   : > { %9108 = vmatpush1.msk.msra.mxu0 %vm1712_vm1, %v10545_v20  ;;  %9106 = vmatmul.mubr.msk.f32.vlgmr.msra.gmra.mrb[8].mxu1 %vm1708_vm2, %v10540_v19  ;;  %v1359_v55 = vrot.slane %v1319_v27, %v10485_v45  ;;  %v1543_v56 = vrot.slane %v1503_v46, %v10489_v48  ;;  %v1515_v57 = vrot.slane %v621_v22, %v10495_v51 }
 0x271   : > { %9109 = vmatmul.mubr.msk.f32.vlgmr.msra.gmra.mrb[12].mxu0 %vm1708_vm2, %v10540_v19  ;;  %2246 = vmatprep.mubr.f32.mxu1 %v12369_v1  ;;  %v1631_v60 = vrot.slane %v1591_v34, %v10491_v49  ;;  %v1551_v61 = vrot.slane %v1511_v35, %v10489_v48  ;;  %v1639_v62 = vrot.slane %v1599_v36, %v10491_v49 }
 0x272   : > { %2317 = vmatprep.mubr.f32.mxu0 %v12369_v1  ;;  %v1603_v63 = vrot.slane %v621_v22, %v10497_v52  ;;  %v1547_v5 = vrot.slane %v1507_v47, %v10489_v48  ;;  %v1635_v6 = vrot.slane %v1595_v42, %v10491_v49  ;;  %v1555_v26 = vrot.slane %v1515_v57, %v10489_v48 }
 0x274   : > { %v1643_v28 = vrot.slane %v1603_v63, %v10491_v49 }
 0x29f   : > { %v1200_v58 = vpop.f32.mrb[4].mxu1  ;;  %v1277_v59 = vpop.f32.mrb[8].mxu0 }
 0x2a0   : > { %v1448_v0 = vmul.f32 %v1431_v37, %v1200_v58  ;;  %v1450_v2 = vmul.f32 %v1439_v39, %v1277_v59  ;;  %v1202_v3 = vpop.f32.mrb[5].mxu1  ;;  %v1279_v4 = vpop.f32.mrb[9].mxu0  ;;  %v1368_v11 = vmul.f32 %v1351_v54, %v1200_v58  ;;  %v1370_v14 = vmul.f32 %v1359_v55, %v1277_v59 }
 0x2a1   : > { %v1369_v7 = vmul.f32 %v1355_v43, %v1202_v3  ;;  %v1449_v8 = vmul.f32 %v1435_v50, %v1202_v3  ;;  %v1371_v9 = vmul.f32 %v1363_v16, %v1279_v4  ;;  %v1451_v10 = vmul.f32 %v1443_v53, %v1279_v4 }
 0x2a2   : > { %v1464_v13 = vrot.slane %v1448_v0, 4  ;;  %v1466_v21 = vrot.slane %v1450_v2, 4 }
 0x2a3   : > { %v1465_v23 = vrot.slane %v1449_v8, 4  ;;  %v1467_v24 = vrot.slane %v1451_v10, 4  ;;  %v1206_v25 = vpop.f32.mrb[6].mxu1  ;;  %v1283_v22 = vpop.f32.mrb[10].mxu0 }
 0x2a4   : > { %v1480_v29 = vadd.f32 %v1464_v13, %v1368_v11  ;;  %v1482_v32 = vadd.f32 %v1466_v21, %v1370_v14  ;;  %v1560_v27 = vmul.f32 %v1543_v56, %v1206_v25  ;;  %v1648_v46 = vmul.f32 %v1631_v60, %v1206_v25  ;;  %v1208_v34 = vpop.f32.mrb[7].mxu1  ;;  %v1285_v35 = vpop.f32.mrb[11].mxu0 }
 0x2a5   : > { %v1481_v36 = vadd.f32 %v1465_v23, %v1369_v7  ;;  %v1483_v37 = vadd.f32 %v1467_v24, %v1371_v9  ;;  %v1562_v39 = vmul.f32 %v1551_v61, %v1283_v22  ;;  %v1650_v47 = vmul.f32 %v1639_v62, %v1283_v22 }
 0x2a6   : > { %v1568_v42 = vadd.f32 %v1560_v27, %v1480_v29  ;;  %v1664_v43 = vrot.slane %v1648_v46, 4  ;;  %v1561_v50 = vmul.f32 %v1547_v5, %v1208_v34  ;;  %v1649_v16 = vmul.f32 %v1635_v6, %v1208_v34  ;;  %v10617_v6 = vpop.permute.xlu0 %2327 }
 0x2a7   : > { %v1570_v53 = vadd.f32 %v1562_v39, %v1482_v32  ;;  %v1666_v54 = vrot.slane %v1650_v47, 4  ;;  %v1563_v55 = vmul.f32 %v1555_v26, %v1285_v35  ;;  %v1651_v57 = vmul.f32 %v1643_v28, %v1285_v35 }
 0x2a8   : > { %v1680_v58 = vadd.f32 %v1664_v43, %v1568_v42  ;;  %v1569_v59 = vadd.f32 %v1561_v50, %v1481_v36  ;;  %v1665_v63 = vrot.slane %v1649_v16, 4 }
 0x2a9   : > { %v1682_v0 = vadd.f32 %v1666_v54, %v1570_v53  ;;  %v1571_v56 = vadd.f32 %v1563_v55, %v1483_v37  ;;  %v1667_v60 = vrot.slane %v1651_v57, 4 }
 0x2aa   : > { %v1681_v2 = vadd.f32 %v1665_v63, %v1569_v59  ;;  %v10595_v61 = vadd.f32 %v10529_v12, %v1680_v58 }
 0x2ab   : > { %v1683_v3 = vadd.f32 %v1667_v60, %v1571_v56  ;;  %v10601_v5 = vadd.f32 %v10529_v12, %v1682_v0 }
 0x2ac   : > { %v10592_v4 = vadd.f32 %v10529_v12, %v1681_v2 }
 0x2ad   : > { %v10598_v62 = vadd.f32 %v10529_v12, %v1683_v3  ;;  %v2351_v12 = vpop.permute.xlu1 %2350 }
 0x2ae   : > { %9110 = vmatprep.subr.msk.mxu1 %vm1712_vm1, %v10592_v4  ;;  %v10620_v9 = vrot.slane %v2351_v12, %v10485_v45 }
 0x2af   : > { %9113 = vmatprep.subr.msk.mxu0 %vm1712_vm1, %v10598_v62  ;;  %9111 = vmatpush1.msk.msra.mxu1 %vm1712_vm1, %v10595_v61 }
 0x2b0   : > { %9114 = vmatpush1.msk.msra.mxu0 %vm1712_vm1, %v10601_v5  ;;  %9112 = vmatmul.mubr.msk.f32.vlgmr.msra.gmra.mrb[10].mxu1 %vm1708_vm2, %v10540_v19 }
 0x2b1   : > { %9115 = vmatmul.mubr.msk.f32.vlgmr.msra.gmra.mrb[14].mxu0 %vm1708_vm2, %v10540_v19  ;;  %2704 = vmatprep.mubr.f32.mxu1 %v12369_v1  ;;  %v2384_v7 = vpop.permute.xlu1 %2383  ;;  %v2368_v19 = vpop.permute.xlu0 %2367 }
 0x2b2   : > { %2775 = vmatprep.mubr.f32.mxu0 %v12369_v1  ;;  %v10624_v14 = vrot.slane %v2384_v7, %v10485_v45  ;;  %v10630_v29 = vrot.slane %v2368_v19, %v10485_v45 }
 0x343   : > { %v2106_v8 = vpop.f32.mrb[8].mxu1 }
 0x344   : > { %v2330_v10 = vadd.f32 %v10617_v6, %v2106_v8  ;;  %v2177_v11 = vpop.f32.mrb[12].mxu0  ;;  %v2108_v13 = vpop.f32.mrb[9].mxu1 }
 0x345   : > { %v2332_v21 = vadd.f32 %v10617_v6, %v2177_v11  ;;  %v2331_v23 = vadd.f32 %v10617_v6, %v2108_v13  ;;  %v2179_v24 = vpop.f32.mrb[13].mxu0 }
 0x346   : > { %v2338_v25 = vmax.f32 %v2330_v10, 0.0  ;;  %v2333_v22 = vadd.f32 %v10617_v6, %v2179_v24 }
 0x347   : > { %v2340_v26 = vmax.f32 %v2332_v21, 0.0  ;;  %v2339_v28 = vmax.f32 %v2331_v23, 0.0 }
 0x348   : > { %v2357_v32 = vmul.f32 %v10620_v9, %v2338_v25  ;;  %v2341_v27 = vmax.f32 %v2333_v22, 0.0  ;;  %v2390_v46 = vmul.f32 %v10624_v14, %v2338_v25 }
 0x349   : > { %v2359_v34 = vmul.f32 %v10620_v9, %v2340_v26  ;;  %v2358_v35 = vmul.f32 %v10620_v9, %v2339_v28  ;;  %v2391_v36 = vmul.f32 %v10624_v14, %v2339_v28  ;;  %v2392_v37 = vmul.f32 %v10624_v14, %v2340_v26 }
 0x34a   : > { %v2374_v39 = vadd.f32 %v10630_v29, %v2357_v32  ;;  %v2360_v47 = vmul.f32 %v10620_v9, %v2341_v27  ;;  %v2393_v42 = vmul.f32 %v10624_v14, %v2341_v27  ;;  %v2406_v43 = vrot.slane %v2390_v46, 1 }
 0x34b   : > { %v2376_v50 = vadd.f32 %v10630_v29, %v2359_v34  ;;  %v2375_v16 = vadd.f32 %v10630_v29, %v2358_v35  ;;  %v2407_v53 = vrot.slane %v2391_v36, 1  ;;  %v2408_v54 = vrot.slane %v2392_v37, 1 }
 0x34c   : > { %v2377_v55 = vadd.f32 %v10630_v29, %v2360_v47  ;;  %v2409_v57 = vrot.slane %v2393_v42, 1  ;;  %v2422_v58 = vadd.f32 %v2406_v43, %v2374_v39  ;;  %v2542_v34 = vrot.slane %v10538_v18, 4 }
 0x34d   : > { %v2423_v59 = vadd.f32 %v2407_v53, %v2375_v16  ;;  %v2424_v63 = vadd.f32 %v2408_v54, %v2376_v50  ;;  %v2544_v37 = vrot.slane %v10545_v20, 4  ;;  %v2543_v39 = vrot.slane %v10532_v15, 4 }
 0x34e   : > { %v2425_v0 = vadd.f32 %v2409_v57, %v2377_v55  ;;  %v9116_v56 = vmul.f32 -1.442695, %v2422_v58  ;;  %v2545_v50 = vrot.slane %v10535_v17, 4 }
 0x34f   : > { %v9117_v60 = vmul.f32 -1.442695, %v2423_v59  ;;  %v9118_v2 = vmul.f32 -1.442695, %v2424_v63 }
 0x350   : > { %9800 = vpow2.f32 %v9116_v56  ;;  %v9119_v3 = vmul.f32 -1.442695, %v2425_v0 }
 0x351   : > { %9802 = vpow2.f32 %v9117_v60 }
 0x352   : > { %9804 = vpow2.f32 %v9118_v2 }
 0x353   : > { %9806 = vpow2.f32 %v9119_v3 }
 0x35a   : > { %v9801_v12 = vpop.eup %9800 }
 0x35b   : > { %v9803_v7 = vpop.eup %9802  ;;  %v2454_v8 = vadd.f32 1.0, %v9801_v12 }
 0x35c   : > { %v9805_v10 = vpop.eup %9804  ;;  %v2455_v11 = vadd.f32 1.0, %v9803_v7 }
 0x35d   : > { %v9807_v13 = vpop.eup %9806  ;;  %v2456_v19 = vadd.f32 1.0, %v9805_v10  ;;  %9808 = vrcp.f32 %v2454_v8 }
 0x35e   : > { %v2457_v21 = vadd.f32 1.0, %v9807_v13  ;;  %9810 = vrcp.f32 %v2455_v11 }
 0x35f   : > { %9812 = vrcp.f32 %v2456_v19 }
 0x360   : > { %9814 = vrcp.f32 %v2457_v21 }
 0x367   : > { %v9809_v23 = vpop.eup %9808 }
 0x368   : > { %v9811_v24 = vpop.eup %9810  ;;  %v2481_v25 = vrot.slane %v9809_v23, %v10485_v45 }
 0x369   : > { %v9813_v22 = vpop.eup %9812  ;;  %v2485_v26 = vrot.slane %v9811_v24, %v10485_v45 }
 0x36a   : > { %v9815_v28 = vpop.eup %9814  ;;  %v2489_v32 = vrot.slane %v9813_v22, %v10485_v45 }
 0x36b   : > { %v2493_v27 = vrot.slane %v9815_v28, %v10485_v45  ;;  %v2518_v46 = vcombine.low %v2481_v25, %v2485_v26 }
 0x36d   : > { %v2519_v35 = vcombine.low %v2489_v32, %v2493_v27  ;;  %v2526_v36 = vmul.f32 %v2518_v46, %v10437_v30 }
 0x36f   : > { %v2527_v47 = vmul.f32 %v2519_v35, %v10440_v31  ;;  %v10654_v42 = vsel %vm1712_vm1, %v2526_v36, %v2542_v34  ;;  %v2534_v43 = vcombine.high %v2526_v36, %v2526_v36 }
 0x370   : > { %2569 = vrot.lane.b32.xlu0 %v10654_v42, %s10060_s18 }
 0x371   : > { %v10660_v18 = vsel %vm1712_vm1, %v2527_v47, %v2544_v37  ;;  %v2535_v30 = vcombine.high %v2527_v47, %v2527_v47  ;;  %v10663_v20 = vsel %vm1712_vm1, %v2534_v43, %v2543_v39 }
 0x372   : > { %2573 = vrot.lane.b32.xlu1 %v10660_v18, %s10060_s18 }
 0x373   : > { %v10668_v31 = vsel %vm1712_vm1, %v2535_v30, %v2545_v50 }
 0x374   : > { %3211 = vrot.lane.b32.xlu0 %v10654_v42, %s10061_s16 }
 0x376   : > { %3215 = vrot.lane.b32.xlu1 %v10660_v18, %s10061_s16 }
 0x378   : > { %3573 = vrot.lane.b32.xlu0 %v10654_v42, %s12367_s14 }
 0x37a   : > { %3577 = vrot.lane.b32.xlu1 %v10660_v18, %s12367_s14 }
 0x37c   : > { %3935 = vrot.lane.b32.xlu0 %v10654_v42, %s12361_s0 }
 0x37e   : > { %3939 = vrot.lane.b32.xlu1 %v10660_v18, %s12361_s0 }
 0x380   : > { %2575 = vrot.lane.b32.xlu0 %v10668_v31, %s10060_s18 }
 0x382   : > { %4301 = vrot.lane.b32.xlu1 %v10660_v18, %s10064_s10 }
 0x383   : > { %v2248_v15 = vpop.f32.mrb[10].mxu1 }
 0x384   : > { %v2334_v17 = vadd.f32 %v10617_v6, %v2248_v15  ;;  %v2319_v16 = vpop.f32.mrb[14].mxu0  ;;  %v2250_v53 = vpop.f32.mrb[11].mxu1  ;;  %3217 = vrot.lane.b32.xlu0 %v10668_v31, %s10061_s16 }
 0x385   : > { %v2336_v54 = vadd.f32 %v10617_v6, %v2319_v16  ;;  %v2335_v55 = vadd.f32 %v10617_v6, %v2250_v53  ;;  %v2321_v57 = vpop.f32.mrb[15].mxu0 }
 0x386   : > { %v2342_v58 = vmax.f32 %v2334_v17, 0.0  ;;  %v2337_v59 = vadd.f32 %v10617_v6, %v2321_v57  ;;  %4297 = vrot.lane.b32.xlu1 %v10654_v42, %s10064_s10 }
 0x387   : > { %v2344_v63 = vmax.f32 %v2336_v54, 0.0  ;;  %v2343_v0 = vmax.f32 %v2335_v55, 0.0 }
 0x388   : > { %v2361_v56 = vmul.f32 %v10620_v9, %v2342_v58  ;;  %v2394_v60 = vmul.f32 %v10624_v14, %v2342_v58  ;;  %v2345_v2 = vmax.f32 %v2337_v59, 0.0  ;;  %3579 = vrot.lane.b32.xlu0 %v10668_v31, %s12367_s14 }
 0x389   : > { %v2363_v3 = vmul.f32 %v10620_v9, %v2344_v63  ;;  %v2396_v12 = vmul.f32 %v10624_v14, %v2344_v63  ;;  %v2362_v7 = vmul.f32 %v10620_v9, %v2343_v0  ;;  %v2395_v6 = vmul.f32 %v10624_v14, %v2343_v0 }
 0x38a   : > { %v2378_v8 = vadd.f32 %v10630_v29, %v2361_v56  ;;  %v2410_v10 = vrot.slane %v2394_v60, 1  ;;  %v2364_v11 = vmul.f32 %v10620_v9, %v2345_v2  ;;  %v2397_v13 = vmul.f32 %v10624_v14, %v2345_v2  ;;  %2571 = vrot.lane.b32.xlu1 %v10663_v20, %s10060_s18 }
 0x38b   : > { %v2380_v19 = vadd.f32 %v10630_v29, %v2363_v3  ;;  %v2412_v21 = vrot.slane %v2396_v12, 1  ;;  %v2379_v23 = vadd.f32 %v10630_v29, %v2362_v7  ;;  %v2411_v24 = vrot.slane %v2395_v6, 1 }
 0x38c   : > { %v2426_v25 = vadd.f32 %v2410_v10, %v2378_v8  ;;  %v2381_v22 = vadd.f32 %v10630_v29, %v2364_v11  ;;  %v2413_v26 = vrot.slane %v2397_v13, 1  ;;  %3941 = vrot.lane.b32.xlu0 %v10668_v31, %s12361_s0  ;;  %v2546_v63 = vrot.slane %v10595_v61, 4 }
 0x38d   : > { %v2428_v28 = vadd.f32 %v2412_v21, %v2380_v19  ;;  %v2427_v9 = vadd.f32 %v2411_v24, %v2379_v23  ;;  %v2548_v56 = vrot.slane %v10601_v5, 4  ;;  %v2547_v2 = vrot.slane %v10592_v4, 4  ;;  %v10822_v19 = vld [vmem:[%s12450_s19 + $0x18] sm:$0xff] }
 0x38e   : > { %v9120_v32 = vmul.f32 -1.442695, %v2426_v25  ;;  %v2429_v14 = vadd.f32 %v2413_v26, %v2381_v22  ;;  %3213 = vrot.lane.b32.xlu1 %v10663_v20, %s10061_s16  ;;  %v2549_v7 = vrot.slane %v10598_v62, 4  ;;  %v10815_v13 = vand.u32 127, %v1292_v38 }
 0x38f   : > { %v9122_v27 = vmul.f32 -1.442695, %v2428_v28  ;;  %v9121_v46 = vmul.f32 -1.442695, %v2427_v9  ;;  %v10833_v38 = vrot.slane %v10822_v19, %v10485_v45  ;;  %v10854_v28 = vld [vmem:[%s12450_s19 + $0x10] sm:$0xff]  ;;  %v10859_v9 = vld [vmem:[%s12450_s19 + $0x8] sm:$0xff] }
 0x390   : > { %9816 = vpow2.f32 %v9120_v32  ;;  %v9123_v34 = vmul.f32 -1.442695, %v2429_v14  ;;  %4299 = vrot.lane.b32.xlu0 %v10663_v20, %s10064_s10  ;;  %vm2587_vm3 = vcmp.lt.s32.totalorder %v10815_v13, 17  ;;  %v10869_v14 = vrot.slane %v10854_v28, %v10485_v45 }
 0x391   : > { %9818 = vpow2.f32 %v9122_v27  ;;  %12451 = vst [vmem:[#allocation19_spill] sm:$0xff] %v10833_v38  ;;  %v10873_v27 = vrot.slane %v10859_v9, %v10485_v45  ;;  %vm3227_vm4 = vcmp.lt.s32.totalorder %v10815_v13, 16  ;;  %vm3589_vm5 = vcmp.lt.s32.totalorder %v10815_v13, 15 }
 0x392   : > { %9820 = vpow2.f32 %v9121_v46  ;;  %3575 = vrot.lane.b32.xlu1 %v10663_v20, %s12367_s14  ;;  %12453 = vst [vmem:[#allocation21_spill] sm:$0xff] %v10869_v14  ;;  %vm3951_vm6 = vcmp.lt.s32.totalorder %v10815_v13, 1  ;;  %vm4313_vm7 = vcmp.lt.s32.totalorder %v10815_v13, 127  ;;  %vm4675_vm8 = vcmp.lt.s32.totalorder %v10815_v13, 113 }
 0x393   : > { %9822 = vpow2.f32 %v9123_v34  ;;  %12454 = vst [vmem:[#allocation22_spill] sm:$0xff] %v10873_v27  ;;  %vm5037_vm9 = vcmp.lt.s32.totalorder %v10815_v13, 112  ;;  %vm5399_vm10 = vcmp.lt.s32.totalorder %v10815_v13, 111 }
 0x396   : > { %3937 = vrot.lane.b32.xlu1 %v10663_v20, %s12361_s0 }
 0x39a   : > { %v9817_v29 = vpop.eup %9816  ;;  %4303 = vrot.lane.b32.xlu1 %v10668_v31, %s10064_s10 }
 0x39b   : > { %v9819_v35 = vpop.eup %9818  ;;  %v2458_v36 = vadd.f32 1.0, %v9817_v29 }
 0x39c   : > { %v9821_v37 = vpop.eup %9820  ;;  %v2460_v39 = vadd.f32 1.0, %v9819_v35 }
 0x39d   : > { %v9823_v47 = vpop.eup %9822  ;;  %9824 = vrcp.f32 %v2458_v36  ;;  %v2459_v43 = vadd.f32 1.0, %v9821_v37  ;;  %v10889_v37 = vld [vmem:[%s12455_s4] sm:$0xf] }
 0x39e   : > { %9826 = vrcp.f32 %v2460_v39  ;;  %v2461_v50 = vadd.f32 1.0, %v9823_v47 }
 0x39f   : > { %9828 = vrcp.f32 %v2459_v43 }
 0x3a0   : > { %9830 = vrcp.f32 %v2461_v50 }
 0x3a7   : > { %v9825_v30 = vpop.eup %9824 }
 0x3a8   : > { %v9827_v15 = vpop.eup %9826  ;;  %v2497_v17 = vrot.slane %v9825_v30, %v10485_v45 }
 0x3a9   : > { %v9829_v16 = vpop.eup %9828  ;;  %v2505_v53 = vrot.slane %v9827_v15, %v10485_v45 }
 0x3aa   : > { %v9831_v54 = vpop.eup %9830  ;;  %v2501_v55 = vrot.slane %v9829_v16, %v10485_v45 }
 0x3ab   : > { %v2509_v57 = vrot.slane %v9831_v54, %v10485_v45 }
 0x3ac   : > { %v2520_v58 = vcombine.low %v2497_v17, %v2501_v55 }
 0x3ad   : > { %v2521_v59 = vcombine.low %v2505_v53, %v2509_v57 }
 0x3ae   : > { %v2528_v0 = vmul.f32 %v2520_v58, %v10447_v33 }
 0x3af   : > { %v2529_v60 = vmul.f32 %v2521_v59, %v10450_v41 }
 0x3b0   : > { %v10732_v3 = vsel %vm1712_vm1, %v2528_v0, %v2546_v63  ;;  %v2536_v12 = vcombine.high %v2528_v0, %v2528_v0 }
 0x3b1   : > { %v10736_v6 = vsel %vm1712_vm1, %v2529_v60, %v2548_v56  ;;  %2577 = vrot.lane.b32.xlu0 %v10732_v3, %s10060_s18  ;;  %v2537_v61 = vcombine.high %v2529_v60, %v2529_v60  ;;  %v10936_v60 = vld [vmem:[%s12450_s19 + $0x38] sm:$0xff] }
 0x3b2   : > { %2581 = vrot.lane.b32.xlu1 %v10736_v6, %s10060_s18  ;;  %v10743_v33 = vsel %vm1712_vm1, %v2536_v12, %v2547_v2  ;;  %v10943_v12 = vld [vmem:[%s12450_s19 + $0x28] sm:$0xff] }
 0x3b3   : > { %v10746_v41 = vsel %vm1712_vm1, %v2537_v61, %v2549_v7  ;;  %v10948_v7 = vld [vmem:[%s12450_s19] sm:$0xff] }
 0x3b4   : > { %v10953_v61 = vld [vmem:[%s12450_s19 + $0x20] sm:$0xff] }
 0x3b5   : > { %3219 = vrot.lane.b32.xlu0 %v10732_v3, %s10061_s16 }
 0x3b6   : > { %3223 = vrot.lane.b32.xlu1 %v10736_v6, %s10061_s16 }
 0x3b9   : > { %3581 = vrot.lane.b32.xlu0 %v10732_v3, %s12367_s14 }
 0x3ba   : > { %3585 = vrot.lane.b32.xlu1 %v10736_v6, %s12367_s14 }
 0x3bd   : > { %3943 = vrot.lane.b32.xlu0 %v10732_v3, %s12361_s0 }
 0x3be   : > { %3947 = vrot.lane.b32.xlu1 %v10736_v6, %s12361_s0 }
 0x3c1   : > { %4305 = vrot.lane.b32.xlu0 %v10732_v3, %s10064_s10 }
 0x3c2   : > { %2579 = vrot.lane.b32.xlu1 %v10743_v33, %s10060_s18 }
 0x3c5   : > { %2583 = vrot.lane.b32.xlu0 %v10746_v41, %s10060_s18 }
 0x3c6   : > { %4309 = vrot.lane.b32.xlu1 %v10736_v6, %s10064_s10 }
 0x3c9   : > { %4667 = vrot.lane.b32.xlu0 %v10732_v3, %s12359_s21 }
 0x3ca   : > { %4665 = vrot.lane.b32.xlu1 %v10668_v31, %s12359_s21 }
 0x3cd   : > { %4661 = vrot.lane.b32.xlu0 %v10663_v20, %s12359_s21 }
 0x3ce   : > { %4663 = vrot.lane.b32.xlu1 %v10660_v18, %s12359_s21 }
 0x3d1   : > { %3225 = vrot.lane.b32.xlu0 %v10746_v41, %s10061_s16 }
 0x3d2   : > { %3221 = vrot.lane.b32.xlu1 %v10743_v33, %s10061_s16 }
 0x3d5   : > { %3587 = vrot.lane.b32.xlu0 %v10746_v41, %s12367_s14 }
 0x3d6   : > { %4659 = vrot.lane.b32.xlu1 %v10654_v42, %s12359_s21 }
 0x3d9   : > { %3949 = vrot.lane.b32.xlu0 %v10746_v41, %s12361_s0 }
 0x3da   : > { %3583 = vrot.lane.b32.xlu1 %v10743_v33, %s12367_s14  ;;  %s12502_s14 = smov 15  }
 0x3dd   : > { %5029 = vrot.lane.b32.xlu0 %v10732_v3, %s12365_s9 }
 0x3de   : > { %4671 = vrot.lane.b32.xlu1 %v10736_v6, %s12359_s21 }
 0x3e1   : > { %5023 = vrot.lane.b32.xlu0 %v10663_v20, %s12365_s9 }
 0x3e2   : > { %3945 = vrot.lane.b32.xlu1 %v10743_v33, %s12361_s0  ;;  %v10796_v4 = vpop.permute.xlu0 %2569  ;;  %s12456_s0 = sld [smem:[#allocation67_spill]] }
 0x3e4   : > { %v2574_v62 = vpop.permute.xlu1 %2573 }
 0x3e5   : > { %5391 = vrot.lane.b32.xlu0 %v10732_v3, %s12363_s29 }
 0x3e6   : > { %5027 = vrot.lane.b32.xlu1 %v10668_v31, %s12365_s9  ;;  %v10802_v5 = vpop.permute.xlu0 %3211 }
 0x3e8   : > { %v10804_v8 = vpop.permute.xlu1 %3215  ;;  %v2566_v39 = vld [vmem:[%s12456_s0] sm:$0xf] }
 0x3e9   : > { %5385 = vrot.lane.b32.xlu0 %v10663_v20, %s12363_s29 }
 0x3ea   : > { %5025 = vrot.lane.b32.xlu1 %v10660_v18, %s12365_s9  ;;  %v10810_v10 = vpop.permute.xlu0 %3573 }
 0x3ec   : > { %v10812_v11 = vpop.permute.xlu1 %3577 }
 0x3ed   : > { %4311 = vrot.lane.b32.xlu0 %v10746_v41, %s10064_s10 }
 0x3ee   : > { %5021 = vrot.lane.b32.xlu1 %v10654_v42, %s12365_s9  ;;  %v10826_v21 = vpop.permute.xlu0 %3935 }
 0x3f0   : > { %v10828_v23 = vpop.permute.xlu1 %3939 }
 0x3f1   : > { %4307 = vrot.lane.b32.xlu0 %v10743_v33, %s10064_s10 }
 0x3f2   : > { %5033 = vrot.lane.b32.xlu1 %v10736_v6, %s12365_s9  ;;  %v10839_v24 = vpop.permute.xlu0 %2575 }
 0x3f3   : > { %v2592_v25 = vsel %vm2587_vm3, %v2574_v62, %v10839_v24 }
 0x3f4   : > { %v10844_v22 = vpop.permute.xlu1 %4301  ;;  %v2631_v26 = vmul.f32 %v10833_v38, %v2592_v25 }
 0x3f5   : > { %4673 = vrot.lane.b32.xlu0 %v10746_v41, %s12359_s21 }
 0x3f6   : > { %5389 = vrot.lane.b32.xlu1 %v10668_v31, %s12363_s29  ;;  %2711 = vmatprep.subr.mxu0 %v2631_v26  ;;  %v10905_v47 = vpop.permute.xlu0 %3217  ;;  %v10962_v26 = vrot.slane %v10948_v7, %v10485_v45 }
 0x3f8   : > { %v10861_v32 = vpop.permute.xlu1 %4297 }
 0x3f9   : > { %12452 = vst [vmem:[#allocation20_spill] sm:$0xff] %v10861_v32  ;;  %4669 = vrot.lane.b32.xlu0 %v10743_v33, %s12359_s21  ;;  %s12512_s21 = sld [smem:[#allocation66_spill]] }
 0x3fa   : > { %5387 = vrot.lane.b32.xlu1 %v10660_v18, %s12363_s29  ;;  %v10909_v50 = vpop.permute.xlu0 %3579 }
 0x3fc   : > { %v2572_v46 = vpop.permute.xlu1 %2571 }
 0x3fd   : > { %v2593_v34 = vsel %vm2587_vm3, %v2572_v46, %v2574_v62  ;;  %v2594_v29 = vsel %vm2587_vm3, %v10796_v4, %v2572_v46  ;;  %5035 = vrot.lane.b32.xlu0 %v10746_v41, %s12365_s9  ;;  %v10958_v62 = vld [vmem:[%s12450_s19 + $0x30] sm:$0xff]  ;;  %v10966_v46 = vrot.slane %v10936_v60, %v10485_v45 }
 0x3fe   : > { %v2630_v35 = vmul.f32 %v10869_v14, %v2593_v34  ;;  %5383 = vrot.lane.b32.xlu1 %v10654_v42, %s12363_s29  ;;  %v2629_v36 = vmul.f32 %v10873_v27, %v2594_v29  ;;  %v10913_v15 = vpop.permute.xlu0 %3941  ;;  %v10970_v34 = vrot.slane %v10943_v12, %v10485_v45  ;;  %v10974_v29 = vrot.slane %v10953_v61, %v10485_v45 }
 0x400   : > { %2712 = vmatpush1.msra.mxu0 %v2630_v35  ;;  %2640 = vmatprep.subr.mxu1 %v2629_v36  ;;  %v10907_v43 = vpop.permute.xlu1 %3213  ;;  %v10978_v35 = vrot.slane %v10958_v62, %v10485_v45 }
 0x401   : > { %5031 = vrot.lane.b32.xlu0 %v10743_v33, %s12365_s9  ;;  %9126 = vmatmul.mubr.msk.f32.vlgmr.msra.gmra.mrb[16].mxu0 %vm640_vm0, %v10889_v37  ;;  %s12503_s9 = smov 1  }
 0x402   : > { %5395 = vrot.lane.b32.xlu1 %v10736_v6, %s12363_s29  ;;  %2917 = vmatprep.mubr.f32.mxu0 %v12369_v1  ;;  %v10917_v16 = vpop.permute.xlu0 %4299 }
 0x404   : > { %v10911_v30 = vpop.permute.xlu1 %3575 }
 0x405   : > { %5397 = vrot.lane.b32.xlu0 %v10746_v41, %s12363_s29 }
 0x406   : > { %5747 = vperm.xlu1 %9795, %v2566_v39  }
 0x408   : > { %v10915_v17 = vpop.permute.xlu1 %3937 }
 0x409   : > { %5393 = vrot.lane.b32.xlu0 %v10743_v33, %s12363_s29  ;;  %s12504_s29 = smov 113  }
 0x40c   : > { %v10919_v53 = vpop.permute.xlu1 %4303 }
 0x423   : > { %v2578_v54 = vpop.permute.xlu0 %2577 }
 0x424   : > { %v2582_v55 = vpop.permute.xlu1 %2581  ;;  %v2591_v1 = vsel %vm2587_vm3, %v10839_v24, %v2578_v54 }
 0x425   : > { %v2632_v24 = vmul.f32 %v10974_v29, %v2591_v1  ;;  %v11011_v1 = vrot.slane %v10822_v19, %v10481_v40 }
 0x427   : > { %v10921_v57 = vpop.permute.xlu0 %3219 }
 0x428   : > { %v10923_v58 = vpop.permute.xlu1 %3223 }
 0x42b   : > { %v10925_v59 = vpop.permute.xlu0 %3581 }
 0x42c   : > { %v10927_v63 = vpop.permute.xlu1 %3585 }
 0x42f   : > { %v10929_v0 = vpop.permute.xlu0 %3943 }
 0x430   : > { %v10931_v56 = vpop.permute.xlu1 %3947 }
 0x433   : > { %v10938_v2 = vpop.permute.xlu0 %4305 }
 0x434   : > { %v2580_v25 = vpop.permute.xlu1 %2579 }
 0x435   : > { %v2590_v36 = vsel %vm2587_vm3, %v2578_v54, %v2580_v25  ;;  %v2589_v27 = vsel %vm2587_vm3, %v2580_v25, %v2582_v55 }
 0x436   : > { %v2633_v32 = vmul.f32 %v10970_v34, %v2590_v36  ;;  %v2634_v54 = vmul.f32 %v10978_v35, %v2589_v27  ;;  %v11052_v27 = vrot.slane %v10948_v7, %v10481_v40 }
 0x437   : > { %v2584_v39 = vpop.permute.xlu0 %2583 }
 0x438   : > { %v2588_v14 = vsel %vm2587_vm3, %v2582_v55, %v2584_v39  ;;  %v2595_v38 = vsel %vm2587_vm3, %v2584_v39, %v10796_v4  ;;  %v10992_v45 = vpop.permute.xlu1 %4309  ;;  %v9124_v4 = vld [vmem:[%s12455_s4 + $0x10] sm:$0xf] }
 0x439   : > { %v2628_v52 = vmul.f32 %v10962_v26, %v2595_v38  ;;  %v2635_v51 = vmul.f32 %v10966_v46, %v2588_v14 }
 0x43b   : > { %2641 = vmatpush1.msra.mxu1 %v2628_v52  ;;  %2853 = vmatprep.subr.mxu0 %v2635_v51  ;;  %v10999_v25 = vpop.permute.xlu0 %4667  ;;  %v3232_v51 = vsel %vm3227_vm4, %v10804_v8, %v10905_v47 }
 0x43c   : > { %v11002_v55 = vpop.permute.xlu1 %4665  ;;  %9125 = vmatmul.mubr.msk.f32.vlgmr.msra.gmra.mrb[12].mxu1 %vm640_vm0, %v10889_v37  ;;  %2782 = vmatprep.subr.mxu1 %v2633_v32  ;;  %v11030_v32 = vrot.slane %v10854_v28, %v10481_v40  ;;  %v3271_v14 = vmul.f32 %v11011_v1, %v3232_v51 }
 0x43d   : > { %2854 = vmatpush1.msra.mxu0 %v2634_v54  ;;  %2783 = vmatpush1.msra.mxu1 %v2632_v24 }
 0x43e   : > { %9128 = vmatmul.mubr.msk.f32.vlgmr.msra.gmra.mrb[18].mxu0 %vm640_vm0, %v10889_v37  ;;  %2998 = vmatprep.subr.mxu0 %v10668_v31  ;;  %v12457_v31 = vmov 0.0  }
 0x43f   : > { %2927 = vmatprep.subr.mxu1 %v10663_v20  ;;  %2999 = vmatpush1.msra.mxu0 %v10660_v18  ;;  %v11019_v52 = vpop.permute.xlu0 %4661  ;;  %v11037_v18 = vrot.slane %v10936_v60, %v10481_v40  ;;  %v11041_v20 = vrot.slane %v10859_v9, %v10481_v40 }
 0x440   : > { %2846 = vmatprep.mubr.f32.mxu1 %v12457_v31  ;;  %3140 = vmatprep.subr.mxu0 %v10746_v41  ;;  %v11026_v38 = vpop.permute.xlu1 %4663  ;;  %v3234_v41 = vsel %vm3227_vm4, %v10802_v5, %v10907_v43 }
 0x441   : > { %9127 = vmatmul.mubr.msk.f32.vlgmr.msra.gmra.mrb[14].mxu1 %vm640_vm0, %v10889_v37  ;;  %3062 = vmatprep.mubr.f32.mxu0 %v12457_v31  ;;  %12458 = vst [vmem:[#allocation23_spill] sm:$0xff] %v11037_v18  ;;  %v3233_v37 = vsel %vm3227_vm4, %v10907_v43, %v10804_v8  ;;  %v3269_v43 = vmul.f32 %v11041_v20, %v3234_v41 }
 0x442   : > { %2928 = vmatpush1.msra.mxu1 %v10654_v42  ;;  %9130 = vmatmul.mubr.msk.f32.vlgmr.msra.gmra.mrb[16].mxu0 %vm640_vm0, %v9124_v4  ;;  %v3270_v54 = vmul.f32 %v11030_v32, %v3233_v37  ;;  %v11092_v37 = vrot.slane %v10822_v19, %v10489_v48 }
 0x443   : > { %3069 = vmatprep.subr.mxu1 %v10743_v33  ;;  %3141 = vmatpush1.msra.mxu0 %v10736_v6  ;;  %v3226_v36 = vpop.permute.xlu0 %3225  ;;  %v11071_v6 = vrot.slane %v10943_v12, %v10481_v40  ;;  %v11075_v33 = vrot.slane %v10958_v62, %v10481_v40 }
 0x444   : > { %3352 = vmatprep.subr.mxu0 %v3271_v14  ;;  %v3228_v42 = vsel %vm3227_vm4, %v10923_v58, %v3226_v36  ;;  %v3235_v39 = vsel %vm3227_vm4, %v3226_v36, %v10802_v5  ;;  %2991 = vmatprep.mubr.f32.mxu1 %v12457_v31  ;;  %v3222_v24 = vpop.permute.xlu1 %3221  ;;  %12459 = vst [vmem:[#allocation24_spill] sm:$0xff] %v11092_v37 }
 0x445   : > { %v3275_v8 = vmul.f32 %v11037_v18, %v3228_v42  ;;  %9129 = vmatmul.mubr.msk.f32.vlgmr.msra.gmra.mrb[12].mxu1 %vm640_vm0, %v9124_v4  ;;  %v3268_v5 = vmul.f32 %v11052_v27, %v3235_v39  ;;  %v3230_v51 = vsel %vm3227_vm4, %v10921_v57, %v3222_v24  ;;  %3204 = vmatprep.mubr.f32.mxu0 %v12457_v31  ;;  %v9133_v42 = vld [vmem:[%s12455_s4 + $0x4] sm:$0xf] }
 0x446   : > { %3070 = vmatpush1.msra.mxu1 %v10732_v3  ;;  %v3229_v14 = vsel %vm3227_vm4, %v3222_v24, %v10923_v58  ;;  %9132 = vmatmul.mubr.msk.f32.vlgmr.msra.gmra.mrb[18].mxu0 %vm640_vm0, %v9124_v4  ;;  %v3594_v36 = vsel %vm3589_vm5, %v10812_v11, %v10909_v50  ;;  %v11100_v3 = vrot.slane %v10854_v28, %v10489_v48 }
 0x447   : > { %3281 = vmatprep.subr.mxu1 %v3269_v43  ;;  %v3588_v41 = vpop.permute.xlu0 %3587  ;;  %3353 = vmatpush1.msra.mxu0 %v3270_v54  ;;  %v11110_v39 = vrot.slane %v10953_v61, %v10481_v40  ;;  %v3273_v24 = vmul.f32 %v11071_v6, %v3230_v51  ;;  %v11116_v43 = vrot.slane %v10859_v9, %v10489_v48 }
 0x448   : > { %12460 = vst [vmem:[#allocation25_spill] sm:$0xff] %v11100_v3  ;;  %3133 = vmatprep.mubr.f32.mxu1 %v12457_v31  ;;  %v11103_v58 = vpop.permute.xlu1 %4659  ;;  %3494 = vmatprep.subr.mxu0 %v3275_v8  ;;  %v3231_v54 = vsel %vm3227_vm4, %v10905_v47, %v10921_v57  ;;  %v3274_v18 = vmul.f32 %v11075_v33, %v3229_v14 }
 0x449   : > { %12461 = vst [vmem:[#allocation26_spill] sm:$0xff] %v11110_v39  ;;  %9131 = vmatmul.mubr.msk.f32.vlgmr.msra.gmra.mrb[14].mxu1 %vm640_vm0, %v9124_v4  ;;  %12462 = vst [vmem:[#allocation27_spill] sm:$0xff] %v11116_v43  ;;  %v11125_v40 = vrot.slane %v10936_v60, %v10489_v48  ;;  %3416 = vmatprep.mubr.f32.mxu0 %v12457_v31  ;;  %v3595_v4 = vsel %vm3589_vm5, %v10911_v30, %v10812_v11 }
 0x44a   : > { %3282 = vmatpush1.msra.mxu1 %v3268_v5  ;;  %v3596_v8 = vsel %vm3589_vm5, %v10810_v10, %v10911_v30  ;;  %9135 = vmatmul.mubr.msk.f32.vlgmr.msra.gmra.mrb[16].mxu0 %vm640_vm0, %v9133_v42  ;;  %v3633_v47 = vmul.f32 %v11092_v37, %v3594_v36  ;;  %v3590_v5 = vsel %vm3589_vm5, %v10927_v63, %v3588_v41 }
 0x44b   : > { %12463 = vst [vmem:[#allocation28_spill] sm:$0xff] %v11125_v40  ;;  %3423 = vmatprep.subr.mxu1 %v3273_v24  ;;  %v3950_v57 = vpop.permute.xlu0 %3949  ;;  %3495 = vmatpush1.msra.mxu0 %v3274_v18  ;;  %v11145_v51 = vrot.slane %v10822_v19, %v10491_v49  ;;  %v3272_v30 = vmul.f32 %v11110_v39, %v3231_v54 }
 0x44c   : > { %3345 = vmatprep.mubr.f32.mxu1 %v12457_v31  ;;  %v3584_v11 = vpop.permute.xlu1 %3583  ;;  %v11150_v14 = vrot.slane %v10948_v7, %v10489_v48  ;;  %3714 = vmatprep.subr.mxu0 %v3633_v47  ;;  %v11154_v36 = vrot.slane %v10943_v12, %v10489_v48  ;;  %v11158_v18 = vrot.slane %v10958_v62, %v10489_v48 }
 0x44d   : > { %v3632_v24 = vmul.f32 %v11100_v3, %v3595_v4  ;;  %v3597_v37 = vsel %vm3589_vm5, %v3588_v41, %v10810_v10  ;;  %9134 = vmatmul.mubr.msk.f32.vlgmr.msra.gmra.mrb[12].mxu1 %vm640_vm0, %v9133_v42  ;;  %3558 = vmatprep.mubr.f32.mxu0 %v12457_v31  ;;  %v3631_v54 = vmul.f32 %v11116_v43, %v3596_v8 }
 0x44e   : > { %v3637_v47 = vmul.f32 %v11125_v40, %v3590_v5  ;;  %v3591_v39 = vsel %vm3589_vm5, %v3584_v11, %v10927_v63  ;;  %v3592_v4 = vsel %vm3589_vm5, %v10925_v59, %v3584_v11  ;;  %3424 = vmatpush1.msra.mxu1 %v3272_v30  ;;  %9137 = vmatmul.mubr.msk.f32.vlgmr.msra.gmra.mrb[18].mxu0 %vm640_vm0, %v9133_v42  ;;  %v9138_v5 = vld [vmem:[%s12455_s4 + $0x8] sm:$0xf] }
 0x44f   : > { %v11175_v10 = vpop.permute.xlu0 %5029  ;;  %v3956_v41 = vsel %vm3951_vm6, %v10828_v23, %v10913_v15  ;;  %v11183_v8 = vrot.slane %v10854_v28, %v10491_v49  ;;  %3643 = vmatprep.subr.mxu1 %v3631_v54  ;;  %3715 = vmatpush1.msra.mxu0 %v3632_v24  ;;  %v11192_v11 = vrot.slane %v10859_v9, %v10491_v49 }
 0x450   : > { %v11185_v63 = vpop.permute.xlu1 %4671  ;;  %v11196_v30 = vrot.slane %v10953_v61, %v10489_v48  ;;  %v3630_v40 = vmul.f32 %v11150_v14, %v3597_v37  ;;  %v11201_v54 = vrot.slane %v10936_v60, %v10491_v49  ;;  %3856 = vmatprep.subr.mxu0 %v3637_v47  ;;  %3487 = vmatprep.mubr.f32.mxu1 %v12457_v31 }
 0x451   : > { %12464 = vst [vmem:[#allocation29_spill] sm:$0xff] %v11183_v8  ;;  %v3593_v24 = vsel %vm3589_vm5, %v10909_v50, %v10925_v59  ;;  %v3635_v3 = vmul.f32 %v11154_v36, %v3592_v4  ;;  %v3636_v43 = vmul.f32 %v11158_v18, %v3591_v39  ;;  %9136 = vmatmul.mubr.msk.f32.vlgmr.msra.gmra.mrb[14].mxu1 %vm640_vm0, %v9133_v42 }
 0x452   : > { %12465 = vst [vmem:[#allocation30_spill] sm:$0xff] %v11201_v54  ;;  %3778 = vmatprep.mubr.f32.mxu0 %v12457_v31  ;;  %v3957_v48 = vsel %vm3951_vm6, %v10915_v17, %v10828_v23  ;;  %v3958_v37 = vsel %vm3951_vm6, %v10826_v21, %v10915_v17  ;;  %3644 = vmatpush1.msra.mxu1 %v3630_v40 }
 0x453   : > { %9140 = vmatmul.mubr.msk.f32.vlgmr.msra.gmra.mrb[16].mxu0 %vm640_vm0, %v9138_v5  ;;  %v3995_v50 = vmul.f32 %v11145_v51, %v3956_v41  ;;  %v11222_v59 = vpop.permute.xlu0 %5023  ;;  %v11226_v42 = vrot.slane %v10948_v7, %v10491_v49  ;;  %v3952_v23 = vsel %vm3951_vm6, %v10931_v56, %v3950_v57  ;;  %3785 = vmatprep.subr.mxu1 %v3635_v3 }
 0x454   : > { %3857 = vmatpush1.msra.mxu0 %v3636_v43  ;;  %v3946_v39 = vpop.permute.xlu1 %3945  ;;  %v11233_v17 = vrot.slane %v10822_v19, %v10483_v44  ;;  %v3634_v40 = vmul.f32 %v11196_v30, %v3593_v24  ;;  %3707 = vmatprep.mubr.f32.mxu1 %v12457_v31  ;;  %v11239_v47 = vrot.slane %v10943_v12, %v10491_v49 }
 0x455   : > { %4076 = vmatprep.subr.mxu0 %v3995_v50  ;;  %v11243_v4 = vrot.slane %v10958_v62, %v10491_v49  ;;  %v3994_v3 = vmul.f32 %v11183_v8, %v3957_v48  ;;  %v3959_v43 = vsel %vm3951_vm6, %v3950_v57, %v10826_v21  ;;  %9139 = vmatmul.mubr.msk.f32.vlgmr.msra.gmra.mrb[12].mxu1 %vm640_vm0, %v9138_v5 }
 0x456   : > { %12466 = vst [vmem:[#allocation31_spill] sm:$0xff] %v11233_v17  ;;  %3920 = vmatprep.mubr.f32.mxu0 %v12457_v31  ;;  %v3993_v41 = vmul.f32 %v11192_v11, %v3958_v37  ;;  %v3999_v24 = vmul.f32 %v11201_v54, %v3952_v23  ;;  %v3953_v50 = vsel %vm3951_vm6, %v3946_v39, %v10931_v56  ;;  %v9143_v56 = vld [vmem:[%s12455_s4 + $0xc] sm:$0xf] }
 0x457   : > { %v3954_v48 = vsel %vm3951_vm6, %v10929_v0, %v3946_v39  ;;  %3786 = vmatpush1.msra.mxu1 %v3634_v40  ;;  %9142 = vmatmul.mubr.msk.f32.vlgmr.msra.gmra.mrb[18].mxu0 %vm640_vm0, %v9138_v5  ;;  %v11261_v21 = vpop.permute.xlu0 %5391  ;;  %v4317_v57 = vsel %vm4313_vm7, %v10919_v53, %v10938_v2  ;;  %v11274_v23 = vrot.slane %v10859_v9, %v10483_v44 }
 0x458   : > { %4005 = vmatprep.subr.mxu1 %v3993_v41  ;;  %4077 = vmatpush1.msra.mxu0 %v3994_v3  ;;  %v11267_v37 = vpop.permute.xlu1 %5027  ;;  %v11278_v39 = vrot.slane %v10854_v28, %v10483_v44  ;;  %v11282_v40 = vrot.slane %v10953_v61, %v10491_v49  ;;  %v3992_v3 = vmul.f32 %v11226_v42, %v3959_v43 }
 0x459   : > { %12467 = vst [vmem:[#allocation32_spill] sm:$0xff] %v11274_v23  ;;  %4218 = vmatprep.subr.mxu0 %v3999_v24  ;;  %3849 = vmatprep.mubr.f32.mxu1 %v12457_v31  ;;  %v3955_v41 = vsel %vm3951_vm6, %v10913_v15, %v10929_v0  ;;  %v3997_v54 = vmul.f32 %v11239_v47, %v3954_v48 }
 0x45a   : > { %12468 = vst [vmem:[#allocation33_spill] sm:$0xff] %v11278_v39  ;;  %12469 = vst [vmem:[#allocation34_spill] sm:$0xff] %v11282_v40  ;;  %v3998_v8 = vmul.f32 %v11243_v4, %v3953_v50  ;;  %9141 = vmatmul.mubr.msk.f32.vlgmr.msra.gmra.mrb[14].mxu1 %vm640_vm0, %v9138_v5  ;;  %4140 = vmatprep.mubr.f32.mxu0 %v12457_v31  ;;  %v4319_v49 = vsel %vm4313_vm7, %v10917_v16, %v10844_v22 }
 0x45b   : > { %v4318_v43 = vsel %vm4313_vm7, %v10844_v22, %v10919_v53  ;;  %4006 = vmatpush1.msra.mxu1 %v3992_v3  ;;  %9145 = vmatmul.mubr.msk.f32.vlgmr.msra.gmra.mrb[16].mxu0 %vm640_vm0, %v9143_v56  ;;  %v4357_v15 = vmul.f32 %v11233_v17, %v4317_v57  ;;  %v11304_v0 = vpop.permute.xlu0 %5385  ;;  %v11308_v5 = vrot.slane %v10948_v7, %v10483_v44  ;;  %v12472_v22 = vld [vmem:[#allocation20_spill] sm:$0xff]  ;;  %v9148_v17 = vld [vmem:[%s12455_s4 + $0x14] sm:$0xf] }
 0x45c   : > { %4147 = vmatprep.subr.mxu1 %v3997_v54  ;;  %4219 = vmatpush1.msra.mxu0 %v3998_v8  ;;  %v11310_v24 = vpop.permute.xlu1 %5025  ;;  %v11314_v50 = vrot.slane %v10958_v62, %v10483_v44  ;;  %v4320_v53 = vsel %vm4313_vm7, %v12472_v22, %v10917_v16  ;;  %v3996_v48 = vmul.f32 %v11282_v40, %v3955_v41  ;;  %v12474_v16 = vld [vmem:[#allocation17_spill] sm:$0xff] }
 0x45d   : > { %12470 = vst [vmem:[#allocation35_spill] sm:$0xff] %v11308_v5  ;;  %4438 = vmatprep.subr.mxu0 %v4357_v15  ;;  %4069 = vmatprep.mubr.f32.mxu1 %v12457_v31  ;;  %v11324_v54 = vrot.slane %v10936_v60, %v10483_v44  ;;  %v4356_v8 = vmul.f32 %v11278_v39, %v4318_v43 }
 0x45e   : > { %12471 = vst [vmem:[#allocation36_spill] sm:$0xff] %v11314_v50  ;;  %9144 = vmatmul.mubr.msk.f32.vlgmr.msra.gmra.mrb[12].mxu1 %vm640_vm0, %v9143_v56  ;;  %4282 = vmatprep.mubr.f32.mxu0 %v12457_v31  ;;  %v4355_v57 = vmul.f32 %v11274_v23, %v4319_v49  ;;  %v11333_v3 = vrot.slane %v10822_v19, %v12474_v16 }
 0x45f   : > { %12473 = vst [vmem:[#allocation20_spill] sm:$0xff] %v11324_v54  ;;  %4148 = vmatpush1.msra.mxu1 %v3996_v48  ;;  %9147 = vmatmul.mubr.msk.f32.vlgmr.msra.gmra.mrb[18].mxu0 %vm640_vm0, %v9143_v56  ;;  %v4312_v41 = vpop.permute.xlu0 %4311  ;;  %v11338_v15 = vrot.slane %v10953_v61, %v10483_v44  ;;  %v11342_v43 = vrot.slane %v10943_v12, %v10483_v44 }
 0x460   : > { %12475 = vst [vmem:[#allocation17_spill] sm:$0xff] %v11333_v3  ;;  %v4354_v39 = vmul.f32 %v11308_v5, %v4320_v53  ;;  %4367 = vmatprep.subr.mxu1 %v4355_v57  ;;  %4439 = vmatpush1.msra.mxu0 %v4356_v8  ;;  %v4314_v49 = vsel %vm4313_vm7, %v10992_v45, %v4312_v41  ;;  %v11351_v23 = vpop.permute.xlu1 %5021 }
 0x461   : > { %12476 = vst [vmem:[#allocation37_spill] sm:$0xff] %v11338_v15  ;;  %12477 = vst [vmem:[#allocation38_spill] sm:$0xff] %v11342_v43  ;;  %v4321_v48 = vsel %vm4313_vm7, %v4312_v41, %v12472_v22  ;;  %v4679_v44 = vsel %vm4675_vm8, %v11002_v55, %v10999_v25  ;;  %v4360_v53 = vmul.f32 %v11314_v50, %v4314_v49  ;;  %4211 = vmatprep.mubr.f32.mxu1 %v12457_v31 }
 0x462   : > { %v4361_v8 = vmul.f32 %v11324_v54, %v4321_v48  ;;  %4502 = vmatprep.mubr.f32.mxu0 %v12457_v31  ;;  %v11366_v22 = vrot.slane %v10859_v9, %v12474_v16  ;;  %v11370_v57 = vrot.slane %v10854_v28, %v12474_v16  ;;  %v11374_v41 = vrot.slane %v10948_v7, %v12474_v16 }
 0x463   : > { %9146 = vmatmul.mubr.msk.f32.vlgmr.msra.gmra.mrb[14].mxu1 %vm640_vm0, %v9143_v56  ;;  %v4680_v49 = vsel %vm4675_vm8, %v11026_v38, %v11002_v55  ;;  %9150 = vmatmul.mubr.msk.f32.vlgmr.msra.gmra.mrb[16].mxu0 %vm640_vm0, %v9148_v17  ;;  %v4308_v48 = vpop.permute.xlu0 %4307  ;;  %v11384_v50 = vrot.slane %v10958_v62, %v12474_v16  ;;  %v11388_v54 = vrot.slane %v10936_v60, %v12474_v16 }
 0x464   : > { %12478 = vst [vmem:[#allocation39_spill] sm:$0xff] %v11366_v22  ;;  %12479 = vst [vmem:[#allocation40_spill] sm:$0xff] %v11370_v57  ;;  %4368 = vmatpush1.msra.mxu1 %v4354_v39  ;;  %v4719_v5 = vmul.f32 %v11333_v3, %v4679_v44  ;;  %v4315_v56 = vsel %vm4313_vm7, %v4308_v48, %v10992_v45  ;;  %v4316_v55 = vsel %vm4313_vm7, %v10938_v2, %v4308_v48  ;;  %v11397_v39 = vpop.permute.xlu1 %5033 }
 0x465   : > { %12480 = vst [vmem:[#allocation41_spill] sm:$0xff] %v11374_v41  ;;  %12481 = vst [vmem:[#allocation42_spill] sm:$0xff] %v11384_v50  ;;  %4580 = vmatprep.subr.mxu0 %v4361_v8  ;;  %4431 = vmatprep.mubr.f32.mxu1 %v12457_v31  ;;  %v4681_v40 = vsel %vm4675_vm8, %v11019_v52, %v11026_v38  ;;  %v4358_v44 = vmul.f32 %v11338_v15, %v4316_v55  ;;  %v12483_v38 = vld [vmem:[#allocation18_spill] sm:$0xff] }
 0x466   : > { %12482 = vst [vmem:[#allocation43_spill] sm:$0xff] %v11388_v54  ;;  %v4359_v3 = vmul.f32 %v11342_v43, %v4315_v56  ;;  %4581 = vmatpush1.msra.mxu0 %v4360_v53  ;;  %4644 = vmatprep.mubr.f32.mxu0 %v12457_v31  ;;  %v4718_v45 = vmul.f32 %v11370_v57, %v4680_v49  ;;  %v9153_v56 = vld [vmem:[%s12455_s4 + $0x18] sm:$0xf] }
 0x467   : > { %v4682_v2 = vsel %vm4675_vm8, %v11103_v58, %v11019_v52  ;;  %9149 = vmatmul.mubr.msk.f32.vlgmr.msra.gmra.mrb[12].mxu1 %vm640_vm0, %v9148_v17  ;;  %4800 = vmatprep.subr.mxu0 %v4719_v5  ;;  %v11416_v8 = vrot.slane %v10822_v19, %v12483_v38  ;;  %v4674_v53 = vpop.permute.xlu0 %4673  ;;  %v11421_v49 = vrot.slane %v10953_v61, %v12474_v16 }
 0x468   : > { %9152 = vmatmul.mubr.msk.f32.vlgmr.msra.gmra.mrb[18].mxu0 %vm640_vm0, %v9148_v17  ;;  %4509 = vmatprep.subr.mxu1 %v4359_v3  ;;  %v11425_v52 = vrot.slane %v10943_v12, %v12474_v16  ;;  %v4717_v5 = vmul.f32 %v11366_v22, %v4681_v40  ;;  %v4676_v19 = vsel %vm4675_vm8, %v11185_v63, %v4674_v53  ;;  %v5390_v3 = vpop.permute.xlu1 %5389 }
 0x469   : > { %12484 = vst [vmem:[#allocation18_spill] sm:$0xff] %v11416_v8  ;;  %12485 = vst [vmem:[#allocation44_spill] sm:$0xff] %v11421_v49  ;;  %4801 = vmatpush1.msra.mxu0 %v4718_v45  ;;  %v4683_v48 = vsel %vm4675_vm8, %v4674_v53, %v11103_v58  ;;  %4510 = vmatpush1.msra.mxu1 %v4358_v44  ;;  %v4716_v16 = vmul.f32 %v11374_v41, %v4682_v2 }
 0x46a   : > { %12486 = vst [vmem:[#allocation45_spill] sm:$0xff] %v11425_v52  ;;  %v4722_v55 = vmul.f32 %v11384_v50, %v4676_v19  ;;  %v4723_v40 = vmul.f32 %v11388_v54, %v4683_v48  ;;  %4573 = vmatprep.mubr.f32.mxu1 %v12457_v31  ;;  %4864 = vmatprep.mubr.f32.mxu0 %v12457_v31 }
 0x46b   : > { %v5041_v58 = vsel %vm5037_vm9, %v11267_v37, %v11175_v10  ;;  %v11448_v44 = vrot.slane %v10854_v28, %v12483_v38  ;;  %9151 = vmatmul.mubr.msk.f32.vlgmr.msra.gmra.mrb[14].mxu1 %vm640_vm0, %v9148_v17  ;;  %4729 = vmatprep.subr.mxu1 %v4717_v5  ;;  %v11453_v45 = vrot.slane %v10859_v9, %v12483_v38  ;;  %v4670_v53 = vpop.permute.xlu0 %4669 }
 0x46c   : > { %v5042_v2 = vsel %vm5037_vm9, %v11310_v24, %v11267_v37  ;;  %9155 = vmatmul.mubr.msk.f32.vlgmr.msra.gmra.mrb[16].mxu0 %vm640_vm0, %v9153_v56  ;;  %4730 = vmatpush1.msra.mxu1 %v4716_v16  ;;  %v4677_v28 = vsel %vm4675_vm8, %v4670_v53, %v11185_v63  ;;  %v4678_v17 = vsel %vm4675_vm8, %v10999_v25, %v4670_v53  ;;  %v5388_v9 = vpop.permute.xlu1 %5387 }
 0x46d   : > { %12487 = vst [vmem:[#allocation46_spill] sm:$0xff] %v11448_v44  ;;  %12488 = vst [vmem:[#allocation47_spill] sm:$0xff] %v11453_v45  ;;  %4942 = vmatprep.subr.mxu0 %v4723_v40  ;;  %4793 = vmatprep.mubr.f32.mxu1 %v12457_v31  ;;  %v11469_v5 = vrot.slane %v10958_v62, %v12483_v38  ;;  %v5081_v37 = vmul.f32 %v11416_v8, %v5041_v58 }
 0x46e   : > { %v4720_v19 = vmul.f32 %v11421_v49, %v4678_v17  ;;  %v4721_v48 = vmul.f32 %v11425_v52, %v4677_v28  ;;  %4943 = vmatpush1.msra.mxu0 %v4722_v55  ;;  %v11476_v63 = vrot.slane %v10936_v60, %v12483_v38  ;;  %v5043_v25 = vsel %vm5037_vm9, %v11222_v59, %v11310_v24  ;;  %v11520_v17 = vld [vmem:[%s12450_s19 + $0x58] ss:$0 sm:$0xff] }
 0x46f   : > { %12489 = vst [vmem:[#allocation48_spill] sm:$0xff] %v11469_v5  ;;  %v5080_v16 = vmul.f32 %v11448_v44, %v5042_v2  ;;  %v11485_v62 = vrot.slane %v10948_v7, %v12483_v38  ;;  %5006 = vmatprep.mubr.f32.mxu0 %v12457_v31  ;;  %9154 = vmatmul.mubr.msk.f32.vlgmr.msra.gmra.mrb[12].mxu1 %vm640_vm0, %v9153_v56  ;;  %v5036_v24 = vpop.permute.xlu0 %5035  ;;  %12494 = vst [vmem:[#allocation53_spill] sm:$0xff] %v11520_v17 }
 0x470   : > { %12490 = vst [vmem:[#allocation49_spill] sm:$0xff] %v11476_v63  ;;  %v5044_v60 = vsel %vm5037_vm9, %v11351_v23, %v11222_v59  ;;  %9157 = vmatmul.mubr.msk.f32.vlgmr.msra.gmra.mrb[18].mxu0 %vm640_vm0, %v9153_v56  ;;  %5162 = vmatprep.subr.mxu0 %v5081_v37  ;;  %v11497_v55 = vrot.slane %v10953_v61, %v12483_v38  ;;  %v9158_v59 = vld [vmem:[%s12455_s4 + $0x1c] sm:$0xf]  ;;  %v5384_v28 = vpop.permute.xlu1 %5383 }
 0x471   : > { %12491 = vst [vmem:[#allocation50_spill] sm:$0xff] %v11485_v62  ;;  %5163 = vmatpush1.msra.mxu0 %v5080_v16  ;;  %v5038_v7 = vsel %vm5037_vm9, %v11397_v39, %v5036_v24  ;;  %v5045_v40 = vsel %vm5037_vm9, %v5036_v24, %v11351_v23  ;;  %4871 = vmatprep.subr.mxu1 %v4721_v48  ;;  %v11559_v24 = vld [vmem:[%s12450_s19 + $0x70] ss:$0 sm:$0xff] }
 0x472   : > { %12492 = vst [vmem:[#allocation51_spill] sm:$0xff] %v11497_v55  ;;  %v11510_v58 = vrot.slane %v10943_v12, %v12483_v38  ;;  %v5079_v61 = vmul.f32 %v11453_v45, %v5043_v25  ;;  %v5084_v2 = vmul.f32 %v11469_v5, %v5038_v7  ;;  %v5085_v53 = vmul.f32 %v11476_v63, %v5045_v40  ;;  %v11530_v38 = vld [vmem:[%s12450_s19 + $0x50] ss:$0 sm:$0xff]  ;;  %v11564_v7 = vld [vmem:[%s12450_s19 + $0x78] ss:$0 sm:$0xff] }
 0x473   : > { %4872 = vmatpush1.msra.mxu1 %v4720_v19  ;;  %4935 = vmatprep.mubr.f32.mxu1 %v12457_v31  ;;  %v5078_v23 = vmul.f32 %v11485_v62, %v5044_v60  ;;  %v5403_v12 = vsel %vm5399_vm10, %v5390_v3, %v11261_v21  ;;  %12495 = vst [vmem:[#allocation54_spill] sm:$0xff] %v11530_v38  ;;  %v5032_v19 = vpop.permute.xlu0 %5031  ;;  %v11548_v60 = vld [vmem:[%s12450_s19 + $0x48] ss:$0 sm:$0xff]  ;;  %12497 = vst [vmem:[#allocation56_spill] sm:$0xff] %v11559_v24  ;;  %v12511_v5 = vld [vmem:[#allocation22_spill] sm:$0xff] }
 0x474   : > { %12493 = vst [vmem:[#allocation52_spill] sm:$0xff] %v11510_v58  ;;  %5226 = vmatprep.mubr.f32.mxu0 %v12457_v31  ;;  %9156 = vmatmul.mubr.msk.f32.vlgmr.msra.gmra.mrb[14].mxu1 %vm640_vm0, %v9153_v56  ;;  %v5404_v37 = vsel %vm5399_vm10, %v5388_v9, %v5390_v3  ;;  %v5039_v48 = vsel %vm5037_vm9, %v5032_v19, %v11397_v39  ;;  %12496 = vst [vmem:[#allocation55_spill] sm:$0xff] %v11548_v60  ;;  %v5801_v63 = vld [vmem:[%s12512_s21] sm:$0xf] }
 0x475   : > { %5091 = vmatprep.subr.mxu1 %v5079_v61  ;;  %9160 = vmatmul.mubr.msk.f32.vlgmr.msra.gmra.mrb[16].mxu0 %vm640_vm0, %v9158_v59  ;;  %v5040_v56 = vsel %vm5037_vm9, %v11175_v10, %v5032_v19  ;;  %v5443_v25 = vmul.f32 %v11520_v17, %v5403_v12  ;;  %v5083_v3 = vmul.f32 %v11510_v58, %v5039_v48  ;;  %v5396_v61 = vpop.permute.xlu1 %5395  ;;  %v9171_v12 = vld [vmem:[%s12455_s4 + $0x20] sm:$0xf]  ;;  %v12510_v58 = vld [vmem:[#allocation21_spill] sm:$0xff] }
 0x476   : > { %5092 = vmatpush1.msra.mxu1 %v5078_v23  ;;  %5304 = vmatprep.subr.mxu0 %v5085_v53  ;;  %v5082_v16 = vmul.f32 %v11497_v55, %v5040_v56  ;;  %v5405_v39 = vsel %vm5399_vm10, %v11304_v0, %v5388_v9  ;;  %v5442_v10 = vmul.f32 %v11530_v38, %v5404_v37  ;;  %v11569_v9 = vld [vmem:[%s12450_s19 + $0x40] ss:$0 sm:$0xff]  ;;  %v11597_v56 = vld [vmem:[%s12450_s19 + $0x68] ss:$0 sm:$0xff] }
 0x477   : > { %5155 = vmatprep.mubr.f32.mxu1 %v12457_v31  ;;  %5305 = vmatpush1.msra.mxu0 %v5084_v2  ;;  %12498 = vst [vmem:[#allocation57_spill] sm:$0xff] %v11564_v7  ;;  %12499 = vst [vmem:[#allocation58_spill] sm:$0xff] %v11569_v9  ;;  %v5406_v40 = vsel %vm5399_vm10, %v5384_v28, %v11304_v0  ;;  %v5398_v2 = vpop.permute.xlu0 %5397  ;;  %v5441_v37 = vmul.f32 %v11548_v60, %v5405_v39 }
 0x478   : > { %5368 = vmatprep.mubr.f32.mxu0 %v12457_v31  ;;  %9159 = vmatmul.mubr.msk.f32.vlgmr.msra.gmra.mrb[12].mxu1 %vm640_vm0, %v9158_v59  ;;  %v5400_v53 = vsel %vm5399_vm10, %v5396_v61, %v5398_v2  ;;  %v5407_v23 = vsel %vm5399_vm10, %v5398_v2, %v5384_v28  ;;  %v5440_v48 = vmul.f32 %v11569_v9, %v5406_v40  ;;  %v11592_v28 = vld [vmem:[%s12450_s19 + $0x60] ss:$0 sm:$0xff] }
 0x479   : > { %9162 = vmatmul.mubr.msk.f32.vlgmr.msra.gmra.mrb[18].mxu0 %vm640_vm0, %v9158_v59  ;;  %5524 = vmatprep.subr.mxu0 %v5443_v25  ;;  %v5446_v0 = vmul.f32 %v11559_v24, %v5400_v53  ;;  %v5447_v19 = vmul.f32 %v11564_v7, %v5407_v23  ;;  %12500 = vst [vmem:[#allocation59_spill] sm:$0xff] %v11592_v28  ;;  %12501 = vst [vmem:[#allocation60_spill] sm:$0xff] %v11597_v56 }
 0x47a   : > { %5525 = vmatpush1.msra.mxu0 %v5442_v10  ;;  %5233 = vmatprep.subr.mxu1 %v5083_v3 }
 0x47b   : > { %5234 = vmatpush1.msra.mxu1 %v5082_v16  ;;  %5297 = vmatprep.mubr.f32.mxu1 %v12457_v31  ;;  %v5394_v25 = vpop.permute.xlu0 %5393 }
 0x47c   : > { %5588 = vmatprep.mubr.f32.mxu0 %v12457_v31  ;;  %9161 = vmatmul.mubr.msk.f32.vlgmr.msra.gmra.mrb[14].mxu1 %vm640_vm0, %v9158_v59  ;;  %v5401_v16 = vsel %vm5399_vm10, %v5394_v25, %v5396_v61  ;;  %v5402_v59 = vsel %vm5399_vm10, %v11261_v21, %v5394_v25 }
 0x47d   : > { %5453 = vmatprep.subr.mxu1 %v5441_v37  ;;  %9173 = vmatmul.mubr.msk.f32.vlgmr.msra.gmra.mrb[16].mxu0 %vm640_vm0, %v9171_v12  ;;  %v5444_v3 = vmul.f32 %v11592_v28, %v5402_v59  ;;  %v5445_v39 = vmul.f32 %v11597_v56, %v5401_v16 }
 0x47e   : > { %5454 = vmatpush1.msra.mxu1 %v5440_v48  ;;  %5666 = vmatprep.subr.mxu0 %v5447_v19 }
 0x47f   : > { %5517 = vmatprep.mubr.f32.mxu1 %v12457_v31  ;;  %5667 = vmatpush1.msra.mxu0 %v5446_v0 }
 0x480   : > { %5730 = vmatprep.mubr.f32.mxu0 %v12457_v31  ;;  %9172 = vmatmul.mubr.msk.f32.vlgmr.msra.gmra.mrb[12].mxu1 %vm640_vm0, %v9171_v12 }
 0x481   : > { %9175 = vmatmul.mubr.msk.f32.vlgmr.msra.gmra.mrb[18].mxu0 %vm640_vm0, %v9171_v12  ;;  %5595 = vmatprep.subr.mxu1 %v5445_v39 }
 0x482   : > { %5596 = vmatpush1.msra.mxu1 %v5444_v3  ;;  %5659 = vmatprep.mubr.f32.mxu1 %v12457_v31 }
 0x483   : > { %5964 = vmatprep.mubr.f32.mxu0 %v12457_v31 }
 0x484   : > { %9174 = vmatmul.mubr.msk.f32.vlgmr.msra.gmra.mrb[14].mxu1 %vm640_vm0, %v9171_v12 }
 0x485   : > { %5893 = vmatprep.mubr.f32.mxu1 %v12457_v31  ;;  %v5748_v21 = vpop.permute.xlu1 %5747 }
 0x550   : > { %v5590_v10 = vpop.f32.mrb[16].mxu0 }
 0x551   : > { %v5752_v40 = vadd.f32 %v5748_v21, %v5590_v10  ;;  %v5592_v61 = vpop.f32.mrb[17].mxu0 }
 0x552   : > { %v5753_v53 = vadd.f32 %v5748_v21, %v5592_v61 }
 0x553   : > { %v11615_v2 = vmax.f32 %v5752_v40, 0.0  ;;  %v5519_v23 = vpop.f32.mrb[12].mxu1 }
 0x554   : > { %v5732_v37 = vpop.f32.mrb[18].mxu0  ;;  %v5521_v0 = vpop.f32.mrb[13].mxu1  ;;  %v11621_v12 = vmax.f32 %v5753_v53, 0.0  ;;  %v5750_v16 = vadd.f32 %v5748_v21, %v5519_v23 }
 0x555   : > { %v5734_v19 = vpop.f32.mrb[19].mxu0  ;;  %7487 = vrot.lane.b32.xlu1 %v11615_v2, %s10064_s10  ;;  %5773 = vrot.lane.b32.xlu0 %v11615_v2, %s10060_s18  ;;  %v5751_v59 = vadd.f32 %v5748_v21, %v5521_v0  ;;  %v5756_v39 = vadd.f32 %v5748_v21, %v5732_v37 }
 0x556   : > { %v11639_v3 = vmax.f32 %v5750_v16, 0.0  ;;  %v5757_v61 = vadd.f32 %v5748_v21, %v5734_v19 }
 0x557   : > { %v5661_v48 = vpop.f32.mrb[14].mxu1  ;;  %v11641_v10 = vmax.f32 %v5751_v59, 0.0  ;;  %v11647_v40 = vmax.f32 %v5756_v39, 0.0  ;;  %v12507_v39 = vld [vmem:[#allocation19_spill] sm:$0xff] }
 0x558   : > { %v5663_v25 = vpop.f32.mrb[15].mxu1  ;;  %v11669_v53 = vmax.f32 %v5757_v61, 0.0  ;;  %v5754_v23 = vadd.f32 %v5748_v21, %v5661_v48 }
 0x559   : > { %5775 = vrot.lane.b32.xlu1 %v11621_v12, %s10060_s18  ;;  %6428 = vrot.lane.b32.xlu0 %v11615_v2, %s10061_s16  ;;  %v5755_v0 = vadd.f32 %v5748_v21, %v5663_v25 }
 0x55a   : > { %v11679_v37 = vmax.f32 %v5754_v23, 0.0 }
 0x55b   : > { %v11689_v19 = vmax.f32 %v5755_v0, 0.0 }
 0x55d   : > { %6430 = vrot.lane.b32.xlu1 %v11621_v12, %s10061_s16  ;;  %6781 = vrot.lane.b32.xlu0 %v11615_v2, %s12502_s14 }
 0x561   : > { %6783 = vrot.lane.b32.xlu1 %v11621_v12, %s12502_s14  ;;  %7134 = vrot.lane.b32.xlu0 %v11615_v2, %s12503_s9 }
 0x565   : > { %7136 = vrot.lane.b32.xlu1 %v11621_v12, %s12503_s9  ;;  %7489 = vrot.lane.b32.xlu0 %v11621_v12, %s10064_s10 }
 0x569   : > { %5771 = vrot.lane.b32.xlu1 %v11641_v10, %s10060_s18  ;;  %5769 = vrot.lane.b32.xlu0 %v11639_v3, %s10060_s18 }
 0x56d   : > { %5781 = vrot.lane.b32.xlu1 %v11647_v40, %s10060_s18  ;;  %6424 = vrot.lane.b32.xlu0 %v11639_v3, %s10061_s16 }
 0x571   : > { %6426 = vrot.lane.b32.xlu1 %v11641_v10, %s10061_s16  ;;  %6777 = vrot.lane.b32.xlu0 %v11639_v3, %s12502_s14 }
 0x575   : > { %6436 = vrot.lane.b32.xlu1 %v11647_v40, %s10061_s16  ;;  %7130 = vrot.lane.b32.xlu0 %v11639_v3, %s12503_s9 }
 0x579   : > { %6779 = vrot.lane.b32.xlu1 %v11641_v10, %s12502_s14  ;;  %7483 = vrot.lane.b32.xlu0 %v11639_v3, %s10064_s10 }
 0x57d   : > { %6789 = vrot.lane.b32.xlu1 %v11647_v40, %s12502_s14  ;;  %7485 = vrot.lane.b32.xlu0 %v11641_v10, %s10064_s10 }
 0x581   : > { %7132 = vrot.lane.b32.xlu1 %v11641_v10, %s12503_s9  ;;  %5783 = vrot.lane.b32.xlu0 %v11669_v53, %s10060_s18 }
 0x585   : > { %7142 = vrot.lane.b32.xlu1 %v11647_v40, %s12503_s9  ;;  %6438 = vrot.lane.b32.xlu0 %v11669_v53, %s10061_s16 }
 0x589   : > { %5777 = vrot.lane.b32.xlu1 %v11679_v37, %s10060_s18  ;;  %6791 = vrot.lane.b32.xlu0 %v11669_v53, %s12502_s14 }
 0x58d   : > { %6432 = vrot.lane.b32.xlu1 %v11679_v37, %s10061_s16  ;;  %7144 = vrot.lane.b32.xlu0 %v11669_v53, %s12503_s9 }
 0x591   : > { %6785 = vrot.lane.b32.xlu1 %v11679_v37, %s12502_s14  ;;  %5779 = vrot.lane.b32.xlu0 %v11689_v19, %s10060_s18  ;;  %s12505_s18 = smov 112  }
 0x595   : > { %7138 = vrot.lane.b32.xlu1 %v11679_v37, %s12503_s9  ;;  %7495 = vrot.lane.b32.xlu0 %v11647_v40, %s10064_s10 }
 0x599   : > { %7491 = vrot.lane.b32.xlu1 %v11679_v37, %s10064_s10  ;;  %7838 = vrot.lane.b32.xlu0 %v11641_v10, %s12504_s29 }
 0x59d   : > { %7497 = vrot.lane.b32.xlu1 %v11669_v53, %s10064_s10  ;;  %7842 = vrot.lane.b32.xlu0 %v11621_v12, %s12504_s29 }
 0x5a1   : > { %7840 = vrot.lane.b32.xlu1 %v11615_v2, %s12504_s29  ;;  %6434 = vrot.lane.b32.xlu0 %v11689_v19, %s10061_s16  ;;  %s12506_s16 = smov 111  }
 0x5a5   : > { %7844 = vrot.lane.b32.xlu1 %v11679_v37, %s12504_s29  ;;  %7836 = vrot.lane.b32.xlu0 %v11639_v3, %s12504_s29 }
 0x5a9   : > { %7850 = vrot.lane.b32.xlu1 %v11669_v53, %s12504_s29  ;;  %6787 = vrot.lane.b32.xlu0 %v11689_v19, %s12502_s14 }
 0x5ad   : > { %8193 = vrot.lane.b32.xlu1 %v11615_v2, %s12505_s18  ;;  %7848 = vrot.lane.b32.xlu0 %v11647_v40, %s12504_s29 }
 0x5b1   : > { %8197 = vrot.lane.b32.xlu1 %v11679_v37, %s12505_s18  ;;  %7140 = vrot.lane.b32.xlu0 %v11689_v19, %s12503_s9 }
 0x5b5   : > { %8203 = vrot.lane.b32.xlu1 %v11669_v53, %s12505_s18  ;;  %8191 = vrot.lane.b32.xlu0 %v11641_v10, %s12505_s18 }
 0x5b9   : > { %7493 = vrot.lane.b32.xlu1 %v11689_v19, %s10064_s10  ;;  %8195 = vrot.lane.b32.xlu0 %v11621_v12, %s12505_s18  ;;  %s10068_s10 = smov [#allocation12]  }
 0x5bd   : > { %8546 = vrot.lane.b32.xlu1 %v11615_v2, %s12506_s16  ;;  %8189 = vrot.lane.b32.xlu0 %v11639_v3, %s12505_s18 }
 0x5c1   : > { %7846 = vrot.lane.b32.xlu1 %v11689_v19, %s12504_s29  ;;  %8201 = vrot.lane.b32.xlu0 %v11647_v40, %s12505_s18  ;;  %s12560_s29 = sld [smem:[#allocation69_spill]] }
 0x5c5   : > { %8550 = vrot.lane.b32.xlu1 %v11679_v37, %s12506_s16  ;;  %8544 = vrot.lane.b32.xlu0 %v11641_v10, %s12506_s16 }
 0x5c7   : > { %v11747_v21 = vpop.permute.xlu1 %7487  ;;  %v5774_v48 = vpop.permute.xlu0 %5773 }
 0x5c9   : > { %8199 = vrot.lane.b32.xlu1 %v11689_v19, %s12505_s18  ;;  %8548 = vrot.lane.b32.xlu0 %v11621_v12, %s12506_s16  ;;  %s12290_s18 = scalar_lea.hbm %s12560_s29, %s9299_s13 }
 0x5cb   : > { %v5776_v25 = vpop.permute.xlu1 %5775  ;;  %v11753_v16 = vpop.permute.xlu0 %6428 }
 0x5cc   : > { %v5789_v59 = vsel %vm2587_vm3, %v5774_v48, %v5776_v25 }
 0x5cd   : > { %v5796_v61 = vmul.f32 %v5789_v59, %v12507_v39  ;;  %8552 = vrot.lane.b32.xlu1 %v11689_v19, %s12506_s16  ;;  %8542 = vrot.lane.b32.xlu0 %v11639_v3, %s12506_s16  ;;  %v5766_v59 = vld [vmem:[%s12508_s30] sm:$0xf]  ;;  %s606_s30 = scalar_lea.vmem [#allocation12], %s12559_s22  ;;  %s9978_s22 = sshll.u32 %s10068_s10, 4  ;;  %s9979_s22 = int_to_ptr.vmem [resolvable:$false] %s9978_s22 }
 0x5ce   : > { %s8951_s0 = sshll.u32 %s606_s30, 4  ;;  %s9980_s1 = scalar_lea.vmem %s9979_s22, 1024  ;;  %s12292_s0 = int_to_ptr.vmem [resolvable:$true] %s8951_s0 }
 0x5cf   : > { %v11762_v23 = vpop.permute.xlu1 %6430  ;;  %9180 = vmatprep.subr.msk.mxu0 %vm1712_vm1, %v5796_v61  ;;  %v11765_v0 = vpop.permute.xlu0 %6781  ;;  %s9974_s28 = scalar_lea.vmem %s12292_s0, 512  ;;  %p9981_p3 = scmp.lt.s32.totalorder %s12292_s0, %s9979_s22 }
 0x5d0   : > { %p9975_p6 = scmp.ne.s32.totalorder %s12292_s0, %s9974_s28  ;;  %p9982_p13 = scmp.lt.s32.totalorder %s9980_s1, %s9974_s28 }
 0x5d1   : > { %8556 = vrot.lane.b32.xlu1 %v11669_v53, %s12506_s16  ;;  %8554 = vrot.lane.b32.xlu0 %v11647_v40, %s12506_s16  ;;  %s8937_s16 = scalar_lea.sflag [#allocation5], %s10373_s2 }
 0x5d2   : > { %p9976_p9 = pnand %p9975_p6, %p12561_p7  ;;  %p9983_p0 = por %p9982_p13, %p9981_p3 }
 0x5d3   : > { %v11774_v39 = vpop.permute.xlu1 %6783  ;;  %v11776_v28 = vpop.permute.xlu0 %7134 }
 0x5d4   : > { %v11782_v61 = vsel %vm3589_vm5, %v11765_v0, %v11774_v39  ;;  %p9977_p12 = pneg %p9976_p9 }
 0x5d5   : > { %8897 = vperm.xlu0 %9792, %v5766_v59  }
 0x5d6   : > { %p9984_p2 = pnand %p9983_p0, %p9977_p12 }
 0x5d7   : > { %v11784_v24 = vpop.permute.xlu1 %7136  ;;  %v11786_v56 = vpop.permute.xlu0 %7489 }
 0x5d8   : > { %v11792_v7 = vsel %vm3951_vm6, %v11776_v28, %v11784_v24  ;;  %v11798_v60 = vsel %vm4313_vm7, %v11747_v21, %v11786_v56 }
 0x5d9   : > { %12509 = vst [vmem:[#allocation19_spill] sm:$0xff] %v11798_v60 }
 0x5db   : > { %v5772_v9 = vpop.permute.xlu1 %5771  ;;  %v5770_v38 = vpop.permute.xlu0 %5769 }
 0x5dc   : > { %v5790_v59 = vsel %vm2587_vm3, %v5772_v9, %v5774_v48  ;;  %v5791_v17 = vsel %vm2587_vm3, %v5770_v38, %v5772_v9 }
 0x5dd   : > { %v5795_v55 = vmul.f32 %v5790_v59, %v12510_v58  ;;  %v5794_v62 = vmul.f32 %v5791_v17, %v12511_v5 }
 0x5df   : > { %9181 = vmatpush1.msk.msra.mxu0 %vm1712_vm1, %v5795_v55  ;;  %v5782_v45 = vpop.permute.xlu1 %5781  ;;  %9177 = vmatprep.subr.msk.mxu1 %vm1712_vm1, %v5794_v62  ;;  %v6425_v44 = vpop.permute.xlu0 %6424 }
 0x5e0   : > { %9182 = vmatmul.mubr.msk.f32.vlgmr.msra.gmra.mrb[20].mxu0 %vm1708_vm2, %v5801_v63 }
 0x5e1   : > { %6106 = vmatprep.mubr.f32.mxu0 %v12457_v31 }
 0x5e3   : > { %v6427_v48 = vpop.permute.xlu1 %6426  ;;  %v11813_v9 = vpop.permute.xlu0 %6777 }
 0x5e7   : > { %v11815_v58 = vpop.permute.xlu1 %6436  ;;  %v11817_v5 = vpop.permute.xlu0 %7130 }
 0x5eb   : > { %v11819_v17 = vpop.permute.xlu1 %6779  ;;  %v11821_v59 = vpop.permute.xlu0 %7483 }
 0x5ec   : > { %12513 = vst [vmem:[#allocation21_spill] sm:$0xff] %v11821_v59 }
 0x5ef   : > { %v11823_v55 = vpop.permute.xlu1 %6789  ;;  %v11825_v8 = vpop.permute.xlu0 %7485 }
 0x5f0   : > { %12514 = vst [vmem:[#allocation22_spill] sm:$0xff] %v11825_v8 }
 0x5f3   : > { %v11827_v62 = vpop.permute.xlu1 %7132  ;;  %v5784_v52 = vpop.permute.xlu0 %5783 }
 0x5f4   : > { %v5785_v49 = vsel %vm2587_vm3, %v5782_v45, %v5784_v52  ;;  %v5792_v50 = vsel %vm2587_vm3, %v5784_v52, %v5770_v38 }
 0x5f5   : > { %v5793_v41 = vmul.f32 %v5792_v50, %v10962_v26  ;;  %v5800_v54 = vmul.f32 %v5785_v49, %v10966_v46 }
 0x5f7   : > { %v11835_v22 = vpop.permute.xlu1 %7142  ;;  %9178 = vmatpush1.msk.msra.mxu1 %vm1712_vm1, %v5793_v41  ;;  %9186 = vmatprep.subr.msk.mxu0 %vm1712_vm1, %v5800_v54  ;;  %v6439_v57 = vpop.permute.xlu0 %6438 }
 0x5f8   : > { %9179 = vmatmul.mubr.msk.f32.vlgmr.msra.gmra.mrb[16].mxu1 %vm1708_vm2, %v5801_v63 }
 0x5f9   : > { %6035 = vmatprep.mubr.f32.mxu1 %v12457_v31 }
 0x5fb   : > { %v5778_v43 = vpop.permute.xlu1 %5777  ;;  %v11841_v15 = vpop.permute.xlu0 %6791 }
 0x5fc   : > { %v5788_v26 = vsel %vm2587_vm3, %v5776_v25, %v5778_v43 }
 0x5fd   : > { %v5797_v59 = vmul.f32 %v5788_v26, %v10974_v29  ;;  %v9176_v29 = vld [vmem:[%s12512_s21 + $0x10] sm:$0xf]  ;;  %v6798_v26 = vsel %vm3589_vm5, %v11819_v17, %v11765_v0  ;;  %v6800_v0 = vsel %vm3589_vm5, %v11841_v15, %v11813_v9 }
 0x5ff   : > { %v6433_v60 = vpop.permute.xlu1 %6432  ;;  %v11843_v52 = vpop.permute.xlu0 %7144 }
 0x603   : > { %v11847_v46 = vpop.permute.xlu1 %6785  ;;  %v5780_v50 = vpop.permute.xlu0 %5779 }
 0x604   : > { %v5786_v54 = vsel %vm2587_vm3, %v5780_v50, %v5782_v45  ;;  %v5787_v41 = vsel %vm2587_vm3, %v5778_v43, %v5780_v50  ;;  %v6799_v50 = vsel %vm3589_vm5, %v11813_v9, %v11819_v17  ;;  %v12520_v9 = vld [vmem:[#allocation28_spill] sm:$0xff] }
 0x605   : > { %v5798_v49 = vmul.f32 %v5787_v41, %v10970_v34  ;;  %v5799_v38 = vmul.f32 %v5786_v54, %v10978_v35  ;;  %v6444_v34 = vsel %vm3227_vm4, %v11753_v16, %v11762_v23  ;;  %v6446_v35 = vsel %vm3227_vm4, %v6425_v44, %v6427_v48 }
 0x607   : > { %v11856_v8 = vpop.permute.xlu1 %7138  ;;  %9183 = vmatprep.subr.msk.mxu1 %vm1712_vm1, %v5798_v49  ;;  %9187 = vmatpush1.msk.msra.mxu0 %vm1712_vm1, %v5799_v38  ;;  %v11860_v25 = vpop.permute.xlu0 %7495  ;;  %v12519_v38 = vld [vmem:[#allocation25_spill] sm:$0xff] }
 0x608   : > { %9184 = vmatpush1.msk.msra.mxu1 %vm1712_vm1, %v5797_v59  ;;  %9188 = vmatmul.mubr.msk.f32.vlgmr.msra.gmra.mrb[22].mxu0 %vm1708_vm2, %v5801_v63 }
 0x609   : > { %9192 = vmatprep.subr.msk.mxu0 %vm1712_vm1, %v11621_v12  ;;  %9185 = vmatmul.mubr.msk.f32.vlgmr.msra.gmra.mrb[18].mxu1 %vm1708_vm2, %v5801_v63  ;;  %v6451_v63 = vmul.f32 %v6444_v34, %v11011_v1  ;;  %v6449_v12 = vmul.f32 %v6446_v35, %v11041_v20  ;;  %v6803_v34 = vmul.f32 %v6798_v26, %v12519_v38 }
 0x60a   : > { %9189 = vmatprep.subr.msk.mxu1 %vm1712_vm1, %v11641_v10  ;;  %9193 = vmatpush1.msk.msra.mxu0 %vm1712_vm1, %v11615_v2  ;;  %v6445_v2 = vsel %vm3227_vm4, %v6427_v48, %v11753_v16  ;;  %v6447_v10 = vsel %vm3227_vm4, %v6439_v57, %v6425_v44  ;;  %v12515_v44 = vld [vmem:[#allocation23_spill] sm:$0xff]  ;;  %v6796_v35 = vsel %vm3589_vm5, %v11774_v39, %v11847_v46 }
 0x60b   : > { %9190 = vmatpush1.msk.msra.mxu1 %vm1712_vm1, %v11639_v3  ;;  %9198 = vmatprep.subr.msk.mxu0 %vm1712_vm1, %v11669_v53  ;;  %v11884_v43 = vpop.permute.xlu1 %7491  ;;  %v11886_v45 = vpop.permute.xlu0 %7838  ;;  %v6440_v3 = vsel %vm3227_vm4, %v11815_v58, %v6439_v57  ;;  %v6450_v53 = vmul.f32 %v6445_v2, %v11030_v32  ;;  %v6448_v57 = vmul.f32 %v6447_v10, %v11052_v27 }
 0x60c   : > { %6275 = vmatprep.mubr.f32.mxu0 %v12457_v31  ;;  %9195 = vmatprep.subr.msk.mxu1 %vm1712_vm1, %v11689_v19  ;;  %v6443_v32 = vsel %vm3227_vm4, %v11762_v23, %v6433_v60  ;;  %v9201_v19 = vld [vmem:[%s12512_s21 + $0x4] sm:$0xf] }
 0x60d   : > { %6204 = vmatprep.mubr.f32.mxu1 %v12457_v31  ;;  %9194 = vmatmul.mubr.msk.f32.vlgmr.msra.gmra.mrb[20].mxu0 %vm1708_vm2, %v9176_v29 }
 0x60e   : > { %9199 = vmatpush1.msk.msra.mxu0 %vm1712_vm1, %v11647_v40  ;;  %9191 = vmatmul.mubr.msk.f32.vlgmr.msra.gmra.mrb[16].mxu1 %vm1708_vm2, %v9176_v29  ;;  %v6455_v40 = vmul.f32 %v6440_v3, %v12515_v44 }
 0x60f   : > { %9196 = vmatpush1.msk.msra.mxu1 %vm1712_vm1, %v11679_v37  ;;  %9205 = vmatprep.subr.msk.mxu0 %vm1712_vm1, %v6451_v63  ;;  %v11909_v1 = vpop.permute.xlu1 %7497  ;;  %v11911_v20 = vpop.permute.xlu0 %7842 }
 0x610   : > { %9202 = vmatprep.subr.msk.mxu1 %vm1712_vm1, %v6449_v12  ;;  %6417 = vmatprep.mubr.f32.mxu0 %v12457_v31  ;;  %v7499_v38 = vsel %vm4313_vm7, %v11860_v25, %v11909_v1 }
 0x611   : > { %6346 = vmatprep.mubr.f32.mxu1 %v12457_v31  ;;  %9200 = vmatmul.mubr.msk.f32.vlgmr.msra.gmra.mrb[22].mxu0 %vm1708_vm2, %v9176_v29 }
 0x612   : > { %9206 = vmatpush1.msk.msra.mxu0 %vm1712_vm1, %v6450_v53  ;;  %9197 = vmatmul.mubr.msk.f32.vlgmr.msra.gmra.mrb[18].mxu1 %vm1708_vm2, %v9176_v29  ;;  %v7151_v53 = vsel %vm3951_vm6, %v11827_v62, %v11776_v28  ;;  %v7153_v28 = vsel %vm3951_vm6, %v11843_v52, %v11817_v5 }
 0x613   : > { %9203 = vmatpush1.msk.msra.mxu1 %vm1712_vm1, %v6448_v57  ;;  %9211 = vmatprep.subr.msk.mxu0 %vm1712_vm1, %v6455_v40  ;;  %v11927_v37 = vpop.permute.xlu1 %7840  ;;  %v6435_v27 = vpop.permute.xlu0 %6434  ;;  %v7149_v40 = vsel %vm3951_vm6, %v11784_v24, %v11856_v8 }
 0x614   : > { %6620 = vmatprep.mubr.f32.mxu0 %v12457_v31  ;;  %v6441_v16 = vsel %vm3227_vm4, %v6435_v27, %v11815_v58  ;;  %v6442_v23 = vsel %vm3227_vm4, %v6433_v60, %v6435_v27  ;;  %6549 = vmatprep.mubr.f32.mxu1 %v12457_v31  ;;  %v12516_v58 = vld [vmem:[#allocation26_spill] sm:$0xff]  ;;  %v6793_v60 = vsel %vm3589_vm5, %v11823_v55, %v11841_v15 }
 0x615   : > { %v6453_v48 = vmul.f32 %v6442_v23, %v11071_v6  ;;  %v6454_v59 = vmul.f32 %v6441_v16, %v11075_v33  ;;  %v6452_v54 = vmul.f32 %v6443_v32, %v12516_v58  ;;  %9207 = vmatmul.mubr.msk.f32.vlgmr.msra.gmra.mrb[20].mxu0 %vm1708_vm2, %v9201_v19  ;;  %v12517_v6 = vld [vmem:[#allocation24_spill] sm:$0xff]  ;;  %v6801_v15 = vmul.f32 %v6800_v0, %v11150_v14  ;;  %v9214_v14 = vld [vmem:[%s12512_s21 + $0x8] sm:$0xf] }
 0x616   : > { %9204 = vmatmul.mubr.msk.f32.vlgmr.msra.gmra.mrb[16].mxu1 %vm1708_vm2, %v9201_v19  ;;  %v6804_v33 = vmul.f32 %v11782_v61, %v12517_v6  ;;  %6762 = vmatprep.mubr.f32.mxu0 %v12457_v31  ;;  %v12518_v61 = vld [vmem:[#allocation27_spill] sm:$0xff]  ;;  %v6808_v29 = vmul.f32 %v6793_v60, %v12520_v9  ;;  %v7502_v27 = vsel %vm4313_vm7, %v11786_v56, %v11884_v43  ;;  %v12523_v56 = vld [vmem:[#allocation22_spill] sm:$0xff]  ;;  %v12529_v60 = vld [vmem:[#allocation32_spill] sm:$0xff] }
 0x617   : > { %v11962_v17 = vpop.permute.xlu1 %7844  ;;  %9208 = vmatprep.subr.msk.mxu1 %vm1712_vm1, %v6453_v48  ;;  %9212 = vmatpush1.msk.msra.mxu0 %vm1712_vm1, %v6454_v59  ;;  %v11966_v41 = vpop.permute.xlu0 %7836  ;;  %v6802_v49 = vmul.f32 %v6799_v50, %v12518_v61  ;;  %v7504_v48 = vsel %vm4313_vm7, %v12523_v56, %v11747_v21  ;;  %v12524_v59 = vld [vmem:[#allocation34_spill] sm:$0xff]  ;;  %v12528_v6 = vld [vmem:[#allocation19_spill] sm:$0xff] }
 0x618   : > { %9209 = vmatpush1.msk.msra.mxu1 %vm1712_vm1, %v6452_v54  ;;  %6691 = vmatprep.mubr.f32.mxu1 %v12457_v31  ;;  %v7158_v26 = vmul.f32 %v7149_v40, %v12524_v59  ;;  %v12527_v54 = vld [vmem:[#allocation33_spill] sm:$0xff]  ;;  %v7508_v0 = vmul.f32 %v7504_v48, %v12529_v60  ;;  %v12530_v61 = vld [vmem:[#allocation35_spill] sm:$0xff]  ;;  %v7855_v9 = vsel %vm4675_vm8, %v11911_v20, %v11962_v17 }
 0x619   : > { %9218 = vmatprep.subr.msk.mxu0 %vm1712_vm1, %v6804_v33  ;;  %9213 = vmatmul.mubr.msk.f32.vlgmr.msra.gmra.mrb[22].mxu0 %vm1708_vm2, %v9201_v19  ;;  %v7509_v33 = vmul.f32 %v12528_v6, %v12527_v54  ;;  %v12542_v59 = vld [vmem:[#allocation45_spill] sm:$0xff]  ;;  %v12545_v60 = vld [vmem:[#allocation47_spill] sm:$0xff] }
 0x61a   : > { %9210 = vmatmul.mubr.msk.f32.vlgmr.msra.gmra.mrb[18].mxu1 %vm1708_vm2, %v9201_v19  ;;  %9215 = vmatprep.subr.msk.mxu1 %vm1712_vm1, %v6802_v49 }
 0x61b   : > { %9219 = vmatpush1.msk.msra.mxu0 %vm1712_vm1, %v6803_v34  ;;  %v11984_v63 = vpop.permute.xlu1 %7850  ;;  %v6788_v2 = vpop.permute.xlu0 %6787  ;;  %9216 = vmatpush1.msk.msra.mxu1 %vm1712_vm1, %v6801_v15  ;;  %v12531_v34 = vld [vmem:[#allocation20_spill] sm:$0xff] }
 0x61c   : > { %9224 = vmatprep.subr.msk.mxu0 %vm1712_vm1, %v6808_v29  ;;  %v6794_v12 = vsel %vm3589_vm5, %v6788_v2, %v11823_v55  ;;  %v6795_v39 = vsel %vm3589_vm5, %v11847_v46, %v6788_v2  ;;  %6973 = vmatprep.mubr.f32.mxu0 %v12457_v31  ;;  %v7152_v55 = vsel %vm3951_vm6, %v11817_v5, %v11827_v62 }
 0x61d   : > { %v6806_v3 = vmul.f32 %v6795_v39, %v11154_v36  ;;  %v6807_v10 = vmul.f32 %v6794_v12, %v11158_v18  ;;  %6902 = vmatprep.mubr.f32.mxu1 %v12457_v31  ;;  %v6805_v46 = vmul.f32 %v6796_v35, %v11196_v30  ;;  %9220 = vmatmul.mubr.msk.f32.vlgmr.msra.gmra.mrb[20].mxu0 %vm1708_vm2, %v9214_v14  ;;  %v12532_v12 = vld [vmem:[#allocation36_spill] sm:$0xff] }
 0x61e   : > { %9217 = vmatmul.mubr.msk.f32.vlgmr.msra.gmra.mrb[16].mxu1 %vm1708_vm2, %v9214_v14  ;;  %v7157_v36 = vmul.f32 %v11792_v7, %v11145_v51  ;;  %v7146_v18 = vsel %vm3951_vm6, %v11835_v22, %v11843_v52  ;;  %7115 = vmatprep.mubr.f32.mxu0 %v12457_v31  ;;  %v7155_v51 = vmul.f32 %v7152_v55, %v11192_v11  ;;  %v12521_v7 = vld [vmem:[#allocation29_spill] sm:$0xff]  ;;  %v12522_v52 = vld [vmem:[#allocation30_spill] sm:$0xff] }
 0x61f   : > { %v12022_v62 = vpop.permute.xlu1 %8193  ;;  %9221 = vmatprep.subr.msk.mxu1 %vm1712_vm1, %v6806_v3  ;;  %9225 = vmatpush1.msk.msra.mxu0 %vm1712_vm1, %v6807_v10  ;;  %v12026_v30 = vpop.permute.xlu0 %7848  ;;  %v7156_v57 = vmul.f32 %v7151_v53, %v12521_v7  ;;  %v7154_v5 = vmul.f32 %v7153_v28, %v11226_v42  ;;  %v7161_v44 = vmul.f32 %v7146_v18, %v12522_v52  ;;  %v9227_v42 = vld [vmem:[%s12512_s21 + $0xc] sm:$0xf]  ;;  %v12538_v52 = vld [vmem:[#allocation43_spill] sm:$0xff] }
 0x620   : > { %9222 = vmatpush1.msk.msra.mxu1 %vm1712_vm1, %v6805_v46  ;;  %7044 = vmatprep.mubr.f32.mxu1 %v12457_v31  ;;  %v7513_v39 = vmul.f32 %v7499_v38, %v12532_v12  ;;  %v12533_v3 = vld [vmem:[#allocation37_spill] sm:$0xff]  ;;  %v12534_v53 = vld [vmem:[#allocation38_spill] sm:$0xff]  ;;  %v7856_v46 = vsel %vm4675_vm8, %v11927_v37, %v11911_v20  ;;  %v7852_v40 = vsel %vm4675_vm8, %v12026_v30, %v11984_v63  ;;  %v12548_v38 = vld [vmem:[#allocation48_spill] sm:$0xff] }
 0x621   : > { %9231 = vmatprep.subr.msk.mxu0 %vm1712_vm1, %v7157_v36  ;;  %9226 = vmatmul.mubr.msk.f32.vlgmr.msra.gmra.mrb[22].mxu0 %vm1708_vm2, %v9214_v14  ;;  %v12535_v36 = vld [vmem:[#allocation17_spill] sm:$0xff] }
 0x622   : > { %9223 = vmatmul.mubr.msk.f32.vlgmr.msra.gmra.mrb[18].mxu1 %vm1708_vm2, %v9214_v14  ;;  %9228 = vmatprep.subr.msk.mxu1 %vm1712_vm1, %v7155_v51  ;;  %v7863_v18 = vmul.f32 %v7855_v9, %v12535_v36  ;;  %v7858_v51 = vsel %vm4675_vm8, %v11966_v41, %v11886_v45 }
 0x623   : > { %9232 = vmatpush1.msk.msra.mxu0 %vm1712_vm1, %v7156_v57  ;;  %v12044_v11 = vpop.permute.xlu1 %8197  ;;  %v7141_v32 = vpop.permute.xlu0 %7140  ;;  %9229 = vmatpush1.msk.msra.mxu1 %vm1712_vm1, %v7154_v5  ;;  %v12537_v57 = vld [vmem:[#allocation39_spill] sm:$0xff] }
 0x624   : > { %9237 = vmatprep.subr.msk.mxu0 %vm1712_vm1, %v7161_v44  ;;  %v7147_v24 = vsel %vm3951_vm6, %v7141_v32, %v11835_v22  ;;  %v7148_v19 = vsel %vm3951_vm6, %v11856_v8, %v7141_v32  ;;  %7326 = vmatprep.mubr.f32.mxu0 %v12457_v31  ;;  %v12525_v22 = vld [vmem:[#allocation21_spill] sm:$0xff]  ;;  %v12526_v8 = vld [vmem:[#allocation31_spill] sm:$0xff] }
 0x625   : > { %v7159_v16 = vmul.f32 %v7148_v19, %v11239_v47  ;;  %v7160_v23 = vmul.f32 %v7147_v24, %v11243_v4  ;;  %7255 = vmatprep.mubr.f32.mxu1 %v12457_v31  ;;  %9233 = vmatmul.mubr.msk.f32.vlgmr.msra.gmra.mrb[20].mxu0 %vm1708_vm2, %v9227_v42  ;;  %v7505_v47 = vsel %vm4313_vm7, %v12525_v22, %v12523_v56  ;;  %v12541_v56 = vld [vmem:[#allocation44_spill] sm:$0xff] }
 0x626   : > { %9230 = vmatmul.mubr.msk.f32.vlgmr.msra.gmra.mrb[16].mxu1 %vm1708_vm2, %v9227_v42  ;;  %v7510_v4 = vmul.f32 %v7502_v27, %v12526_v8  ;;  %v7506_v50 = vsel %vm4313_vm7, %v11909_v1, %v12525_v22  ;;  %7468 = vmatprep.mubr.f32.mxu0 %v12457_v31  ;;  %v7507_v49 = vmul.f32 %v7505_v47, %v12530_v61  ;;  %v9240_v1 = vld [vmem:[%s12512_s21 + $0x14] sm:$0xf]  ;;  %v12546_v61 = vld [vmem:[#allocation49_spill] sm:$0xff] }
 0x627   : > { %v12081_v58 = vpop.permute.xlu1 %8203  ;;  %9234 = vmatprep.subr.msk.mxu1 %vm1712_vm1, %v7159_v16  ;;  %9238 = vmatpush1.msk.msra.mxu0 %vm1712_vm1, %v7160_v23  ;;  %v12085_v21 = vpop.permute.xlu0 %8191  ;;  %v7514_v15 = vmul.f32 %v7506_v50, %v12531_v34  ;;  %v12540_v16 = vld [vmem:[#allocation42_spill] sm:$0xff] }
 0x628   : > { %9235 = vmatpush1.msk.msra.mxu1 %vm1712_vm1, %v7158_v26  ;;  %7397 = vmatprep.mubr.f32.mxu1 %v12457_v31  ;;  %v7866_v23 = vmul.f32 %v7852_v40, %v12540_v16  ;;  %v12543_v47 = vld [vmem:[#allocation18_spill] sm:$0xff] }
 0x629   : > { %9244 = vmatprep.subr.msk.mxu0 %vm1712_vm1, %v7510_v4  ;;  %9239 = vmatmul.mubr.msk.f32.vlgmr.msra.gmra.mrb[22].mxu0 %vm1708_vm2, %v9227_v42 }
 0x62a   : > { %9236 = vmatmul.mubr.msk.f32.vlgmr.msra.gmra.mrb[18].mxu1 %vm1708_vm2, %v9227_v42  ;;  %9241 = vmatprep.subr.msk.mxu1 %vm1712_vm1, %v7508_v0 }
 0x62b   : > { %9245 = vmatpush1.msk.msra.mxu0 %vm1712_vm1, %v7509_v33  ;;  %v7494_v29 = vpop.permute.xlu1 %7493  ;;  %v8196_v35 = vpop.permute.xlu0 %8195  ;;  %9242 = vmatpush1.msk.msra.mxu1 %vm1712_vm1, %v7507_v49 }
 0x62c   : > { %9250 = vmatprep.subr.msk.mxu0 %vm1712_vm1, %v7514_v15  ;;  %v7500_v2 = vsel %vm4313_vm7, %v7494_v29, %v11860_v25  ;;  %v7501_v14 = vsel %vm4313_vm7, %v11884_v43, %v7494_v29  ;;  %7679 = vmatprep.mubr.f32.mxu0 %v12457_v31  ;;  %v7857_v25 = vsel %vm4675_vm8, %v11886_v45, %v11927_v37  ;;  %v12536_v37 = vld [vmem:[#allocation40_spill] sm:$0xff]  ;;  %v12539_v45 = vld [vmem:[#allocation41_spill] sm:$0xff] }
 0x62d   : > { %v7511_v10 = vmul.f32 %v7501_v14, %v12533_v3  ;;  %v7512_v55 = vmul.f32 %v7500_v2, %v12534_v53  ;;  %7608 = vmatprep.mubr.f32.mxu1 %v12457_v31  ;;  %9246 = vmatmul.mubr.msk.f32.vlgmr.msra.gmra.mrb[20].mxu0 %vm1708_vm2, %v9240_v1  ;;  %v7859_v43 = vsel %vm4675_vm8, %v11984_v63, %v11966_v41  ;;  %v9253_v63 = vld [vmem:[%s12512_s21 + $0x18] sm:$0xf]  ;;  %v9266_v29 = vld [vmem:[%s12512_s21 + $0x1c] sm:$0xf]  ;;  %v12551_v53 = vld [vmem:[#allocation53_spill] sm:$0xff] }
 0x62e   : > { %9251 = vmatpush1.msk.msra.mxu0 %vm1712_vm1, %v7513_v39  ;;  %9243 = vmatmul.mubr.msk.f32.vlgmr.msra.gmra.mrb[16].mxu1 %vm1708_vm2, %v9240_v1  ;;  %v7862_v7 = vmul.f32 %v7856_v46, %v12536_v37  ;;  %v7861_v5 = vmul.f32 %v7857_v25, %v12537_v57  ;;  %v7867_v44 = vmul.f32 %v7859_v43, %v12538_v52  ;;  %v12549_v14 = vld [vmem:[#allocation51_spill] sm:$0xff]  ;;  %v12550_v39 = vld [vmem:[#allocation52_spill] sm:$0xff]  ;;  %v12552_v46 = vld [vmem:[#allocation54_spill] sm:$0xff] }
 0x62f   : > { %v12140_v20 = vpop.permute.xlu1 %8546  ;;  %v8190_v28 = vpop.permute.xlu0 %8189  ;;  %9257 = vmatprep.subr.msk.mxu0 %vm1712_vm1, %v7863_v18  ;;  %9247 = vmatprep.subr.msk.mxu1 %vm1712_vm1, %v7512_v55  ;;  %v7860_v41 = vmul.f32 %v7858_v51, %v12539_v45  ;;  %v8208_v32 = vsel %vm5037_vm9, %v8196_v35, %v12044_v11  ;;  %v8209_v22 = vsel %vm5037_vm9, %v12022_v62, %v8196_v35  ;;  %v9279_v52 = vld [vmem:[%s12512_s21 + $0x20] sm:$0xf] }
 0x630   : > { %7821 = vmatprep.mubr.f32.mxu0 %v12457_v31  ;;  %9248 = vmatpush1.msk.msra.mxu1 %vm1712_vm1, %v7511_v10  ;;  %v8212_v8 = vsel %vm5037_vm9, %v12081_v58, %v8190_v28  ;;  %v8211_v54 = vsel %vm5037_vm9, %v8190_v28, %v12085_v21  ;;  %v12553_v28 = vld [vmem:[#allocation58_spill] sm:$0xff] }
 0x631   : > { %7750 = vmatprep.mubr.f32.mxu1 %v12457_v31  ;;  %9252 = vmatmul.mubr.msk.f32.vlgmr.msra.gmra.mrb[22].mxu0 %vm1708_vm2, %v9240_v1  ;;  %v8220_v49 = vmul.f32 %v8212_v8, %v12546_v61 }
 0x632   : > { %9258 = vmatpush1.msk.msra.mxu0 %vm1712_vm1, %v7862_v7  ;;  %9249 = vmatmul.mubr.msk.f32.vlgmr.msra.gmra.mrb[18].mxu1 %vm1708_vm2, %v9240_v1 }
 0x633   : > { %v7847_v42 = vpop.permute.xlu1 %7846  ;;  %v8202_v27 = vpop.permute.xlu0 %8201  ;;  %9254 = vmatprep.subr.msk.mxu1 %vm1712_vm1, %v7861_v5  ;;  %9263 = vmatprep.subr.msk.mxu0 %vm1712_vm1, %v7867_v44 }
 0x634   : > { %v7853_v24 = vsel %vm4675_vm8, %v7847_v42, %v12026_v30  ;;  %v7854_v19 = vsel %vm4675_vm8, %v11962_v17, %v7847_v42  ;;  %9255 = vmatpush1.msk.msra.mxu1 %vm1712_vm1, %v7860_v41  ;;  %8032 = vmatprep.mubr.f32.mxu0 %v12457_v31  ;;  %v8216_v30 = vmul.f32 %v8208_v32, %v12543_v47  ;;  %v12555_v41 = vld [vmem:[#allocation57_spill] sm:$0xff]  ;;  %v12556_v42 = vld [vmem:[#allocation60_spill] sm:$0xff] }
 0x635   : > { %v7864_v48 = vmul.f32 %v7854_v19, %v12541_v56  ;;  %v7865_v26 = vmul.f32 %v7853_v24, %v12542_v59  ;;  %7961 = vmatprep.mubr.f32.mxu1 %v12457_v31  ;;  %9259 = vmatmul.mubr.msk.f32.vlgmr.msra.gmra.mrb[20].mxu0 %vm1708_vm2, %v9253_v63  ;;  %v8210_v17 = vsel %vm5037_vm9, %v12085_v21, %v12022_v62  ;;  %v12544_v62 = vld [vmem:[#allocation46_spill] sm:$0xff]  ;;  %v12558_v19 = vld [vmem:[#allocation59_spill] sm:$0xff] }
 0x636   : > { %9264 = vmatpush1.msk.msra.mxu0 %vm1712_vm1, %v7866_v23  ;;  %9256 = vmatmul.mubr.msk.f32.vlgmr.msra.gmra.mrb[16].mxu1 %vm1708_vm2, %v9253_v63  ;;  %v8205_v6 = vsel %vm5037_vm9, %v8202_v27, %v12081_v58  ;;  %v8215_v33 = vmul.f32 %v8209_v22, %v12544_v62  ;;  %v8214_v0 = vmul.f32 %v8210_v17, %v12545_v60  ;;  %v12547_v21 = vld [vmem:[#allocation50_spill] sm:$0xff] }
 0x637   : > { %v8551_v4 = vpop.permute.xlu1 %8550  ;;  %v8545_v50 = vpop.permute.xlu0 %8544  ;;  %9270 = vmatprep.subr.msk.mxu0 %vm1712_vm1, %v8216_v30  ;;  %9260 = vmatprep.subr.msk.mxu1 %vm1712_vm1, %v7865_v26  ;;  %v8213_v58 = vmul.f32 %v8211_v54, %v12547_v21  ;;  %v8219_v34 = vmul.f32 %v8205_v6, %v12548_v38 }
 0x638   : > { %8174 = vmatprep.mubr.f32.mxu0 %v12457_v31  ;;  %9261 = vmatpush1.msk.msra.mxu1 %vm1712_vm1, %v7864_v48 }
 0x639   : > { %8103 = vmatprep.mubr.f32.mxu1 %v12457_v31  ;;  %9265 = vmatmul.mubr.msk.f32.vlgmr.msra.gmra.mrb[22].mxu0 %vm1708_vm2, %v9253_v63 }
 0x63a   : > { %9271 = vmatpush1.msk.msra.mxu0 %vm1712_vm1, %v8215_v33  ;;  %9262 = vmatmul.mubr.msk.f32.vlgmr.msra.gmra.mrb[18].mxu1 %vm1708_vm2, %v9253_v63  ;;  %v12557_v63 = vld [vmem:[#allocation56_spill] sm:$0xff] }
 0x63b   : > { %v8200_v15 = vpop.permute.xlu1 %8199  ;;  %v8549_v9 = vpop.permute.xlu0 %8548  ;;  %9267 = vmatprep.subr.msk.mxu1 %vm1712_vm1, %v8214_v0  ;;  %9276 = vmatprep.subr.msk.mxu0 %vm1712_vm1, %v8220_v49 }
 0x63c   : > { %v8206_v35 = vsel %vm5037_vm9, %v8200_v15, %v8202_v27  ;;  %v8207_v1 = vsel %vm5037_vm9, %v12044_v11, %v8200_v15  ;;  %v8561_v2 = vsel %vm5399_vm10, %v8549_v9, %v8551_v4  ;;  %9268 = vmatpush1.msk.msra.mxu1 %vm1712_vm1, %v8213_v58  ;;  %8385 = vmatprep.mubr.f32.mxu0 %v12457_v31 }
 0x63d   : > { %v8217_v12 = vmul.f32 %v8207_v1, %v12549_v14  ;;  %v8218_v3 = vmul.f32 %v8206_v35, %v12550_v39  ;;  %v8562_v10 = vsel %vm5399_vm10, %v12140_v20, %v8549_v9  ;;  %v8569_v55 = vmul.f32 %v12551_v53, %v8561_v2  ;;  %8314 = vmatprep.mubr.f32.mxu1 %v12457_v31 }
 0x63e   : > { %9272 = vmatmul.mubr.msk.f32.vlgmr.msra.gmra.mrb[20].mxu0 %vm1708_vm2, %v9266_v29  ;;  %v8563_v11 = vsel %vm5399_vm10, %v8545_v50, %v12140_v20  ;;  %v8568_v36 = vmul.f32 %v12552_v46, %v8562_v10  ;;  %9269 = vmatmul.mubr.msk.f32.vlgmr.msra.gmra.mrb[16].mxu1 %vm1708_vm2, %v9266_v29  ;;  %v12554_v20 = vld [vmem:[#allocation55_spill] sm:$0xff] }
 0x63f   : > { %9277 = vmatpush1.msk.msra.mxu0 %vm1712_vm1, %v8219_v34  ;;  %v8553_v18 = vpop.permute.xlu1 %8552  ;;  %v8543_v25 = vpop.permute.xlu0 %8542  ;;  %9273 = vmatprep.subr.msk.mxu1 %vm1712_vm1, %v8218_v3  ;;  %v8567_v37 = vmul.f32 %v12554_v20, %v8563_v11 }
 0x640   : > { %8527 = vmatprep.mubr.f32.mxu0 %v12457_v31  ;;  %v8564_v43 = vsel %vm5399_vm10, %v8543_v25, %v8545_v50  ;;  %9283 = vmatprep.subr.msk.mxu0 %vm1712_vm1, %v8569_v55  ;;  %v8560_v7 = vsel %vm5399_vm10, %v8551_v4, %v8553_v18 }
 0x641   : > { %v8566_v51 = vmul.f32 %v12553_v28, %v8564_v43  ;;  %9274 = vmatpush1.msk.msra.mxu1 %vm1712_vm1, %v8217_v12  ;;  %8456 = vmatprep.mubr.f32.mxu1 %v12457_v31  ;;  %v8570_v16 = vmul.f32 %v12558_v19, %v8560_v7 }
 0x642   : > { %9278 = vmatmul.mubr.msk.f32.vlgmr.msra.gmra.mrb[22].mxu0 %vm1708_vm2, %v9266_v29  ;;  %9275 = vmatmul.mubr.msk.f32.vlgmr.msra.gmra.mrb[18].mxu1 %vm1708_vm2, %v9266_v29 }
 0x643   : > { %9284 = vmatpush1.msk.msra.mxu0 %vm1712_vm1, %v8568_v36  ;;  %v8557_v57 = vpop.permute.xlu1 %8556  ;;  %v8555_v5 = vpop.permute.xlu0 %8554  ;;  %9280 = vmatprep.subr.msk.mxu1 %vm1712_vm1, %v8567_v37 }
 0x644   : > { %v8565_v44 = vsel %vm5399_vm10, %v8557_v57, %v8543_v25  ;;  %8738 = vmatprep.mubr.f32.mxu0 %v12457_v31  ;;  %v8558_v40 = vsel %vm5399_vm10, %v8555_v5, %v8557_v57  ;;  %v8559_v45 = vsel %vm5399_vm10, %v8553_v18, %v8555_v5  ;;  %9281 = vmatpush1.msk.msra.mxu1 %vm1712_vm1, %v8566_v51 }
 0x645   : > { %v8573_v32 = vmul.f32 %v12555_v41, %v8565_v44  ;;  %v8571_v27 = vmul.f32 %v12556_v42, %v8559_v45  ;;  %v8572_v24 = vmul.f32 %v12557_v63, %v8558_v40  ;;  %8667 = vmatprep.mubr.f32.mxu1 %v12457_v31 }
 0x646   : > { %9285 = vmatmul.mubr.msk.f32.vlgmr.msra.gmra.mrb[20].mxu0 %vm1708_vm2, %v9279_v52  ;;  %9282 = vmatmul.mubr.msk.f32.vlgmr.msra.gmra.mrb[16].mxu1 %vm1708_vm2, %v9279_v52 }
 0x647   : > { %9286 = vmatprep.subr.msk.mxu1 %vm1712_vm1, %v8571_v27  ;;  %9289 = vmatprep.subr.msk.mxu0 %vm1712_vm1, %v8573_v32 }
 0x648   : > { %9287 = vmatpush1.msk.msra.mxu1 %vm1712_vm1, %v8570_v16  ;;  %8809 = vmatprep.mubr.f32.mxu1 %v12457_v31 }
 0x649   : > { %9290 = vmatpush1.msk.msra.mxu0 %vm1712_vm1, %v8572_v24  ;;  %8880 = vmatprep.mubr.f32.mxu0 %v12457_v31 }
 0x64a   : > { %9288 = vmatmul.mubr.msk.f32.vlgmr.msra.gmra.mrb[18].mxu1 %vm1708_vm2, %v9279_v52  ;;  %9291 = vmatmul.mubr.msk.f32.vlgmr.msra.gmra.mrb[22].mxu0 %vm1708_vm2, %v9279_v52 }
 0x654   : > { %v8898_v13 = vpop.permute.xlu0 %8897 }
 0x719   : > { %v8740_v23 = vpop.f32.mrb[20].mxu0  ;;  %v8669_v48 = vpop.f32.mrb[16].mxu1 }
 0x71a   : > { %v8902_v56 = vadd.f32 %v8898_v13, %v8740_v23  ;;  %v8742_v59 = vpop.f32.mrb[21].mxu0  ;;  %v8900_v26 = vadd.f32 %v8898_v13, %v8669_v48  ;;  %v8671_v47 = vpop.f32.mrb[17].mxu1 }
 0x71b   : > { %v8903_v22 = vadd.f32 %v8898_v13, %v8742_v59  ;;  %v8901_v17 = vadd.f32 %v8898_v13, %v8671_v47 }
 0x71c   : > { %v8910_v30 = vmax.f32 %v8902_v56, 0.0  ;;  %v8908_v8 = vmax.f32 %v8900_v26, 0.0 }
 0x71d   : > { %v8911_v4 = vmax.f32 %v8903_v22, 0.0  ;;  %v8909_v50 = vmax.f32 %v8901_v17, 0.0  ;;  %v8811_v31 = vpop.f32.mrb[18].mxu1  ;;  %v8882_v54 = vpop.f32.mrb[22].mxu0 }
 0x71e   : > { %v8904_v62 = vadd.f32 %v8898_v13, %v8811_v31  ;;  %v8906_v33 = vadd.f32 %v8898_v13, %v8882_v54  ;;  %v8813_v60 = vpop.f32.mrb[19].mxu1  ;;  %v8884_v0 = vpop.f32.mrb[23].mxu0 }
 0x71f   : > { %v8925_v6 = vcombine.low %v8910_v30, %v8911_v4  ;;  %v8924_v61 = vcombine.low %v8908_v8, %v8909_v50  ;;  %v8905_v49 = vadd.f32 %v8898_v13, %v8813_v60  ;;  %v8907_v21 = vadd.f32 %v8898_v13, %v8884_v0 }
 0x720   : > { %v8912_v58 = vmax.f32 %v8904_v62, 0.0  ;;  %v8914_v38 = vmax.f32 %v8906_v33, 0.0 }
 0x721   : > { %8933 = vst [vmem:[%s606_s30 + $0x8] sm:$0xff] %v8925_v6  ;;  %8932 = vst [vmem:[%s606_s30] sm:$0xff] %v8924_v61  ;;  %v8913_v34 = vmax.f32 %v8905_v49, 0.0  ;;  %v8915_v15 = vmax.f32 %v8907_v21, 0.0 }
 0x723   : > { %v8926_v9 = vcombine.low %v8912_v58, %v8913_v34  ;;  %v8927_v29 = vcombine.low %v8914_v38, %v8915_v15 }
 0x725   : > { %8934 = vst [vmem:[%s606_s30 + $0x10] sm:$0xff] %v8926_v9  ;;  %8935 = vst [vmem:[%s606_s30 + $0x18] sm:$0xff] %v8927_v29 }
 0x726   : > { %9987 = shalt.err (!%p9984_p2)
}
 0x727   : > { %s9988_s2 = scalar_lea.hbm %s12290_s18, 512  ;;  %s9992_s14 = scalar_lea.hbm %s12560_s29, 1024 }
 0x728   : > { %p9989_p8 = scmp.ne.s32.totalorder %s12290_s18, %s9988_s2  ;;  %p9993_p11 = scmp.lt.u32.totalorder %s12290_s18, %s12560_s29 }
 0x729   : > { %p9994_p1 = scmp.lt.u32.totalorder %s9992_s14, %s9988_s2  ;;  %p9996_p6 = scmp.lt.u32.totalorder %s9988_s2, %s12290_s18 }
 0x72a   : > { %p9990_p4 = pnand %p9989_p8, %p12561_p7 }
 0x72b   : > { %p9995_p5 = por %p9994_p1, %p9993_p11 }
 0x72c   : > { %p9991_p10 = pneg %p9990_p4 }
 0x72d   : > { %p9997_p9 = por %p9996_p6, %p9995_p5 }
 0x72f   : > { %p9998_p12 = pnand %p9997_p9, %p9991_p10 }
 0x731   : > { %10001 = shalt.err (!%p9998_p12)
}
 0x732   : > { %9710 = dma.vmem_to_hbm [thread:$0]  (%p12561_p7), %s12292_s0, 512, %s12290_s18, %s8937_s16  }
 0x733 PF: > { %s8963_s1 = sand.u32 1, %s10036_s23   ;;  %p12562_p3 = scmp.ne.s32.totalorder %s12439_s20, 0 }
 0x734   : > { %p12563_p13 = scmp.ge.s32.totalorder %s10048_s26, 2  ;;  %s8964_s28 = scalar_lea.sflag [#allocation5], %s8963_s1 }
 0x736   : > { %p9730_p0 = pnand %p12563_p13, %p12562_p3 }
 0x738   : > { %10031 = dma.done.wait (!%p9730_p0), %s8964_s28, 512  }
 0x739   : > { %10033 = vsyncadd (!%p9730_p0), %s8964_s28, 4294966784  ;;  %p33_p2 = scmp.ge.s32.totalorder %s10297_s17, 4   ;;  %s12564_s23 = smov %s10040_s24 }
 0x73a   : > { %s12565_s24 = smov %s10044_s25  ;;  %s12566_s25 = smov %s10308_s27 }
 0x73b   : > { %s12567_s26 = smov %s10297_s17  ;;  %35 = sbr.rel (!%p33_p2) target bundleno = 17 (0x11), region = 164 }
 0x742   :  { %8969 = vsyncpa [#allocation4], 1 }
 0x743   :  { %8971 = vsyncpa [#allocation4 + $0x1], 1 }
 0x744   :  { %8972 = vsyncpa [#allocation7], 1 }
 0x745   :  { %8973 = vsyncpa [#allocation10], 1 }
 0x746   :  { %8974 = vsyncpa [#allocation5], 1 }
 0x747   :  { %8976 = vsyncpa [#allocation5 + $0x1], 1 }

</bundles_post_ra>
